<compile_context>
chip_gen: v7x
topology: tpu7x:2x2x1
jax: 0.10.0
libtpu: 0.0.40
codegen_flags: <defaults>
</compile_context>

<pallas_src>
import math

import jax
import jax.numpy as jnp
import numpy as np
from jax.experimental import pallas as pl
from jax.experimental.pallas import tpu as pltpu

EPS = 1e-8
BN_EPS = 1e-5
NUM_PART_FEATS = 7  # px, py, pz, E, pt, rapidity, phi
HIGHEST = jax.lax.Precision.HIGHEST


def _gelu_exact(x):
    # nn.GELU() default (erf-based, approximate='none')
    return 0.5 * x * (1.0 + jax.lax.erf(x / math.sqrt(2.0)))


def _pairwise_feats_pp6(pi, pj, eps=EPS):
    """pairwise_lv_fts_pp with num_outputs=6.

    pi / pj: tuples (px, py, pz, E, pt, rap, phi) of broadcast-compatible
    arrays.  Returns the 6 features in the torch order:
    [lnkt, lnz, lndelta, lnm2, lnds2, costheta].
    Pure jnp -> shared by the Pallas kernel and the reference so both paths
    use the exact same formulation.
    """
    pxi, pyi, pzi, ei, pti, rapi, phii = pi
    pxj, pyj, pzj, ej, ptj, rapj, phij = pj

    two_pi = 2.0 * math.pi
    # delta_phi: (a - b + pi) % (2*pi) - pi   (python-style remainder)
    d = phii - phij + math.pi
    dphi = d - two_pi * jnp.floor(d / two_pi) - math.pi
    drap = rapi - rapj
    delta = jnp.sqrt(drap * drap + dphi * dphi)
    lndelta = jnp.log(jnp.maximum(delta, eps))

    ptmin = jnp.minimum(pti, ptj)
    lnkt = jnp.log(jnp.maximum(ptmin * delta, eps))
    lnz = jnp.log(jnp.maximum(ptmin / jnp.maximum(pti + ptj, eps), eps))

    pxs, pys, pzs, es = pxi + pxj, pyi + pyj, pzi + pzj, ei + ej
    p2s = pxs * pxs + pys * pys + pzs * pzs
    lnm2 = jnp.log(jnp.maximum(es * es - p2s, eps))

    dpx, dpy, dpz, de = pxi - pxj, pyi - pyj, pzi - pzj, ei - ej
    lnds2 = jnp.log(jnp.maximum(-(de * de - (dpx * dpx + dpy * dpy + dpz * dpz)), eps))

    # boost xj into the rest frame of xij, then cos(theta) vs xij direction.
    inv_es = 1.0 / jnp.maximum(es, eps)          # one divide instead of three
    bx, by, bz = -pxs * inv_es, -pys * inv_es, -pzs * inv_es
    b2 = bx * bx + by * by + bz * bz
    gamma = 1.0 / jnp.sqrt(jnp.maximum(1.0 - b2, eps))
    # exact-zero check mirrors torch's masked_fill_(b2 == 0, 0)
    b2_safe = jnp.where(b2 == 0.0, 1.0, b2)
    gamma2 = jnp.where(b2 == 0.0, 0.0, (gamma - 1.0) / b2_safe)
    bp = pxj * bx + pyj * by + pzj * bz
    coef = gamma2 * bp + ej * gamma              # v = pj + coef * b
    vx = pxj + coef * bx
    vy = pyj + coef * by
    vz = pzj + coef * bz
    vn = jnp.maximum(jnp.sqrt(vx * vx + vy * vy + vz * vz), eps)
    sn = jnp.maximum(jnp.sqrt(p2s), eps)
    costheta = (vx * pxs + vy * pys + vz * pzs) / (vn * sn)

    # Exact self-pair (xi == xj): the boosted momentum v is analytically 0 and
    # torch's p3_norm clamp then yields costheta = 0 in exact arithmetic; in
    # f32 the cancellation leaves implementation-dependent rounding noise, so
    # snap to the exact-arithmetic value (applied identically in kernel and
    # reference; off-diagonal pairs are untouched).
    same = (dpx == 0.0) & (dpy == 0.0) & (dpz == 0.0) & (de == 0.0)
    costheta = jnp.where(same, 0.0, costheta)

    return [lnkt, lnz, lndelta, lnm2, lnds2, costheta]


# ----------------------------------------------------------------------------
# Pallas kernel: one grid step = (batch b, i-row tile it) of TI rows.
#   * pairwise features computed lane/sublane-dense on (TI, S) tiles,
#   * layer 1 = exact-f32 broadcast FMAs (K=6 is too small for the MXU),
#     layers 2/3 = channel-major (32, S) MXU matmuls per row,
#   * output block is (1, D3, TI*S): channels on sublanes, flattened (i, j)
#     pairs on lanes -> every store is layout-matched and static-offset, and
#     the HBM writeback is already in the PyTorch layout (free reshape).
# ----------------------------------------------------------------------------
def pair_embed_kernel(fcs_ref, fsc_ref, w1_ref, b1_ref, w2_ref, b2_ref,
                      w3_ref, b3_ref, out_ref):
    S = fcs_ref.shape[2]
    TI = fsc_ref.shape[1]

    fj = fcs_ref[0]                    # (F, S)   feature-major, all particles j
    fi = fsc_ref[0]                    # (TI, F)  the TI particles i of this tile

    pj = tuple(fj[k:k + 1, :] for k in range(NUM_PART_FEATS))   # each (1, S)
    pi = tuple(fi[:, k:k + 1] for k in range(NUM_PART_FEATS))   # each (TI, 1)

    feats = _pairwise_feats_pp6(pi, pj)          # 6 x (TI, S), lane-dense

    w1 = w1_ref[...]; b1 = b1_ref[...]           # (D1, 6),  (D1, 1)
    w2 = w2_ref[...]; b2 = b2_ref[...]           # (D2, D1), (D2, 1)
    w3 = w3_ref[...]; b3 = b3_ref[...]           # (D3, D2), (D3, 1)
    w1_cols = [w1[:, k:k + 1] for k in range(6)]  # hoisted (D1, 1) columns

    # Statically unrolled row loop (TI is small): all slices and store offsets
    # are static, and the scheduler can overlap row t+1's MXU push with row
    # t's GELU/VALU work.
    for t in range(TI):
        h = b1                                                     # (D1, 1)
        for k in range(6):
            h = h + w1_cols[k] * feats[k][t:t + 1, :]              # (D1, S)
        h = _gelu_exact(h)
        h = jnp.dot(w2, h, preferred_element_type=jnp.float32,
                    precision=HIGHEST) + b2                        # (D2, S)
        h = _gelu_exact(h)
        y = jnp.dot(w3, h, preferred_element_type=jnp.float32,
                    precision=HIGHEST) + b3                        # (D3, S)
        # channels on sublanes, j on lanes: layout-matched dense store.
        out_ref[0, :, t * S:(t + 1) * S] = y.astype(out_ref.dtype)


def per_particle_features(x):
    """x: (B, 4, S) f32 with channels (px, py, pz, E) -> (B, 7, S)."""
    px, py, pz, e = x[:, 0], x[:, 1], x[:, 2], x[:, 3]
    pt = jnp.sqrt(px * px + py * py)
    rap = 0.5 * jnp.log(1.0 + 2.0 * pz / jnp.maximum(e - pz, 1e-20))
    phi = jnp.arctan2(py, px)
    return jnp.stack([px, py, pz, e, pt, rap, phi], axis=1)


def _pick_row_tile(S):
    """Row-tile TI for the (i-rows x all-j) pair tile.

    * TI must divide S and the flattened output-block lane extent TI*S must
      be a multiple of 128 unless the tile covers the whole S*S axis (TI==S)
      — Mosaic's (8, 128) block-shape rule.
    * TI = 8 keeps the ~10-15 live (TI, S) f32 temporaries of the feature
      phase within the 64-vreg budget, keeps the statically unrolled row loop
      compact, and keeps the double-buffered (1, D3, TI*S) output block tiny
      (2 MiB even at S=2048) — safe under v5e's 16 MiB scoped VMEM and v7x's
      64 MiB physical VMEM.  Per-step work (TI*S pairs) already dwarfs the
      ~0.35 us grid-step overhead.
    """
    if S % 8 == 0 and (8 * S) % 128 == 0:   # i.e. S % 16 == 0
        return 8
    # Small / odd S: a single row tile covering all rows (TI*S == S*S is the
    # full lane extent, satisfying the (8,128) rule via "full dim").
    return S


def pair_embed_forward(x, folded_params):
    """PairEmbed dense forward. x: (B, 4, S); returns (B, out_dim, S, S)."""
    B, _, S = x.shape
    feat_cs = per_particle_features(x).astype(jnp.float32)   # (B, F, S)
    feat_sc = jnp.transpose(feat_cs, (0, 2, 1))              # (B, S, F) (tiny)
    w1, b1, w2, b2, w3, b3 = folded_params
    F = NUM_PART_FEATS
    D1, D2, D3 = w1.shape[0], w2.shape[0], w3.shape[0]
    TI = _pick_row_tile(S)

    out_flat = pl.pallas_call(
        pair_embed_kernel,
        out_shape=jax.ShapeDtypeStruct((B, D3, S * S), jnp.float32),
        grid=(B, S // TI),
        in_specs=[
            pl.BlockSpec((1, F, S), lambda b, it: (b, 0, 0)),
            pl.BlockSpec((1, TI, F), lambda b, it: (b, it, 0)),
            pl.BlockSpec((D1, 6), lambda b, it: (0, 0)),
            pl.BlockSpec((D1, 1), lambda b, it: (0, 0)),
            pl.BlockSpec((D2, D1), lambda b, it: (0, 0)),
            pl.BlockSpec((D2, 1), lambda b, it: (0, 0)),
            pl.BlockSpec((D3, D2), lambda b, it: (0, 0)),
            pl.BlockSpec((D3, 1), lambda b, it: (0, 0)),
        ],
        out_specs=pl.BlockSpec((1, D3, TI * S), lambda b, it: (b, 0, it)),
        compiler_params=pltpu.CompilerParams(
            dimension_semantics=("parallel", "parallel"),
            vmem_limit_bytes=32 * 1024 * 1024),
    )(feat_cs, feat_sc, w1, b1, w2, b2, w3, b3)

    # (B, D3, S*S) row-major  ->  (B, D3, S_i, S_j): metadata-only reshape,
    # no HBM transpose pass (this replaces the old jnp.transpose).
    return out_flat.reshape(B, D3, S, S)


# ----------------------------------------------------------------------------
# Deterministic parameter setup (shapes per PairEmbed.__init__) + BN folding.
# ----------------------------------------------------------------------------
def init_raw_params(key, in_dim=6, dims=(32, 32, 32)):
    kit = iter(jax.random.split(key, 32))

    def bn_params(dim):
        g = jax.random.uniform(next(kit), (dim,), minval=0.8, maxval=1.2)
        b = 0.1 * jax.random.normal(next(kit), (dim,))
        m = 0.1 * jax.random.normal(next(kit), (dim,))
        v = jax.random.uniform(next(kit), (dim,), minval=0.5, maxval=1.5)
        return (g, b, m, v)

    params = {"bn0": bn_params(in_dim)}
    prev = in_dim
    for li, d in enumerate(dims, start=1):
        W = jax.random.normal(next(kit), (d, prev)) / math.sqrt(prev)  # Conv1d(prev,d,1)
        bb = 0.05 * jax.random.normal(next(kit), (d,))
        params[f"conv{li}"] = (W, bb)
        params[f"bn{li}"] = bn_params(d)
        prev = d
    return params


def fold_params(raw):
    """Fold BN0 + (Conv1d+BN)x3 into three affine layers, (out, in) oriented."""
    def affine(bn):
        g, b, m, v = bn
        s = g / jnp.sqrt(v + BN_EPS)
        return s, b - m * s

    s0, c0 = affine(raw["bn0"])
    W1, bb1 = raw["conv1"]; s1, c1 = affine(raw["bn1"])
    w1 = s1[:, None] * W1 * s0[None, :]                       # (D1, 6)
    b1 = (s1 * (W1 @ c0 + bb1) + c1)[:, None]                 # (D1, 1)
    W2, bb2 = raw["conv2"]; s2, c2 = affine(raw["bn2"])
    w2 = s2[:, None] * W2                                     # (D2, D1)
    b2 = (s2 * bb2 + c2)[:, None]
    W3, bb3 = raw["conv3"]; s3, c3 = affine(raw["bn3"])
    w3 = s3[:, None] * W3                                     # (D3, D2)
    b3 = (s3 * bb3 + c3)[:, None]
    return tuple(jnp.asarray(t, jnp.float32) for t in (w1, b1, w2, b2, w3, b3))


# ----------------------------------------------------------------------------
# Pure-JAX reference (un-folded BN/Conv, matches the PyTorch dense forward).
# All matmuls at HIGHEST precision so it is a trustworthy f32 ground truth.
# ----------------------------------------------------------------------------
def reference_forward(x, raw):
    B, _, S = x.shape
    feat = per_particle_features(x)                      # (B, 7, S)
    comps = [feat[:, k] for k in range(NUM_PART_FEATS)]  # each (B, S)
    pi = tuple(c[:, :, None] for c in comps)             # (B, S, 1) ~ x.unsqueeze(-1)
    pj = tuple(c[:, None, :] for c in comps)             # (B, 1, S) ~ x.unsqueeze(-2)
    fts = _pairwise_feats_pp6(pi, pj)                    # 6 x (B, S, S)
    h = jnp.stack(fts, axis=1).reshape(B, 6, S * S)

    def bn(t, p):
        g, b, m, v = p
        s = g / jnp.sqrt(v + BN_EPS)
        return t * s[None, :, None] + (b - m * s)[None, :, None]

    def conv(t, p):
        W, bb = p
        return jnp.einsum("oc,bcp->bop", W, t,
                          precision=HIGHEST) + bb[None, :, None]

    h = bn(h, raw["bn0"])
    h = conv(h, raw["conv1"]); h = bn(h, raw["bn1"]); h = _gelu_exact(h)
    h = conv(h, raw["conv2"]); h = bn(h, raw["bn2"]); h = _gelu_exact(h)
    h = conv(h, raw["conv3"]); h = bn(h, raw["bn3"])
    return h.reshape(B, -1, S, S)


if __name__ == "__main__":
    key = jax.random.PRNGKey(0)
    k_p, k_m, k_w = jax.random.split(key, 3)

    B, S = 2, 8
    dims = (32, 32, 32)

    # physical 4-vectors: E = sqrt(|p|^2 + m^2) with m > 0
    p3 = jax.random.normal(k_p, (B, 3, S), dtype=jnp.float32)
    m = jax.random.uniform(k_m, (B, 1, S), minval=0.1, maxval=1.0, dtype=jnp.float32)
    e = jnp.sqrt(jnp.sum(p3 * p3, axis=1, keepdims=True) + m * m)
    x = jnp.concatenate([p3, e], axis=1)   # (B, 4, S): (px, py, pz, E)

    raw = init_raw_params(k_w, in_dim=6, dims=dims)
    folded = fold_params(raw)

    y = pair_embed_forward(x, folded)
    y = jax.block_until_ready(y)
    assert y.shape == (B, dims[-1], S, S), y.shape

    ref = reference_forward(x, raw)
    np.testing.assert_allclose(np.asarray(y), np.asarray(ref), rtol=2e-3, atol=2e-3)

    print("KERNEL_OK")
</pallas_src>

<mosaic_0001>
module attributes {stable_mosaic.version = 11 : i64} {
  func.func @pair_embed_kernel(%arg0: i32, %arg1: i32, %arg2: memref<1x7x8xf32, #tpu.memory_space<vmem>>, %arg3: memref<1x8x7xf32, #tpu.memory_space<vmem>>, %arg4: memref<32x6xf32, #tpu.memory_space<vmem>>, %arg5: memref<32x1xf32, #tpu.memory_space<vmem>>, %arg6: memref<32x32xf32, #tpu.memory_space<vmem>>, %arg7: memref<32x1xf32, #tpu.memory_space<vmem>>, %arg8: memref<32x32xf32, #tpu.memory_space<vmem>>, %arg9: memref<32x1xf32, #tpu.memory_space<vmem>>, %arg10: memref<1x32x64xf32, #tpu.memory_space<vmem>>) attributes {dimension_semantics = [#tpu.dimension_semantics<parallel>, #tpu.dimension_semantics<parallel>], iteration_bounds = array<i64: 2, 1>, scalar_prefetch = 0 : i64, scratch_operands = 0 : i64, tpu.core_type = #tpu.core_type<tc>, window_params = [{transform_indices = @transform_0, window_bounds = array<i64: 1, 7, 8>}, {transform_indices = @transform_1, window_bounds = array<i64: 1, 8, 7>}, {pipeline_mode = #tpu.pipeline_mode<synchronous>, transform_indices = @transform_2, window_bounds = array<i64: 32, 6>}, {pipeline_mode = #tpu.pipeline_mode<synchronous>, transform_indices = @transform_3, window_bounds = array<i64: 32, 1>}, {pipeline_mode = #tpu.pipeline_mode<synchronous>, transform_indices = @transform_4, window_bounds = array<i64: 32, 32>}, {pipeline_mode = #tpu.pipeline_mode<synchronous>, transform_indices = @transform_5, window_bounds = array<i64: 32, 1>}, {pipeline_mode = #tpu.pipeline_mode<synchronous>, transform_indices = @transform_6, window_bounds = array<i64: 32, 32>}, {pipeline_mode = #tpu.pipeline_mode<synchronous>, transform_indices = @transform_7, window_bounds = array<i64: 32, 1>}, {transform_indices = @transform_8, window_bounds = array<i64: 1, 32, 64>}]} {
    %c0 = arith.constant 0 : index
    %c0_0 = arith.constant 0 : index
    %c0_1 = arith.constant 0 : index
    %0 = vector.load %arg2[%c0, %c0_0, %c0_1] : memref<1x7x8xf32, #tpu.memory_space<vmem>>, vector<1x7x8xf32>
    %1 = vector.shape_cast %0 : vector<1x7x8xf32> to vector<7x8xf32>
    %c0_2 = arith.constant 0 : index
    %c0_3 = arith.constant 0 : index
    %c0_4 = arith.constant 0 : index
    %2 = vector.load %arg3[%c0_2, %c0_3, %c0_4] : memref<1x8x7xf32, #tpu.memory_space<vmem>>, vector<1x8x7xf32>
    %3 = vector.shape_cast %2 : vector<1x8x7xf32> to vector<8x7xf32>
    %4 = vector.extract_strided_slice %1 {offsets = [0, 0], sizes = [1, 8], strides = [1, 1]} : vector<7x8xf32> to vector<1x8xf32>
    %5 = vector.extract_strided_slice %1 {offsets = [1, 0], sizes = [1, 8], strides = [1, 1]} : vector<7x8xf32> to vector<1x8xf32>
    %6 = vector.extract_strided_slice %1 {offsets = [2, 0], sizes = [1, 8], strides = [1, 1]} : vector<7x8xf32> to vector<1x8xf32>
    %7 = vector.extract_strided_slice %1 {offsets = [3, 0], sizes = [1, 8], strides = [1, 1]} : vector<7x8xf32> to vector<1x8xf32>
    %8 = vector.extract_strided_slice %1 {offsets = [4, 0], sizes = [1, 8], strides = [1, 1]} : vector<7x8xf32> to vector<1x8xf32>
    %9 = vector.extract_strided_slice %1 {offsets = [5, 0], sizes = [1, 8], strides = [1, 1]} : vector<7x8xf32> to vector<1x8xf32>
    %10 = vector.extract_strided_slice %1 {offsets = [6, 0], sizes = [1, 8], strides = [1, 1]} : vector<7x8xf32> to vector<1x8xf32>
    %11 = vector.extract_strided_slice %3 {offsets = [0, 0], sizes = [8, 1], strides = [1, 1]} : vector<8x7xf32> to vector<8x1xf32>
    %12 = vector.extract_strided_slice %3 {offsets = [0, 1], sizes = [8, 1], strides = [1, 1]} : vector<8x7xf32> to vector<8x1xf32>
    %13 = vector.extract_strided_slice %3 {offsets = [0, 2], sizes = [8, 1], strides = [1, 1]} : vector<8x7xf32> to vector<8x1xf32>
    %14 = vector.extract_strided_slice %3 {offsets = [0, 3], sizes = [8, 1], strides = [1, 1]} : vector<8x7xf32> to vector<8x1xf32>
    %15 = vector.extract_strided_slice %3 {offsets = [0, 4], sizes = [8, 1], strides = [1, 1]} : vector<8x7xf32> to vector<8x1xf32>
    %16 = vector.extract_strided_slice %3 {offsets = [0, 5], sizes = [8, 1], strides = [1, 1]} : vector<8x7xf32> to vector<8x1xf32>
    %17 = vector.extract_strided_slice %3 {offsets = [0, 6], sizes = [8, 1], strides = [1, 1]} : vector<8x7xf32> to vector<8x1xf32>
    %18 = vector.broadcast %17 : vector<8x1xf32> to vector<8x8xf32>
    %19 = vector.broadcast %10 : vector<1x8xf32> to vector<8x8xf32>
    %20 = arith.subf %18, %19 : vector<8x8xf32>
    %cst = arith.constant 3.14159274 : f32
    %21 = vector.broadcast %cst : f32 to vector<8x8xf32>
    %22 = arith.addf %20, %21 : vector<8x8xf32>
    %cst_5 = arith.constant 6.28318548 : f32
    %23 = vector.broadcast %cst_5 : f32 to vector<8x8xf32>
    %24 = arith.divf %22, %23 : vector<8x8xf32>
    %25 = math.floor %24 : vector<8x8xf32>
    %cst_6 = arith.constant 6.28318548 : f32
    %26 = vector.broadcast %cst_6 : f32 to vector<8x8xf32>
    %27 = arith.mulf %26, %25 : vector<8x8xf32>
    %28 = arith.subf %22, %27 : vector<8x8xf32>
    %cst_7 = arith.constant 3.14159274 : f32
    %29 = vector.broadcast %cst_7 : f32 to vector<8x8xf32>
    %30 = arith.subf %28, %29 : vector<8x8xf32>
    %31 = vector.broadcast %16 : vector<8x1xf32> to vector<8x8xf32>
    %32 = vector.broadcast %9 : vector<1x8xf32> to vector<8x8xf32>
    %33 = arith.subf %31, %32 : vector<8x8xf32>
    %34 = arith.mulf %33, %33 : vector<8x8xf32>
    %35 = arith.mulf %30, %30 : vector<8x8xf32>
    %36 = arith.addf %34, %35 : vector<8x8xf32>
    %37 = math.sqrt %36 : vector<8x8xf32>
    %cst_8 = arith.constant 9.99999993E-9 : f32
    %38 = vector.broadcast %cst_8 : f32 to vector<8x8xf32>
    %39 = arith.maximumf %37, %38 : vector<8x8xf32>
    %40 = math.log %39 : vector<8x8xf32>
    %41 = vector.broadcast %15 : vector<8x1xf32> to vector<8x8xf32>
    %42 = vector.broadcast %8 : vector<1x8xf32> to vector<8x8xf32>
    %43 = arith.minimumf %41, %42 : vector<8x8xf32>
    %44 = arith.mulf %43, %37 : vector<8x8xf32>
    %cst_9 = arith.constant 9.99999993E-9 : f32
    %45 = vector.broadcast %cst_9 : f32 to vector<8x8xf32>
    %46 = arith.maximumf %44, %45 : vector<8x8xf32>
    %47 = math.log %46 : vector<8x8xf32>
    %48 = vector.broadcast %15 : vector<8x1xf32> to vector<8x8xf32>
    %49 = vector.broadcast %8 : vector<1x8xf32> to vector<8x8xf32>
    %50 = arith.addf %48, %49 : vector<8x8xf32>
    %cst_10 = arith.constant 9.99999993E-9 : f32
    %51 = vector.broadcast %cst_10 : f32 to vector<8x8xf32>
    %52 = arith.maximumf %50, %51 : vector<8x8xf32>
    %53 = arith.divf %43, %52 : vector<8x8xf32>
    %cst_11 = arith.constant 9.99999993E-9 : f32
    %54 = vector.broadcast %cst_11 : f32 to vector<8x8xf32>
    %55 = arith.maximumf %53, %54 : vector<8x8xf32>
    %56 = math.log %55 : vector<8x8xf32>
    %57 = vector.broadcast %11 : vector<8x1xf32> to vector<8x8xf32>
    %58 = vector.broadcast %4 : vector<1x8xf32> to vector<8x8xf32>
    %59 = arith.addf %57, %58 : vector<8x8xf32>
    %60 = vector.broadcast %12 : vector<8x1xf32> to vector<8x8xf32>
    %61 = vector.broadcast %5 : vector<1x8xf32> to vector<8x8xf32>
    %62 = arith.addf %60, %61 : vector<8x8xf32>
    %63 = vector.broadcast %13 : vector<8x1xf32> to vector<8x8xf32>
    %64 = vector.broadcast %6 : vector<1x8xf32> to vector<8x8xf32>
    %65 = arith.addf %63, %64 : vector<8x8xf32>
    %66 = vector.broadcast %14 : vector<8x1xf32> to vector<8x8xf32>
    %67 = vector.broadcast %7 : vector<1x8xf32> to vector<8x8xf32>
    %68 = arith.addf %66, %67 : vector<8x8xf32>
    %69 = arith.mulf %59, %59 : vector<8x8xf32>
    %70 = arith.mulf %62, %62 : vector<8x8xf32>
    %71 = arith.addf %69, %70 : vector<8x8xf32>
    %72 = arith.mulf %65, %65 : vector<8x8xf32>
    %73 = arith.addf %71, %72 : vector<8x8xf32>
    %74 = arith.mulf %68, %68 : vector<8x8xf32>
    %75 = arith.subf %74, %73 : vector<8x8xf32>
    %cst_12 = arith.constant 9.99999993E-9 : f32
    %76 = vector.broadcast %cst_12 : f32 to vector<8x8xf32>
    %77 = arith.maximumf %75, %76 : vector<8x8xf32>
    %78 = math.log %77 : vector<8x8xf32>
    %79 = vector.broadcast %11 : vector<8x1xf32> to vector<8x8xf32>
    %80 = vector.broadcast %4 : vector<1x8xf32> to vector<8x8xf32>
    %81 = arith.subf %79, %80 : vector<8x8xf32>
    %82 = vector.broadcast %12 : vector<8x1xf32> to vector<8x8xf32>
    %83 = vector.broadcast %5 : vector<1x8xf32> to vector<8x8xf32>
    %84 = arith.subf %82, %83 : vector<8x8xf32>
    %85 = vector.broadcast %13 : vector<8x1xf32> to vector<8x8xf32>
    %86 = vector.broadcast %6 : vector<1x8xf32> to vector<8x8xf32>
    %87 = arith.subf %85, %86 : vector<8x8xf32>
    %88 = vector.broadcast %14 : vector<8x1xf32> to vector<8x8xf32>
    %89 = vector.broadcast %7 : vector<1x8xf32> to vector<8x8xf32>
    %90 = arith.subf %88, %89 : vector<8x8xf32>
    %91 = arith.mulf %90, %90 : vector<8x8xf32>
    %92 = arith.mulf %81, %81 : vector<8x8xf32>
    %93 = arith.mulf %84, %84 : vector<8x8xf32>
    %94 = arith.addf %92, %93 : vector<8x8xf32>
    %95 = arith.mulf %87, %87 : vector<8x8xf32>
    %96 = arith.addf %94, %95 : vector<8x8xf32>
    %97 = arith.subf %91, %96 : vector<8x8xf32>
    %cst_13 = arith.constant 0.000000e+00 : f32
    %98 = vector.broadcast %cst_13 : f32 to vector<8x8xf32>
    %99 = arith.subf %98, %97 : vector<8x8xf32>
    %cst_14 = arith.constant 9.99999993E-9 : f32
    %100 = vector.broadcast %cst_14 : f32 to vector<8x8xf32>
    %101 = arith.maximumf %99, %100 : vector<8x8xf32>
    %102 = math.log %101 : vector<8x8xf32>
    %cst_15 = arith.constant 9.99999993E-9 : f32
    %103 = vector.broadcast %cst_15 : f32 to vector<8x8xf32>
    %104 = arith.maximumf %68, %103 : vector<8x8xf32>
    %cst_16 = arith.constant 1.000000e+00 : f32
    %105 = vector.broadcast %cst_16 : f32 to vector<8x8xf32>
    %106 = arith.divf %105, %104 : vector<8x8xf32>
    %cst_17 = arith.constant 0.000000e+00 : f32
    %107 = vector.broadcast %cst_17 : f32 to vector<8x8xf32>
    %108 = arith.subf %107, %59 : vector<8x8xf32>
    %109 = arith.mulf %108, %106 : vector<8x8xf32>
    %cst_18 = arith.constant 0.000000e+00 : f32
    %110 = vector.broadcast %cst_18 : f32 to vector<8x8xf32>
    %111 = arith.subf %110, %62 : vector<8x8xf32>
    %112 = arith.mulf %111, %106 : vector<8x8xf32>
    %cst_19 = arith.constant 0.000000e+00 : f32
    %113 = vector.broadcast %cst_19 : f32 to vector<8x8xf32>
    %114 = arith.subf %113, %65 : vector<8x8xf32>
    %115 = arith.mulf %114, %106 : vector<8x8xf32>
    %116 = arith.mulf %109, %109 : vector<8x8xf32>
    %117 = arith.mulf %112, %112 : vector<8x8xf32>
    %118 = arith.addf %116, %117 : vector<8x8xf32>
    %119 = arith.mulf %115, %115 : vector<8x8xf32>
    %120 = arith.addf %118, %119 : vector<8x8xf32>
    %cst_20 = arith.constant 1.000000e+00 : f32
    %121 = vector.broadcast %cst_20 : f32 to vector<8x8xf32>
    %122 = arith.subf %121, %120 : vector<8x8xf32>
    %cst_21 = arith.constant 9.99999993E-9 : f32
    %123 = vector.broadcast %cst_21 : f32 to vector<8x8xf32>
    %124 = arith.maximumf %122, %123 : vector<8x8xf32>
    %125 = math.sqrt %124 : vector<8x8xf32>
    %cst_22 = arith.constant 1.000000e+00 : f32
    %126 = vector.broadcast %cst_22 : f32 to vector<8x8xf32>
    %127 = arith.divf %126, %125 : vector<8x8xf32>
    %cst_23 = arith.constant 0.000000e+00 : f32
    %128 = vector.broadcast %cst_23 : f32 to vector<8x8xf32>
    %129 = arith.cmpf oeq, %120, %128 : vector<8x8xf32>
    %cst_24 = arith.constant 1.000000e+00 : f32
    %130 = vector.broadcast %cst_24 : f32 to vector<8x8xf32>
    %131 = arith.select %129, %130, %120 : vector<8x8xi1>, vector<8x8xf32>
    %cst_25 = arith.constant 0.000000e+00 : f32
    %132 = vector.broadcast %cst_25 : f32 to vector<8x8xf32>
    %133 = arith.cmpf oeq, %120, %132 : vector<8x8xf32>
    %cst_26 = arith.constant 1.000000e+00 : f32
    %134 = vector.broadcast %cst_26 : f32 to vector<8x8xf32>
    %135 = arith.subf %127, %134 : vector<8x8xf32>
    %136 = arith.divf %135, %131 : vector<8x8xf32>
    %cst_27 = arith.constant 0.000000e+00 : f32
    %137 = vector.broadcast %cst_27 : f32 to vector<8x8xf32>
    %138 = arith.select %133, %137, %136 : vector<8x8xi1>, vector<8x8xf32>
    %139 = vector.broadcast %4 : vector<1x8xf32> to vector<8x8xf32>
    %140 = arith.mulf %139, %109 : vector<8x8xf32>
    %141 = vector.broadcast %5 : vector<1x8xf32> to vector<8x8xf32>
    %142 = arith.mulf %141, %112 : vector<8x8xf32>
    %143 = arith.addf %140, %142 : vector<8x8xf32>
    %144 = vector.broadcast %6 : vector<1x8xf32> to vector<8x8xf32>
    %145 = arith.mulf %144, %115 : vector<8x8xf32>
    %146 = arith.addf %143, %145 : vector<8x8xf32>
    %147 = arith.mulf %138, %146 : vector<8x8xf32>
    %148 = vector.broadcast %7 : vector<1x8xf32> to vector<8x8xf32>
    %149 = arith.mulf %148, %127 : vector<8x8xf32>
    %150 = arith.addf %147, %149 : vector<8x8xf32>
    %151 = arith.mulf %150, %109 : vector<8x8xf32>
    %152 = vector.broadcast %4 : vector<1x8xf32> to vector<8x8xf32>
    %153 = arith.addf %152, %151 : vector<8x8xf32>
    %154 = arith.mulf %150, %112 : vector<8x8xf32>
    %155 = vector.broadcast %5 : vector<1x8xf32> to vector<8x8xf32>
    %156 = arith.addf %155, %154 : vector<8x8xf32>
    %157 = arith.mulf %150, %115 : vector<8x8xf32>
    %158 = vector.broadcast %6 : vector<1x8xf32> to vector<8x8xf32>
    %159 = arith.addf %158, %157 : vector<8x8xf32>
    %160 = arith.mulf %153, %153 : vector<8x8xf32>
    %161 = arith.mulf %156, %156 : vector<8x8xf32>
    %162 = arith.addf %160, %161 : vector<8x8xf32>
    %163 = arith.mulf %159, %159 : vector<8x8xf32>
    %164 = arith.addf %162, %163 : vector<8x8xf32>
    %165 = math.sqrt %164 : vector<8x8xf32>
    %cst_28 = arith.constant 9.99999993E-9 : f32
    %166 = vector.broadcast %cst_28 : f32 to vector<8x8xf32>
    %167 = arith.maximumf %165, %166 : vector<8x8xf32>
    %168 = math.sqrt %73 : vector<8x8xf32>
    %cst_29 = arith.constant 9.99999993E-9 : f32
    %169 = vector.broadcast %cst_29 : f32 to vector<8x8xf32>
    %170 = arith.maximumf %168, %169 : vector<8x8xf32>
    %171 = arith.mulf %153, %59 : vector<8x8xf32>
    %172 = arith.mulf %156, %62 : vector<8x8xf32>
    %173 = arith.addf %171, %172 : vector<8x8xf32>
    %174 = arith.mulf %159, %65 : vector<8x8xf32>
    %175 = arith.addf %173, %174 : vector<8x8xf32>
    %176 = arith.mulf %167, %170 : vector<8x8xf32>
    %177 = arith.divf %175, %176 : vector<8x8xf32>
    %cst_30 = arith.constant 0.000000e+00 : f32
    %178 = vector.broadcast %cst_30 : f32 to vector<8x8xf32>
    %179 = arith.cmpf oeq, %81, %178 : vector<8x8xf32>
    %cst_31 = arith.constant 0.000000e+00 : f32
    %180 = vector.broadcast %cst_31 : f32 to vector<8x8xf32>
    %181 = arith.cmpf oeq, %84, %180 : vector<8x8xf32>
    %182 = arith.andi %179, %181 : vector<8x8xi1>
    %cst_32 = arith.constant 0.000000e+00 : f32
    %183 = vector.broadcast %cst_32 : f32 to vector<8x8xf32>
    %184 = arith.cmpf oeq, %87, %183 : vector<8x8xf32>
    %185 = arith.andi %182, %184 : vector<8x8xi1>
    %cst_33 = arith.constant 0.000000e+00 : f32
    %186 = vector.broadcast %cst_33 : f32 to vector<8x8xf32>
    %187 = arith.cmpf oeq, %90, %186 : vector<8x8xf32>
    %188 = arith.andi %185, %187 : vector<8x8xi1>
    %cst_34 = arith.constant 0.000000e+00 : f32
    %189 = vector.broadcast %cst_34 : f32 to vector<8x8xf32>
    %190 = arith.select %188, %189, %177 : vector<8x8xi1>, vector<8x8xf32>
    %c0_35 = arith.constant 0 : index
    %c0_36 = arith.constant 0 : index
    %191 = vector.load %arg4[%c0_35, %c0_36] : memref<32x6xf32, #tpu.memory_space<vmem>>, vector<32x6xf32>
    %c0_37 = arith.constant 0 : index
    %c0_38 = arith.constant 0 : index
    %192 = vector.load %arg5[%c0_37, %c0_38] : memref<32x1xf32, #tpu.memory_space<vmem>>, vector<32x1xf32>
    %c0_39 = arith.constant 0 : index
    %c0_40 = arith.constant 0 : index
    %193 = vector.load %arg6[%c0_39, %c0_40] : memref<32x32xf32, #tpu.memory_space<vmem>>, vector<32x32xf32>
    %c0_41 = arith.constant 0 : index
    %c0_42 = arith.constant 0 : index
    %194 = vector.load %arg7[%c0_41, %c0_42] : memref<32x1xf32, #tpu.memory_space<vmem>>, vector<32x1xf32>
    %c0_43 = arith.constant 0 : index
    %c0_44 = arith.constant 0 : index
    %195 = vector.load %arg8[%c0_43, %c0_44] : memref<32x32xf32, #tpu.memory_space<vmem>>, vector<32x32xf32>
    %c0_45 = arith.constant 0 : index
    %c0_46 = arith.constant 0 : index
    %196 = vector.load %arg9[%c0_45, %c0_46] : memref<32x1xf32, #tpu.memory_space<vmem>>, vector<32x1xf32>
    %197 = vector.extract_strided_slice %191 {offsets = [0, 0], sizes = [32, 1], strides = [1, 1]} : vector<32x6xf32> to vector<32x1xf32>
    %198 = vector.extract_strided_slice %191 {offsets = [0, 1], sizes = [32, 1], strides = [1, 1]} : vector<32x6xf32> to vector<32x1xf32>
    %199 = vector.extract_strided_slice %191 {offsets = [0, 2], sizes = [32, 1], strides = [1, 1]} : vector<32x6xf32> to vector<32x1xf32>
    %200 = vector.extract_strided_slice %191 {offsets = [0, 3], sizes = [32, 1], strides = [1, 1]} : vector<32x6xf32> to vector<32x1xf32>
    %201 = vector.extract_strided_slice %191 {offsets = [0, 4], sizes = [32, 1], strides = [1, 1]} : vector<32x6xf32> to vector<32x1xf32>
    %202 = vector.extract_strided_slice %191 {offsets = [0, 5], sizes = [32, 1], strides = [1, 1]} : vector<32x6xf32> to vector<32x1xf32>
    %203 = vector.extract_strided_slice %47 {offsets = [0, 0], sizes = [1, 8], strides = [1, 1]} : vector<8x8xf32> to vector<1x8xf32>
    %204 = vector.broadcast %197 : vector<32x1xf32> to vector<32x8xf32>
    %205 = vector.broadcast %203 : vector<1x8xf32> to vector<32x8xf32>
    %206 = arith.mulf %204, %205 : vector<32x8xf32>
    %207 = vector.broadcast %192 : vector<32x1xf32> to vector<32x8xf32>
    %208 = arith.addf %207, %206 : vector<32x8xf32>
    %209 = vector.extract_strided_slice %56 {offsets = [0, 0], sizes = [1, 8], strides = [1, 1]} : vector<8x8xf32> to vector<1x8xf32>
    %210 = vector.broadcast %198 : vector<32x1xf32> to vector<32x8xf32>
    %211 = vector.broadcast %209 : vector<1x8xf32> to vector<32x8xf32>
    %212 = arith.mulf %210, %211 : vector<32x8xf32>
    %213 = arith.addf %208, %212 : vector<32x8xf32>
    %214 = vector.extract_strided_slice %40 {offsets = [0, 0], sizes = [1, 8], strides = [1, 1]} : vector<8x8xf32> to vector<1x8xf32>
    %215 = vector.broadcast %199 : vector<32x1xf32> to vector<32x8xf32>
    %216 = vector.broadcast %214 : vector<1x8xf32> to vector<32x8xf32>
    %217 = arith.mulf %215, %216 : vector<32x8xf32>
    %218 = arith.addf %213, %217 : vector<32x8xf32>
    %219 = vector.extract_strided_slice %78 {offsets = [0, 0], sizes = [1, 8], strides = [1, 1]} : vector<8x8xf32> to vector<1x8xf32>
    %220 = vector.broadcast %200 : vector<32x1xf32> to vector<32x8xf32>
    %221 = vector.broadcast %219 : vector<1x8xf32> to vector<32x8xf32>
    %222 = arith.mulf %220, %221 : vector<32x8xf32>
    %223 = arith.addf %218, %222 : vector<32x8xf32>
    %224 = vector.extract_strided_slice %102 {offsets = [0, 0], sizes = [1, 8], strides = [1, 1]} : vector<8x8xf32> to vector<1x8xf32>
    %225 = vector.broadcast %201 : vector<32x1xf32> to vector<32x8xf32>
    %226 = vector.broadcast %224 : vector<1x8xf32> to vector<32x8xf32>
    %227 = arith.mulf %225, %226 : vector<32x8xf32>
    %228 = arith.addf %223, %227 : vector<32x8xf32>
    %229 = vector.extract_strided_slice %190 {offsets = [0, 0], sizes = [1, 8], strides = [1, 1]} : vector<8x8xf32> to vector<1x8xf32>
    %230 = vector.broadcast %202 : vector<32x1xf32> to vector<32x8xf32>
    %231 = vector.broadcast %229 : vector<1x8xf32> to vector<32x8xf32>
    %232 = arith.mulf %230, %231 : vector<32x8xf32>
    %233 = arith.addf %228, %232 : vector<32x8xf32>
    %cst_47 = arith.constant 5.000000e-01 : f32
    %234 = vector.broadcast %cst_47 : f32 to vector<32x8xf32>
    %235 = arith.mulf %234, %233 : vector<32x8xf32>
    %cst_48 = arith.constant 1.41421354 : f32
    %236 = vector.broadcast %cst_48 : f32 to vector<32x8xf32>
    %237 = arith.divf %233, %236 : vector<32x8xf32>
    %238 = math.erf %237 : vector<32x8xf32>
    %cst_49 = arith.constant 1.000000e+00 : f32
    %239 = vector.broadcast %cst_49 : f32 to vector<32x8xf32>
    %240 = arith.addf %239, %238 : vector<32x8xf32>
    %241 = arith.mulf %235, %240 : vector<32x8xf32>
    %cst_50 = arith.constant dense<0.000000e+00> : vector<32x8xf32>
    %242 = tpu.matmul %193, %241, %cst_50 {dimension_numbers = #tpu.dot_dimension_numbers<[1], [0], [0], [1], [0, 0, 1, 1], [], []>, precision = #tpu.contract_precision<fp32>} : vector<32x32xf32>, vector<32x8xf32>, vector<32x8xf32> -> vector<32x8xf32>
    %243 = vector.broadcast %194 : vector<32x1xf32> to vector<32x8xf32>
    %244 = arith.addf %242, %243 : vector<32x8xf32>
    %cst_51 = arith.constant 5.000000e-01 : f32
    %245 = vector.broadcast %cst_51 : f32 to vector<32x8xf32>
    %246 = arith.mulf %245, %244 : vector<32x8xf32>
    %cst_52 = arith.constant 1.41421354 : f32
    %247 = vector.broadcast %cst_52 : f32 to vector<32x8xf32>
    %248 = arith.divf %244, %247 : vector<32x8xf32>
    %249 = math.erf %248 : vector<32x8xf32>
    %cst_53 = arith.constant 1.000000e+00 : f32
    %250 = vector.broadcast %cst_53 : f32 to vector<32x8xf32>
    %251 = arith.addf %250, %249 : vector<32x8xf32>
    %252 = arith.mulf %246, %251 : vector<32x8xf32>
    %cst_54 = arith.constant dense<0.000000e+00> : vector<32x8xf32>
    %253 = tpu.matmul %195, %252, %cst_54 {dimension_numbers = #tpu.dot_dimension_numbers<[1], [0], [0], [1], [0, 0, 1, 1], [], []>, precision = #tpu.contract_precision<fp32>} : vector<32x32xf32>, vector<32x8xf32>, vector<32x8xf32> -> vector<32x8xf32>
    %254 = vector.broadcast %196 : vector<32x1xf32> to vector<32x8xf32>
    %255 = arith.addf %253, %254 : vector<32x8xf32>
    %c0_55 = arith.constant 0 : index
    %c0_56 = arith.constant 0 : index
    %c0_57 = arith.constant 0 : index
    %256 = vector.load %arg10[%c0_55, %c0_56, %c0_57] : memref<1x32x64xf32, #tpu.memory_space<vmem>>, vector<1x32x8xf32>
    %257 = vector.shape_cast %256 : vector<1x32x8xf32> to vector<32x8xf32>
    %258 = vector.shape_cast %255 : vector<32x8xf32> to vector<1x32x8xf32>
    tpu.vector_store %arg10[%c0_55, %c0_56, %c0_57], %258 {strides = array<i32>} : memref<1x32x64xf32, #tpu.memory_space<vmem>>, vector<1x32x8xf32>,
    %259 = vector.extract_strided_slice %47 {offsets = [1, 0], sizes = [1, 8], strides = [1, 1]} : vector<8x8xf32> to vector<1x8xf32>
    %260 = vector.broadcast %197 : vector<32x1xf32> to vector<32x8xf32>
    %261 = vector.broadcast %259 : vector<1x8xf32> to vector<32x8xf32>
    %262 = arith.mulf %260, %261 : vector<32x8xf32>
    %263 = vector.broadcast %192 : vector<32x1xf32> to vector<32x8xf32>
    %264 = arith.addf %263, %262 : vector<32x8xf32>
    %265 = vector.extract_strided_slice %56 {offsets = [1, 0], sizes = [1, 8], strides = [1, 1]} : vector<8x8xf32> to vector<1x8xf32>
    %266 = vector.broadcast %198 : vector<32x1xf32> to vector<32x8xf32>
    %267 = vector.broadcast %265 : vector<1x8xf32> to vector<32x8xf32>
    %268 = arith.mulf %266, %267 : vector<32x8xf32>
    %269 = arith.addf %264, %268 : vector<32x8xf32>
    %270 = vector.extract_strided_slice %40 {offsets = [1, 0], sizes = [1, 8], strides = [1, 1]} : vector<8x8xf32> to vector<1x8xf32>
    %271 = vector.broadcast %199 : vector<32x1xf32> to vector<32x8xf32>
    %272 = vector.broadcast %270 : vector<1x8xf32> to vector<32x8xf32>
    %273 = arith.mulf %271, %272 : vector<32x8xf32>
    %274 = arith.addf %269, %273 : vector<32x8xf32>
    %275 = vector.extract_strided_slice %78 {offsets = [1, 0], sizes = [1, 8], strides = [1, 1]} : vector<8x8xf32> to vector<1x8xf32>
    %276 = vector.broadcast %200 : vector<32x1xf32> to vector<32x8xf32>
    %277 = vector.broadcast %275 : vector<1x8xf32> to vector<32x8xf32>
    %278 = arith.mulf %276, %277 : vector<32x8xf32>
    %279 = arith.addf %274, %278 : vector<32x8xf32>
    %280 = vector.extract_strided_slice %102 {offsets = [1, 0], sizes = [1, 8], strides = [1, 1]} : vector<8x8xf32> to vector<1x8xf32>
    %281 = vector.broadcast %201 : vector<32x1xf32> to vector<32x8xf32>
    %282 = vector.broadcast %280 : vector<1x8xf32> to vector<32x8xf32>
    %283 = arith.mulf %281, %282 : vector<32x8xf32>
    %284 = arith.addf %279, %283 : vector<32x8xf32>
    %285 = vector.extract_strided_slice %190 {offsets = [1, 0], sizes = [1, 8], strides = [1, 1]} : vector<8x8xf32> to vector<1x8xf32>
    %286 = vector.broadcast %202 : vector<32x1xf32> to vector<32x8xf32>
    %287 = vector.broadcast %285 : vector<1x8xf32> to vector<32x8xf32>
    %288 = arith.mulf %286, %287 : vector<32x8xf32>
    %289 = arith.addf %284, %288 : vector<32x8xf32>
    %cst_58 = arith.constant 5.000000e-01 : f32
    %290 = vector.broadcast %cst_58 : f32 to vector<32x8xf32>
    %291 = arith.mulf %290, %289 : vector<32x8xf32>
    %cst_59 = arith.constant 1.41421354 : f32
    %292 = vector.broadcast %cst_59 : f32 to vector<32x8xf32>
    %293 = arith.divf %289, %292 : vector<32x8xf32>
    %294 = math.erf %293 : vector<32x8xf32>
    %cst_60 = arith.constant 1.000000e+00 : f32
    %295 = vector.broadcast %cst_60 : f32 to vector<32x8xf32>
    %296 = arith.addf %295, %294 : vector<32x8xf32>
    %297 = arith.mulf %291, %296 : vector<32x8xf32>
    %cst_61 = arith.constant dense<0.000000e+00> : vector<32x8xf32>
    %298 = tpu.matmul %193, %297, %cst_61 {dimension_numbers = #tpu.dot_dimension_numbers<[1], [0], [0], [1], [0, 0, 1, 1], [], []>, precision = #tpu.contract_precision<fp32>} : vector<32x32xf32>, vector<32x8xf32>, vector<32x8xf32> -> vector<32x8xf32>
    %299 = vector.broadcast %194 : vector<32x1xf32> to vector<32x8xf32>
    %300 = arith.addf %298, %299 : vector<32x8xf32>
    %cst_62 = arith.constant 5.000000e-01 : f32
    %301 = vector.broadcast %cst_62 : f32 to vector<32x8xf32>
    %302 = arith.mulf %301, %300 : vector<32x8xf32>
    %cst_63 = arith.constant 1.41421354 : f32
    %303 = vector.broadcast %cst_63 : f32 to vector<32x8xf32>
    %304 = arith.divf %300, %303 : vector<32x8xf32>
    %305 = math.erf %304 : vector<32x8xf32>
    %cst_64 = arith.constant 1.000000e+00 : f32
    %306 = vector.broadcast %cst_64 : f32 to vector<32x8xf32>
    %307 = arith.addf %306, %305 : vector<32x8xf32>
    %308 = arith.mulf %302, %307 : vector<32x8xf32>
    %cst_65 = arith.constant dense<0.000000e+00> : vector<32x8xf32>
    %309 = tpu.matmul %195, %308, %cst_65 {dimension_numbers = #tpu.dot_dimension_numbers<[1], [0], [0], [1], [0, 0, 1, 1], [], []>, precision = #tpu.contract_precision<fp32>} : vector<32x32xf32>, vector<32x8xf32>, vector<32x8xf32> -> vector<32x8xf32>
    %310 = vector.broadcast %196 : vector<32x1xf32> to vector<32x8xf32>
    %311 = arith.addf %309, %310 : vector<32x8xf32>
    %c0_66 = arith.constant 0 : index
    %c0_67 = arith.constant 0 : index
    %c8 = arith.constant 8 : index
    %312 = vector.load %arg10[%c0_66, %c0_67, %c8] : memref<1x32x64xf32, #tpu.memory_space<vmem>>, vector<1x32x8xf32>
    %313 = vector.shape_cast %312 : vector<1x32x8xf32> to vector<32x8xf32>
    %314 = vector.shape_cast %311 : vector<32x8xf32> to vector<1x32x8xf32>
    tpu.vector_store %arg10[%c0_66, %c0_67, %c8], %314 {strides = array<i32>} : memref<1x32x64xf32, #tpu.memory_space<vmem>>, vector<1x32x8xf32>,
    %315 = vector.extract_strided_slice %47 {offsets = [2, 0], sizes = [1, 8], strides = [1, 1]} : vector<8x8xf32> to vector<1x8xf32>
    %316 = vector.broadcast %197 : vector<32x1xf32> to vector<32x8xf32>
    %317 = vector.broadcast %315 : vector<1x8xf32> to vector<32x8xf32>
    %318 = arith.mulf %316, %317 : vector<32x8xf32>
    %319 = vector.broadcast %192 : vector<32x1xf32> to vector<32x8xf32>
    %320 = arith.addf %319, %318 : vector<32x8xf32>
    %321 = vector.extract_strided_slice %56 {offsets = [2, 0], sizes = [1, 8], strides = [1, 1]} : vector<8x8xf32> to vector<1x8xf32>
    %322 = vector.broadcast %198 : vector<32x1xf32> to vector<32x8xf32>
    %323 = vector.broadcast %321 : vector<1x8xf32> to vector<32x8xf32>
    %324 = arith.mulf %322, %323 : vector<32x8xf32>
    %325 = arith.addf %320, %324 : vector<32x8xf32>
    %326 = vector.extract_strided_slice %40 {offsets = [2, 0], sizes = [1, 8], strides = [1, 1]} : vector<8x8xf32> to vector<1x8xf32>
    %327 = vector.broadcast %199 : vector<32x1xf32> to vector<32x8xf32>
    %328 = vector.broadcast %326 : vector<1x8xf32> to vector<32x8xf32>
    %329 = arith.mulf %327, %328 : vector<32x8xf32>
    %330 = arith.addf %325, %329 : vector<32x8xf32>
    %331 = vector.extract_strided_slice %78 {offsets = [2, 0], sizes = [1, 8], strides = [1, 1]} : vector<8x8xf32> to vector<1x8xf32>
    %332 = vector.broadcast %200 : vector<32x1xf32> to vector<32x8xf32>
    %333 = vector.broadcast %331 : vector<1x8xf32> to vector<32x8xf32>
    %334 = arith.mulf %332, %333 : vector<32x8xf32>
    %335 = arith.addf %330, %334 : vector<32x8xf32>
    %336 = vector.extract_strided_slice %102 {offsets = [2, 0], sizes = [1, 8], strides = [1, 1]} : vector<8x8xf32> to vector<1x8xf32>
    %337 = vector.broadcast %201 : vector<32x1xf32> to vector<32x8xf32>
    %338 = vector.broadcast %336 : vector<1x8xf32> to vector<32x8xf32>
    %339 = arith.mulf %337, %338 : vector<32x8xf32>
    %340 = arith.addf %335, %339 : vector<32x8xf32>
    %341 = vector.extract_strided_slice %190 {offsets = [2, 0], sizes = [1, 8], strides = [1, 1]} : vector<8x8xf32> to vector<1x8xf32>
    %342 = vector.broadcast %202 : vector<32x1xf32> to vector<32x8xf32>
    %343 = vector.broadcast %341 : vector<1x8xf32> to vector<32x8xf32>
    %344 = arith.mulf %342, %343 : vector<32x8xf32>
    %345 = arith.addf %340, %344 : vector<32x8xf32>
    %cst_68 = arith.constant 5.000000e-01 : f32
    %346 = vector.broadcast %cst_68 : f32 to vector<32x8xf32>
    %347 = arith.mulf %346, %345 : vector<32x8xf32>
    %cst_69 = arith.constant 1.41421354 : f32
    %348 = vector.broadcast %cst_69 : f32 to vector<32x8xf32>
    %349 = arith.divf %345, %348 : vector<32x8xf32>
    %350 = math.erf %349 : vector<32x8xf32>
    %cst_70 = arith.constant 1.000000e+00 : f32
    %351 = vector.broadcast %cst_70 : f32 to vector<32x8xf32>
    %352 = arith.addf %351, %350 : vector<32x8xf32>
    %353 = arith.mulf %347, %352 : vector<32x8xf32>
    %cst_71 = arith.constant dense<0.000000e+00> : vector<32x8xf32>
    %354 = tpu.matmul %193, %353, %cst_71 {dimension_numbers = #tpu.dot_dimension_numbers<[1], [0], [0], [1], [0, 0, 1, 1], [], []>, precision = #tpu.contract_precision<fp32>} : vector<32x32xf32>, vector<32x8xf32>, vector<32x8xf32> -> vector<32x8xf32>
    %355 = vector.broadcast %194 : vector<32x1xf32> to vector<32x8xf32>
    %356 = arith.addf %354, %355 : vector<32x8xf32>
    %cst_72 = arith.constant 5.000000e-01 : f32
    %357 = vector.broadcast %cst_72 : f32 to vector<32x8xf32>
    %358 = arith.mulf %357, %356 : vector<32x8xf32>
    %cst_73 = arith.constant 1.41421354 : f32
    %359 = vector.broadcast %cst_73 : f32 to vector<32x8xf32>
    %360 = arith.divf %356, %359 : vector<32x8xf32>
    %361 = math.erf %360 : vector<32x8xf32>
    %cst_74 = arith.constant 1.000000e+00 : f32
    %362 = vector.broadcast %cst_74 : f32 to vector<32x8xf32>
    %363 = arith.addf %362, %361 : vector<32x8xf32>
    %364 = arith.mulf %358, %363 : vector<32x8xf32>
    %cst_75 = arith.constant dense<0.000000e+00> : vector<32x8xf32>
    %365 = tpu.matmul %195, %364, %cst_75 {dimension_numbers = #tpu.dot_dimension_numbers<[1], [0], [0], [1], [0, 0, 1, 1], [], []>, precision = #tpu.contract_precision<fp32>} : vector<32x32xf32>, vector<32x8xf32>, vector<32x8xf32> -> vector<32x8xf32>
    %366 = vector.broadcast %196 : vector<32x1xf32> to vector<32x8xf32>
    %367 = arith.addf %365, %366 : vector<32x8xf32>
    %c0_76 = arith.constant 0 : index
    %c0_77 = arith.constant 0 : index
    %c16 = arith.constant 16 : index
    %368 = vector.load %arg10[%c0_76, %c0_77, %c16] : memref<1x32x64xf32, #tpu.memory_space<vmem>>, vector<1x32x8xf32>
    %369 = vector.shape_cast %368 : vector<1x32x8xf32> to vector<32x8xf32>
    %370 = vector.shape_cast %367 : vector<32x8xf32> to vector<1x32x8xf32>
    tpu.vector_store %arg10[%c0_76, %c0_77, %c16], %370 {strides = array<i32>} : memref<1x32x64xf32, #tpu.memory_space<vmem>>, vector<1x32x8xf32>,
    %371 = vector.extract_strided_slice %47 {offsets = [3, 0], sizes = [1, 8], strides = [1, 1]} : vector<8x8xf32> to vector<1x8xf32>
    %372 = vector.broadcast %197 : vector<32x1xf32> to vector<32x8xf32>
    %373 = vector.broadcast %371 : vector<1x8xf32> to vector<32x8xf32>
    %374 = arith.mulf %372, %373 : vector<32x8xf32>
    %375 = vector.broadcast %192 : vector<32x1xf32> to vector<32x8xf32>
    %376 = arith.addf %375, %374 : vector<32x8xf32>
    %377 = vector.extract_strided_slice %56 {offsets = [3, 0], sizes = [1, 8], strides = [1, 1]} : vector<8x8xf32> to vector<1x8xf32>
    %378 = vector.broadcast %198 : vector<32x1xf32> to vector<32x8xf32>
    %379 = vector.broadcast %377 : vector<1x8xf32> to vector<32x8xf32>
    %380 = arith.mulf %378, %379 : vector<32x8xf32>
    %381 = arith.addf %376, %380 : vector<32x8xf32>
    %382 = vector.extract_strided_slice %40 {offsets = [3, 0], sizes = [1, 8], strides = [1, 1]} : vector<8x8xf32> to vector<1x8xf32>
    %383 = vector.broadcast %199 : vector<32x1xf32> to vector<32x8xf32>
    %384 = vector.broadcast %382 : vector<1x8xf32> to vector<32x8xf32>
    %385 = arith.mulf %383, %384 : vector<32x8xf32>
    %386 = arith.addf %381, %385 : vector<32x8xf32>
    %387 = vector.extract_strided_slice %78 {offsets = [3, 0], sizes = [1, 8], strides = [1, 1]} : vector<8x8xf32> to vector<1x8xf32>
    %388 = vector.broadcast %200 : vector<32x1xf32> to vector<32x8xf32>
    %389 = vector.broadcast %387 : vector<1x8xf32> to vector<32x8xf32>
    %390 = arith.mulf %388, %389 : vector<32x8xf32>
    %391 = arith.addf %386, %390 : vector<32x8xf32>
    %392 = vector.extract_strided_slice %102 {offsets = [3, 0], sizes = [1, 8], strides = [1, 1]} : vector<8x8xf32> to vector<1x8xf32>
    %393 = vector.broadcast %201 : vector<32x1xf32> to vector<32x8xf32>
    %394 = vector.broadcast %392 : vector<1x8xf32> to vector<32x8xf32>
    %395 = arith.mulf %393, %394 : vector<32x8xf32>
    %396 = arith.addf %391, %395 : vector<32x8xf32>
    %397 = vector.extract_strided_slice %190 {offsets = [3, 0], sizes = [1, 8], strides = [1, 1]} : vector<8x8xf32> to vector<1x8xf32>
    %398 = vector.broadcast %202 : vector<32x1xf32> to vector<32x8xf32>
    %399 = vector.broadcast %397 : vector<1x8xf32> to vector<32x8xf32>
    %400 = arith.mulf %398, %399 : vector<32x8xf32>
    %401 = arith.addf %396, %400 : vector<32x8xf32>
    %cst_78 = arith.constant 5.000000e-01 : f32
    %402 = vector.broadcast %cst_78 : f32 to vector<32x8xf32>
    %403 = arith.mulf %402, %401 : vector<32x8xf32>
    %cst_79 = arith.constant 1.41421354 : f32
    %404 = vector.broadcast %cst_79 : f32 to vector<32x8xf32>
    %405 = arith.divf %401, %404 : vector<32x8xf32>
    %406 = math.erf %405 : vector<32x8xf32>
    %cst_80 = arith.constant 1.000000e+00 : f32
    %407 = vector.broadcast %cst_80 : f32 to vector<32x8xf32>
    %408 = arith.addf %407, %406 : vector<32x8xf32>
    %409 = arith.mulf %403, %408 : vector<32x8xf32>
    %cst_81 = arith.constant dense<0.000000e+00> : vector<32x8xf32>
    %410 = tpu.matmul %193, %409, %cst_81 {dimension_numbers = #tpu.dot_dimension_numbers<[1], [0], [0], [1], [0, 0, 1, 1], [], []>, precision = #tpu.contract_precision<fp32>} : vector<32x32xf32>, vector<32x8xf32>, vector<32x8xf32> -> vector<32x8xf32>
    %411 = vector.broadcast %194 : vector<32x1xf32> to vector<32x8xf32>
    %412 = arith.addf %410, %411 : vector<32x8xf32>
    %cst_82 = arith.constant 5.000000e-01 : f32
    %413 = vector.broadcast %cst_82 : f32 to vector<32x8xf32>
    %414 = arith.mulf %413, %412 : vector<32x8xf32>
    %cst_83 = arith.constant 1.41421354 : f32
    %415 = vector.broadcast %cst_83 : f32 to vector<32x8xf32>
    %416 = arith.divf %412, %415 : vector<32x8xf32>
    %417 = math.erf %416 : vector<32x8xf32>
    %cst_84 = arith.constant 1.000000e+00 : f32
    %418 = vector.broadcast %cst_84 : f32 to vector<32x8xf32>
    %419 = arith.addf %418, %417 : vector<32x8xf32>
    %420 = arith.mulf %414, %419 : vector<32x8xf32>
    %cst_85 = arith.constant dense<0.000000e+00> : vector<32x8xf32>
    %421 = tpu.matmul %195, %420, %cst_85 {dimension_numbers = #tpu.dot_dimension_numbers<[1], [0], [0], [1], [0, 0, 1, 1], [], []>, precision = #tpu.contract_precision<fp32>} : vector<32x32xf32>, vector<32x8xf32>, vector<32x8xf32> -> vector<32x8xf32>
    %422 = vector.broadcast %196 : vector<32x1xf32> to vector<32x8xf32>
    %423 = arith.addf %421, %422 : vector<32x8xf32>
    %c0_86 = arith.constant 0 : index
    %c0_87 = arith.constant 0 : index
    %c24 = arith.constant 24 : index
    %424 = vector.load %arg10[%c0_86, %c0_87, %c24] : memref<1x32x64xf32, #tpu.memory_space<vmem>>, vector<1x32x8xf32>
    %425 = vector.shape_cast %424 : vector<1x32x8xf32> to vector<32x8xf32>
    %426 = vector.shape_cast %423 : vector<32x8xf32> to vector<1x32x8xf32>
    tpu.vector_store %arg10[%c0_86, %c0_87, %c24], %426 {strides = array<i32>} : memref<1x32x64xf32, #tpu.memory_space<vmem>>, vector<1x32x8xf32>,
    %427 = vector.extract_strided_slice %47 {offsets = [4, 0], sizes = [1, 8], strides = [1, 1]} : vector<8x8xf32> to vector<1x8xf32>
    %428 = vector.broadcast %197 : vector<32x1xf32> to vector<32x8xf32>
    %429 = vector.broadcast %427 : vector<1x8xf32> to vector<32x8xf32>
    %430 = arith.mulf %428, %429 : vector<32x8xf32>
    %431 = vector.broadcast %192 : vector<32x1xf32> to vector<32x8xf32>
    %432 = arith.addf %431, %430 : vector<32x8xf32>
    %433 = vector.extract_strided_slice %56 {offsets = [4, 0], sizes = [1, 8], strides = [1, 1]} : vector<8x8xf32> to vector<1x8xf32>
    %434 = vector.broadcast %198 : vector<32x1xf32> to vector<32x8xf32>
    %435 = vector.broadcast %433 : vector<1x8xf32> to vector<32x8xf32>
    %436 = arith.mulf %434, %435 : vector<32x8xf32>
    %437 = arith.addf %432, %436 : vector<32x8xf32>
    %438 = vector.extract_strided_slice %40 {offsets = [4, 0], sizes = [1, 8], strides = [1, 1]} : vector<8x8xf32> to vector<1x8xf32>
    %439 = vector.broadcast %199 : vector<32x1xf32> to vector<32x8xf32>
    %440 = vector.broadcast %438 : vector<1x8xf32> to vector<32x8xf32>
    %441 = arith.mulf %439, %440 : vector<32x8xf32>
    %442 = arith.addf %437, %441 : vector<32x8xf32>
    %443 = vector.extract_strided_slice %78 {offsets = [4, 0], sizes = [1, 8], strides = [1, 1]} : vector<8x8xf32> to vector<1x8xf32>
    %444 = vector.broadcast %200 : vector<32x1xf32> to vector<32x8xf32>
    %445 = vector.broadcast %443 : vector<1x8xf32> to vector<32x8xf32>
    %446 = arith.mulf %444, %445 : vector<32x8xf32>
    %447 = arith.addf %442, %446 : vector<32x8xf32>
    %448 = vector.extract_strided_slice %102 {offsets = [4, 0], sizes = [1, 8], strides = [1, 1]} : vector<8x8xf32> to vector<1x8xf32>
    %449 = vector.broadcast %201 : vector<32x1xf32> to vector<32x8xf32>
    %450 = vector.broadcast %448 : vector<1x8xf32> to vector<32x8xf32>
    %451 = arith.mulf %449, %450 : vector<32x8xf32>
    %452 = arith.addf %447, %451 : vector<32x8xf32>
    %453 = vector.extract_strided_slice %190 {offsets = [4, 0], sizes = [1, 8], strides = [1, 1]} : vector<8x8xf32> to vector<1x8xf32>
    %454 = vector.broadcast %202 : vector<32x1xf32> to vector<32x8xf32>
    %455 = vector.broadcast %453 : vector<1x8xf32> to vector<32x8xf32>
    %456 = arith.mulf %454, %455 : vector<32x8xf32>
    %457 = arith.addf %452, %456 : vector<32x8xf32>
    %cst_88 = arith.constant 5.000000e-01 : f32
    %458 = vector.broadcast %cst_88 : f32 to vector<32x8xf32>
    %459 = arith.mulf %458, %457 : vector<32x8xf32>
    %cst_89 = arith.constant 1.41421354 : f32
    %460 = vector.broadcast %cst_89 : f32 to vector<32x8xf32>
    %461 = arith.divf %457, %460 : vector<32x8xf32>
    %462 = math.erf %461 : vector<32x8xf32>
    %cst_90 = arith.constant 1.000000e+00 : f32
    %463 = vector.broadcast %cst_90 : f32 to vector<32x8xf32>
    %464 = arith.addf %463, %462 : vector<32x8xf32>
    %465 = arith.mulf %459, %464 : vector<32x8xf32>
    %cst_91 = arith.constant dense<0.000000e+00> : vector<32x8xf32>
    %466 = tpu.matmul %193, %465, %cst_91 {dimension_numbers = #tpu.dot_dimension_numbers<[1], [0], [0], [1], [0, 0, 1, 1], [], []>, precision = #tpu.contract_precision<fp32>} : vector<32x32xf32>, vector<32x8xf32>, vector<32x8xf32> -> vector<32x8xf32>
    %467 = vector.broadcast %194 : vector<32x1xf32> to vector<32x8xf32>
    %468 = arith.addf %466, %467 : vector<32x8xf32>
    %cst_92 = arith.constant 5.000000e-01 : f32
    %469 = vector.broadcast %cst_92 : f32 to vector<32x8xf32>
    %470 = arith.mulf %469, %468 : vector<32x8xf32>
    %cst_93 = arith.constant 1.41421354 : f32
    %471 = vector.broadcast %cst_93 : f32 to vector<32x8xf32>
    %472 = arith.divf %468, %471 : vector<32x8xf32>
    %473 = math.erf %472 : vector<32x8xf32>
    %cst_94 = arith.constant 1.000000e+00 : f32
    %474 = vector.broadcast %cst_94 : f32 to vector<32x8xf32>
    %475 = arith.addf %474, %473 : vector<32x8xf32>
    %476 = arith.mulf %470, %475 : vector<32x8xf32>
    %cst_95 = arith.constant dense<0.000000e+00> : vector<32x8xf32>
    %477 = tpu.matmul %195, %476, %cst_95 {dimension_numbers = #tpu.dot_dimension_numbers<[1], [0], [0], [1], [0, 0, 1, 1], [], []>, precision = #tpu.contract_precision<fp32>} : vector<32x32xf32>, vector<32x8xf32>, vector<32x8xf32> -> vector<32x8xf32>
    %478 = vector.broadcast %196 : vector<32x1xf32> to vector<32x8xf32>
    %479 = arith.addf %477, %478 : vector<32x8xf32>
    %c0_96 = arith.constant 0 : index
    %c0_97 = arith.constant 0 : index
    %c32 = arith.constant 32 : index
    %480 = vector.load %arg10[%c0_96, %c0_97, %c32] : memref<1x32x64xf32, #tpu.memory_space<vmem>>, vector<1x32x8xf32>
    %481 = vector.shape_cast %480 : vector<1x32x8xf32> to vector<32x8xf32>
    %482 = vector.shape_cast %479 : vector<32x8xf32> to vector<1x32x8xf32>
    tpu.vector_store %arg10[%c0_96, %c0_97, %c32], %482 {strides = array<i32>} : memref<1x32x64xf32, #tpu.memory_space<vmem>>, vector<1x32x8xf32>,
    %483 = vector.extract_strided_slice %47 {offsets = [5, 0], sizes = [1, 8], strides = [1, 1]} : vector<8x8xf32> to vector<1x8xf32>
    %484 = vector.broadcast %197 : vector<32x1xf32> to vector<32x8xf32>
    %485 = vector.broadcast %483 : vector<1x8xf32> to vector<32x8xf32>
    %486 = arith.mulf %484, %485 : vector<32x8xf32>
    %487 = vector.broadcast %192 : vector<32x1xf32> to vector<32x8xf32>
    %488 = arith.addf %487, %486 : vector<32x8xf32>
    %489 = vector.extract_strided_slice %56 {offsets = [5, 0], sizes = [1, 8], strides = [1, 1]} : vector<8x8xf32> to vector<1x8xf32>
    %490 = vector.broadcast %198 : vector<32x1xf32> to vector<32x8xf32>
    %491 = vector.broadcast %489 : vector<1x8xf32> to vector<32x8xf32>
    %492 = arith.mulf %490, %491 : vector<32x8xf32>
    %493 = arith.addf %488, %492 : vector<32x8xf32>
    %494 = vector.extract_strided_slice %40 {offsets = [5, 0], sizes = [1, 8], strides = [1, 1]} : vector<8x8xf32> to vector<1x8xf32>
    %495 = vector.broadcast %199 : vector<32x1xf32> to vector<32x8xf32>
    %496 = vector.broadcast %494 : vector<1x8xf32> to vector<32x8xf32>
    %497 = arith.mulf %495, %496 : vector<32x8xf32>
    %498 = arith.addf %493, %497 : vector<32x8xf32>
    %499 = vector.extract_strided_slice %78 {offsets = [5, 0], sizes = [1, 8], strides = [1, 1]} : vector<8x8xf32> to vector<1x8xf32>
    %500 = vector.broadcast %200 : vector<32x1xf32> to vector<32x8xf32>
    %501 = vector.broadcast %499 : vector<1x8xf32> to vector<32x8xf32>
    %502 = arith.mulf %500, %501 : vector<32x8xf32>
    %503 = arith.addf %498, %502 : vector<32x8xf32>
    %504 = vector.extract_strided_slice %102 {offsets = [5, 0], sizes = [1, 8], strides = [1, 1]} : vector<8x8xf32> to vector<1x8xf32>
    %505 = vector.broadcast %201 : vector<32x1xf32> to vector<32x8xf32>
    %506 = vector.broadcast %504 : vector<1x8xf32> to vector<32x8xf32>
    %507 = arith.mulf %505, %506 : vector<32x8xf32>
    %508 = arith.addf %503, %507 : vector<32x8xf32>
    %509 = vector.extract_strided_slice %190 {offsets = [5, 0], sizes = [1, 8], strides = [1, 1]} : vector<8x8xf32> to vector<1x8xf32>
    %510 = vector.broadcast %202 : vector<32x1xf32> to vector<32x8xf32>
    %511 = vector.broadcast %509 : vector<1x8xf32> to vector<32x8xf32>
    %512 = arith.mulf %510, %511 : vector<32x8xf32>
    %513 = arith.addf %508, %512 : vector<32x8xf32>
    %cst_98 = arith.constant 5.000000e-01 : f32
    %514 = vector.broadcast %cst_98 : f32 to vector<32x8xf32>
    %515 = arith.mulf %514, %513 : vector<32x8xf32>
    %cst_99 = arith.constant 1.41421354 : f32
    %516 = vector.broadcast %cst_99 : f32 to vector<32x8xf32>
    %517 = arith.divf %513, %516 : vector<32x8xf32>
    %518 = math.erf %517 : vector<32x8xf32>
    %cst_100 = arith.constant 1.000000e+00 : f32
    %519 = vector.broadcast %cst_100 : f32 to vector<32x8xf32>
    %520 = arith.addf %519, %518 : vector<32x8xf32>
    %521 = arith.mulf %515, %520 : vector<32x8xf32>
    %cst_101 = arith.constant dense<0.000000e+00> : vector<32x8xf32>
    %522 = tpu.matmul %193, %521, %cst_101 {dimension_numbers = #tpu.dot_dimension_numbers<[1], [0], [0], [1], [0, 0, 1, 1], [], []>, precision = #tpu.contract_precision<fp32>} : vector<32x32xf32>, vector<32x8xf32>, vector<32x8xf32> -> vector<32x8xf32>
    %523 = vector.broadcast %194 : vector<32x1xf32> to vector<32x8xf32>
    %524 = arith.addf %522, %523 : vector<32x8xf32>
    %cst_102 = arith.constant 5.000000e-01 : f32
    %525 = vector.broadcast %cst_102 : f32 to vector<32x8xf32>
    %526 = arith.mulf %525, %524 : vector<32x8xf32>
    %cst_103 = arith.constant 1.41421354 : f32
    %527 = vector.broadcast %cst_103 : f32 to vector<32x8xf32>
    %528 = arith.divf %524, %527 : vector<32x8xf32>
    %529 = math.erf %528 : vector<32x8xf32>
    %cst_104 = arith.constant 1.000000e+00 : f32
    %530 = vector.broadcast %cst_104 : f32 to vector<32x8xf32>
    %531 = arith.addf %530, %529 : vector<32x8xf32>
    %532 = arith.mulf %526, %531 : vector<32x8xf32>
    %cst_105 = arith.constant dense<0.000000e+00> : vector<32x8xf32>
    %533 = tpu.matmul %195, %532, %cst_105 {dimension_numbers = #tpu.dot_dimension_numbers<[1], [0], [0], [1], [0, 0, 1, 1], [], []>, precision = #tpu.contract_precision<fp32>} : vector<32x32xf32>, vector<32x8xf32>, vector<32x8xf32> -> vector<32x8xf32>
    %534 = vector.broadcast %196 : vector<32x1xf32> to vector<32x8xf32>
    %535 = arith.addf %533, %534 : vector<32x8xf32>
    %c0_106 = arith.constant 0 : index
    %c0_107 = arith.constant 0 : index
    %c40 = arith.constant 40 : index
    %536 = vector.load %arg10[%c0_106, %c0_107, %c40] : memref<1x32x64xf32, #tpu.memory_space<vmem>>, vector<1x32x8xf32>
    %537 = vector.shape_cast %536 : vector<1x32x8xf32> to vector<32x8xf32>
    %538 = vector.shape_cast %535 : vector<32x8xf32> to vector<1x32x8xf32>
    tpu.vector_store %arg10[%c0_106, %c0_107, %c40], %538 {strides = array<i32>} : memref<1x32x64xf32, #tpu.memory_space<vmem>>, vector<1x32x8xf32>,
    %539 = vector.extract_strided_slice %47 {offsets = [6, 0], sizes = [1, 8], strides = [1, 1]} : vector<8x8xf32> to vector<1x8xf32>
    %540 = vector.broadcast %197 : vector<32x1xf32> to vector<32x8xf32>
    %541 = vector.broadcast %539 : vector<1x8xf32> to vector<32x8xf32>
    %542 = arith.mulf %540, %541 : vector<32x8xf32>
    %543 = vector.broadcast %192 : vector<32x1xf32> to vector<32x8xf32>
    %544 = arith.addf %543, %542 : vector<32x8xf32>
    %545 = vector.extract_strided_slice %56 {offsets = [6, 0], sizes = [1, 8], strides = [1, 1]} : vector<8x8xf32> to vector<1x8xf32>
    %546 = vector.broadcast %198 : vector<32x1xf32> to vector<32x8xf32>
    %547 = vector.broadcast %545 : vector<1x8xf32> to vector<32x8xf32>
    %548 = arith.mulf %546, %547 : vector<32x8xf32>
    %549 = arith.addf %544, %548 : vector<32x8xf32>
    %550 = vector.extract_strided_slice %40 {offsets = [6, 0], sizes = [1, 8], strides = [1, 1]} : vector<8x8xf32> to vector<1x8xf32>
    %551 = vector.broadcast %199 : vector<32x1xf32> to vector<32x8xf32>
    %552 = vector.broadcast %550 : vector<1x8xf32> to vector<32x8xf32>
    %553 = arith.mulf %551, %552 : vector<32x8xf32>
    %554 = arith.addf %549, %553 : vector<32x8xf32>
    %555 = vector.extract_strided_slice %78 {offsets = [6, 0], sizes = [1, 8], strides = [1, 1]} : vector<8x8xf32> to vector<1x8xf32>
    %556 = vector.broadcast %200 : vector<32x1xf32> to vector<32x8xf32>
    %557 = vector.broadcast %555 : vector<1x8xf32> to vector<32x8xf32>
    %558 = arith.mulf %556, %557 : vector<32x8xf32>
    %559 = arith.addf %554, %558 : vector<32x8xf32>
    %560 = vector.extract_strided_slice %102 {offsets = [6, 0], sizes = [1, 8], strides = [1, 1]} : vector<8x8xf32> to vector<1x8xf32>
    %561 = vector.broadcast %201 : vector<32x1xf32> to vector<32x8xf32>
    %562 = vector.broadcast %560 : vector<1x8xf32> to vector<32x8xf32>
    %563 = arith.mulf %561, %562 : vector<32x8xf32>
    %564 = arith.addf %559, %563 : vector<32x8xf32>
    %565 = vector.extract_strided_slice %190 {offsets = [6, 0], sizes = [1, 8], strides = [1, 1]} : vector<8x8xf32> to vector<1x8xf32>
    %566 = vector.broadcast %202 : vector<32x1xf32> to vector<32x8xf32>
    %567 = vector.broadcast %565 : vector<1x8xf32> to vector<32x8xf32>
    %568 = arith.mulf %566, %567 : vector<32x8xf32>
    %569 = arith.addf %564, %568 : vector<32x8xf32>
    %cst_108 = arith.constant 5.000000e-01 : f32
    %570 = vector.broadcast %cst_108 : f32 to vector<32x8xf32>
    %571 = arith.mulf %570, %569 : vector<32x8xf32>
    %cst_109 = arith.constant 1.41421354 : f32
    %572 = vector.broadcast %cst_109 : f32 to vector<32x8xf32>
    %573 = arith.divf %569, %572 : vector<32x8xf32>
    %574 = math.erf %573 : vector<32x8xf32>
    %cst_110 = arith.constant 1.000000e+00 : f32
    %575 = vector.broadcast %cst_110 : f32 to vector<32x8xf32>
    %576 = arith.addf %575, %574 : vector<32x8xf32>
    %577 = arith.mulf %571, %576 : vector<32x8xf32>
    %cst_111 = arith.constant dense<0.000000e+00> : vector<32x8xf32>
    %578 = tpu.matmul %193, %577, %cst_111 {dimension_numbers = #tpu.dot_dimension_numbers<[1], [0], [0], [1], [0, 0, 1, 1], [], []>, precision = #tpu.contract_precision<fp32>} : vector<32x32xf32>, vector<32x8xf32>, vector<32x8xf32> -> vector<32x8xf32>
    %579 = vector.broadcast %194 : vector<32x1xf32> to vector<32x8xf32>
    %580 = arith.addf %578, %579 : vector<32x8xf32>
    %cst_112 = arith.constant 5.000000e-01 : f32
    %581 = vector.broadcast %cst_112 : f32 to vector<32x8xf32>
    %582 = arith.mulf %581, %580 : vector<32x8xf32>
    %cst_113 = arith.constant 1.41421354 : f32
    %583 = vector.broadcast %cst_113 : f32 to vector<32x8xf32>
    %584 = arith.divf %580, %583 : vector<32x8xf32>
    %585 = math.erf %584 : vector<32x8xf32>
    %cst_114 = arith.constant 1.000000e+00 : f32
    %586 = vector.broadcast %cst_114 : f32 to vector<32x8xf32>
    %587 = arith.addf %586, %585 : vector<32x8xf32>
    %588 = arith.mulf %582, %587 : vector<32x8xf32>
    %cst_115 = arith.constant dense<0.000000e+00> : vector<32x8xf32>
    %589 = tpu.matmul %195, %588, %cst_115 {dimension_numbers = #tpu.dot_dimension_numbers<[1], [0], [0], [1], [0, 0, 1, 1], [], []>, precision = #tpu.contract_precision<fp32>} : vector<32x32xf32>, vector<32x8xf32>, vector<32x8xf32> -> vector<32x8xf32>
    %590 = vector.broadcast %196 : vector<32x1xf32> to vector<32x8xf32>
    %591 = arith.addf %589, %590 : vector<32x8xf32>
    %c0_116 = arith.constant 0 : index
    %c0_117 = arith.constant 0 : index
    %c48 = arith.constant 48 : index
    %592 = vector.load %arg10[%c0_116, %c0_117, %c48] : memref<1x32x64xf32, #tpu.memory_space<vmem>>, vector<1x32x8xf32>
    %593 = vector.shape_cast %592 : vector<1x32x8xf32> to vector<32x8xf32>
    %594 = vector.shape_cast %591 : vector<32x8xf32> to vector<1x32x8xf32>
    tpu.vector_store %arg10[%c0_116, %c0_117, %c48], %594 {strides = array<i32>} : memref<1x32x64xf32, #tpu.memory_space<vmem>>, vector<1x32x8xf32>,
    %595 = vector.extract_strided_slice %47 {offsets = [7, 0], sizes = [1, 8], strides = [1, 1]} : vector<8x8xf32> to vector<1x8xf32>
    %596 = vector.broadcast %197 : vector<32x1xf32> to vector<32x8xf32>
    %597 = vector.broadcast %595 : vector<1x8xf32> to vector<32x8xf32>
    %598 = arith.mulf %596, %597 : vector<32x8xf32>
    %599 = vector.broadcast %192 : vector<32x1xf32> to vector<32x8xf32>
    %600 = arith.addf %599, %598 : vector<32x8xf32>
    %601 = vector.extract_strided_slice %56 {offsets = [7, 0], sizes = [1, 8], strides = [1, 1]} : vector<8x8xf32> to vector<1x8xf32>
    %602 = vector.broadcast %198 : vector<32x1xf32> to vector<32x8xf32>
    %603 = vector.broadcast %601 : vector<1x8xf32> to vector<32x8xf32>
    %604 = arith.mulf %602, %603 : vector<32x8xf32>
    %605 = arith.addf %600, %604 : vector<32x8xf32>
    %606 = vector.extract_strided_slice %40 {offsets = [7, 0], sizes = [1, 8], strides = [1, 1]} : vector<8x8xf32> to vector<1x8xf32>
    %607 = vector.broadcast %199 : vector<32x1xf32> to vector<32x8xf32>
    %608 = vector.broadcast %606 : vector<1x8xf32> to vector<32x8xf32>
    %609 = arith.mulf %607, %608 : vector<32x8xf32>
    %610 = arith.addf %605, %609 : vector<32x8xf32>
    %611 = vector.extract_strided_slice %78 {offsets = [7, 0], sizes = [1, 8], strides = [1, 1]} : vector<8x8xf32> to vector<1x8xf32>
    %612 = vector.broadcast %200 : vector<32x1xf32> to vector<32x8xf32>
    %613 = vector.broadcast %611 : vector<1x8xf32> to vector<32x8xf32>
    %614 = arith.mulf %612, %613 : vector<32x8xf32>
    %615 = arith.addf %610, %614 : vector<32x8xf32>
    %616 = vector.extract_strided_slice %102 {offsets = [7, 0], sizes = [1, 8], strides = [1, 1]} : vector<8x8xf32> to vector<1x8xf32>
    %617 = vector.broadcast %201 : vector<32x1xf32> to vector<32x8xf32>
    %618 = vector.broadcast %616 : vector<1x8xf32> to vector<32x8xf32>
    %619 = arith.mulf %617, %618 : vector<32x8xf32>
    %620 = arith.addf %615, %619 : vector<32x8xf32>
    %621 = vector.extract_strided_slice %190 {offsets = [7, 0], sizes = [1, 8], strides = [1, 1]} : vector<8x8xf32> to vector<1x8xf32>
    %622 = vector.broadcast %202 : vector<32x1xf32> to vector<32x8xf32>
    %623 = vector.broadcast %621 : vector<1x8xf32> to vector<32x8xf32>
    %624 = arith.mulf %622, %623 : vector<32x8xf32>
    %625 = arith.addf %620, %624 : vector<32x8xf32>
    %cst_118 = arith.constant 5.000000e-01 : f32
    %626 = vector.broadcast %cst_118 : f32 to vector<32x8xf32>
    %627 = arith.mulf %626, %625 : vector<32x8xf32>
    %cst_119 = arith.constant 1.41421354 : f32
    %628 = vector.broadcast %cst_119 : f32 to vector<32x8xf32>
    %629 = arith.divf %625, %628 : vector<32x8xf32>
    %630 = math.erf %629 : vector<32x8xf32>
    %cst_120 = arith.constant 1.000000e+00 : f32
    %631 = vector.broadcast %cst_120 : f32 to vector<32x8xf32>
    %632 = arith.addf %631, %630 : vector<32x8xf32>
    %633 = arith.mulf %627, %632 : vector<32x8xf32>
    %cst_121 = arith.constant dense<0.000000e+00> : vector<32x8xf32>
    %634 = tpu.matmul %193, %633, %cst_121 {dimension_numbers = #tpu.dot_dimension_numbers<[1], [0], [0], [1], [0, 0, 1, 1], [], []>, precision = #tpu.contract_precision<fp32>} : vector<32x32xf32>, vector<32x8xf32>, vector<32x8xf32> -> vector<32x8xf32>
    %635 = vector.broadcast %194 : vector<32x1xf32> to vector<32x8xf32>
    %636 = arith.addf %634, %635 : vector<32x8xf32>
    %cst_122 = arith.constant 5.000000e-01 : f32
    %637 = vector.broadcast %cst_122 : f32 to vector<32x8xf32>
    %638 = arith.mulf %637, %636 : vector<32x8xf32>
    %cst_123 = arith.constant 1.41421354 : f32
    %639 = vector.broadcast %cst_123 : f32 to vector<32x8xf32>
    %640 = arith.divf %636, %639 : vector<32x8xf32>
    %641 = math.erf %640 : vector<32x8xf32>
    %cst_124 = arith.constant 1.000000e+00 : f32
    %642 = vector.broadcast %cst_124 : f32 to vector<32x8xf32>
    %643 = arith.addf %642, %641 : vector<32x8xf32>
    %644 = arith.mulf %638, %643 : vector<32x8xf32>
    %cst_125 = arith.constant dense<0.000000e+00> : vector<32x8xf32>
    %645 = tpu.matmul %195, %644, %cst_125 {dimension_numbers = #tpu.dot_dimension_numbers<[1], [0], [0], [1], [0, 0, 1, 1], [], []>, precision = #tpu.contract_precision<fp32>} : vector<32x32xf32>, vector<32x8xf32>, vector<32x8xf32> -> vector<32x8xf32>
    %646 = vector.broadcast %196 : vector<32x1xf32> to vector<32x8xf32>
    %647 = arith.addf %645, %646 : vector<32x8xf32>
    %c0_126 = arith.constant 0 : index
    %c0_127 = arith.constant 0 : index
    %c56 = arith.constant 56 : index
    %648 = vector.load %arg10[%c0_126, %c0_127, %c56] : memref<1x32x64xf32, #tpu.memory_space<vmem>>, vector<1x32x8xf32>
    %649 = vector.shape_cast %648 : vector<1x32x8xf32> to vector<32x8xf32>
    %650 = vector.shape_cast %647 : vector<32x8xf32> to vector<1x32x8xf32>
    tpu.vector_store %arg10[%c0_126, %c0_127, %c56], %650 {strides = array<i32>} : memref<1x32x64xf32, #tpu.memory_space<vmem>>, vector<1x32x8xf32>,
    return
  }
  func.func @transform_0(%arg0: i32, %arg1: i32) -> (i32, i32, i32) {
    %c0_i32 = arith.constant 0 : i32
    %c0_i32_0 = arith.constant 0 : i32
    %c0_i32_1 = arith.constant 0 : i32
    return %arg0, %c0_i32, %c0_i32_0 : i32, i32, i32
  }
  func.func @transform_1(%arg0: i32, %arg1: i32) -> (i32, i32, i32) {
    %c0_i32 = arith.constant 0 : i32
    %c0_i32_0 = arith.constant 0 : i32
    return %arg0, %arg1, %c0_i32 : i32, i32, i32
  }
  func.func @transform_2(%arg0: i32, %arg1: i32) -> (i32, i32) {
    %c0_i32 = arith.constant 0 : i32
    %c0_i32_0 = arith.constant 0 : i32
    %c0_i32_1 = arith.constant 0 : i32
    return %c0_i32, %c0_i32_0 : i32, i32
  }
  func.func @transform_3(%arg0: i32, %arg1: i32) -> (i32, i32) {
    %c0_i32 = arith.constant 0 : i32
    %c0_i32_0 = arith.constant 0 : i32
    %c0_i32_1 = arith.constant 0 : i32
    return %c0_i32, %c0_i32_0 : i32, i32
  }
  func.func @transform_4(%arg0: i32, %arg1: i32) -> (i32, i32) {
    %c0_i32 = arith.constant 0 : i32
    %c0_i32_0 = arith.constant 0 : i32
    %c0_i32_1 = arith.constant 0 : i32
    return %c0_i32, %c0_i32_0 : i32, i32
  }
  func.func @transform_5(%arg0: i32, %arg1: i32) -> (i32, i32) {
    %c0_i32 = arith.constant 0 : i32
    %c0_i32_0 = arith.constant 0 : i32
    %c0_i32_1 = arith.constant 0 : i32
    return %c0_i32, %c0_i32_0 : i32, i32
  }
  func.func @transform_6(%arg0: i32, %arg1: i32) -> (i32, i32) {
    %c0_i32 = arith.constant 0 : i32
    %c0_i32_0 = arith.constant 0 : i32
    %c0_i32_1 = arith.constant 0 : i32
    return %c0_i32, %c0_i32_0 : i32, i32
  }
  func.func @transform_7(%arg0: i32, %arg1: i32) -> (i32, i32) {
    %c0_i32 = arith.constant 0 : i32
    %c0_i32_0 = arith.constant 0 : i32
    %c0_i32_1 = arith.constant 0 : i32
    return %c0_i32, %c0_i32_0 : i32, i32
  }
  func.func @transform_8(%arg0: i32, %arg1: i32) -> (i32, i32, i32) {
    %c0_i32 = arith.constant 0 : i32
    %c0_i32_0 = arith.constant 0 : i32
    return %arg0, %c0_i32, %arg1 : i32, i32, i32
  }
}

</mosaic_0001>

<bundles_post_ra>
// kernel: tpu_custom_call.1
= control target key start
LH: loop header
LB: loop body
LE: loop exit
PB: predicated region body
PF: predicated region fallthrough
CT: control target
= control target key end

     0   :  { %13 = vsyncpa [#allocation3], 0  ;;  %s17979_s0 = inlined_call_operand.vmem [shape: f32[2,7,8], index: 0, kind: input, shape index: {}]   ;;  %s17980_s1 = inlined_call_operand.vmem [shape: f32[2,8,7], index: 1, kind: input, shape index: {}]   ;;  %s17981_s2 = inlined_call_operand.vmem [shape: f32[32,6], index: 2, kind: input, shape index: {}]   ;;  %s17982_s3 = inlined_call_operand.vmem [shape: f32[32,1], index: 3, kind: input, shape index: {}]   ;;  %s17983_s4 = inlined_call_operand.vmem [shape: f32[32,32], index: 4, kind: input, shape index: {}]   ;;  %s17984_s5 = inlined_call_operand.vmem [shape: f32[32,1], index: 5, kind: input, shape index: {}]   ;;  %s17985_s6 = inlined_call_operand.vmem [shape: f32[32,32], index: 6, kind: input, shape index: {}]   ;;  %s17986_s7 = inlined_call_operand.vmem [shape: f32[32,1], index: 7, kind: input, shape index: {}]   ;;  %s17987_s8 = inlined_call_operand.hbm [shape: f32[2,32,64], index: 8, kind: output, shape index: {}]  }
   0x1   :  { %15 = vsyncpa [#allocation3 + $0x1], 0  ;;  %s15405_s27 = smov 0   ;;  %s15407_s28 = smov 0  }
   0x2   :  { %s15409_s29 = smov 0   ;;  %s15411_s30 = smov 0  }
   0x3   :  { %s15413_s9 = smov 0   ;;  %s15415_s10 = smov 0  }
   0x4 LB: > { %s11731_s11 = sadd.s32 4294967295, %s15342_s10   ;;  %s11732_s12 = sadd.s32 4294967294, %s15342_s10   ;;  %s15342_s10 = sphi %s15415_s10, %s21_s10   ;;  %s15338_s9 = sphi %s15413_s9, %s18407_s9   ;;  %s15334_s30 = sphi %s15411_s30, %s18406_s30   ;;  %s15330_s29 = sphi %s15409_s29, %s18405_s29   ;;  %s15326_s28 = sphi %s15407_s28, %s18404_s28   ;;  %s15322_s27 = sphi %s15405_s27, %s18403_s27  }
   0x5   : > { %s33_s13 = sadd.s32 1, %s15338_s9  ;;  %s222_s14 = sadd.s32 1, %s15330_s29 }
   0x6   : > { %p35_p0 = scmp.ge.s32.totalorder %s33_s13, 2  ;;  %p232_p1 = scmp.ne.s32.totalorder %s15330_s29, %s15326_s28 }
   0x7   : > { %p233_p2 = scmp.eq.s32.totalorder %s11731_s11, 1  ;;  %p238_p3 = scmp.ne.s32.totalorder %s15326_s28, %s15322_s27 }
   0x8   : > { %s18409_s13 = smov (%p35_p0, %s33_s13), 0  ;;  %p239_p5 = scmp.eq.s32.totalorder %s11732_s12, 1 }
   0x9   : > { %p15445_p4 = por %p233_p2, %p232_p1  ;;  %s217_s16 = ssub.s32 %s15338_s9, %s18409_s13 }
   0xa   : > { %p11735_p6 = scmp.ge.s32.totalorder %s15342_s10, 1  ;;  %p220_p7 = scmp.eq.s32.totalorder %s217_s16, 0 }
   0xb   : > { %p15452_p8 = por %p239_p5, %p238_p3  ;;  %p292_p9 = scmp.lt.s32.totalorder %s15342_s10, 3 }
   0xc   : > { %s15458_s18 = scalar_select %p220_p7, %s15330_s29, %s222_s14  }
   0xd   : > { %p293_p10 = pnand %p11735_p6, %p292_p9 }
   0xf   : > { %296 = sbr.rel (%p293_p10) target bundleno = 1365 (0x555), region = 52 }
  0x16   : > { %p332_p11 = scmp.lt.s32.totalorder %s15334_s30, 1  ;;  %v15344_v0 = vmov 3   ;;  %v15345_v1 = vmov 1   ;;  %v15346_v3 = vmov 2   ;;  %v15347_v4 = vmov 0   ;;  %v548_v7 = vld [vmem:[%s17981_s2 + $0x8] sm:$0xff] }
  0x17   : > { %15081 = vset.pattern.permute.xlu0 %v15344_v0  ;;  %15083 = vset.pattern.permute.xlu1 %v15345_v1  ;;  %v15348_v5 = vmov 6   ;;  %v15349_v6 = vmov 5   ;;  %v15350_v8 = vmov 4   ;;  %v550_v9 = vld [vmem:[%s17981_s2 + $0x18] sm:$0xff]  ;;  %v547_v10 = vld [vmem:[%s17981_s2] sm:$0xff]  ;;  %v553_v11 = vld [vmem:[%s17982_s3 + $0x10] sm:$0xff]  ;;  %v350_v16 = vlaneseq }
  0x18   : > { %s15463_s19 = scalar_select %p332_p11, %s15334_s30, 1  ;;  %v551_v12 = vld [vmem:[%s17982_s3] sm:$0xff]  ;;  %v552_v13 = vld [vmem:[%s17982_s3 + $0x8] sm:$0xff]  ;;  %v549_v14 = vld [vmem:[%s17981_s2 + $0x10] sm:$0xff]  ;;  %v18099_v54 = vmov 0 }
  0x19   : > { %v554_v15 = vld [vmem:[%s17982_s3 + $0x18] sm:$0xff]  ;;  %v15505_v17 = vshrl.u32 %v350_v16, 7  ;;  %s329_s14 = sand.u32 1, %s15326_s28   ;;  %s15355_s24 = smov 40  }
  0x1a   : > { %s11737_s20 = sshll.u32 %s15463_s19, 3  ;;  %s11736_s16 = sshll.u32 %s329_s14, 5 }
  0x1b   : > { %s342_s23 = scalar_lea.vmem %s17980_s1, %s11737_s20  ;;  %s335_s22 = scalar_lea.vmem %s17979_s0, %s11737_s20  ;;  %v15513_v18 = vsub.s32 3, %v15505_v17  ;;  %v15516_v19 = vsub.s32 1, %v15505_v17  ;;  %v15529_v23 = vsub.s32 0, %v15505_v17  ;;  %v15532_v24 = vsub.s32 2, %v15505_v17 }
  0x1c   : > { %v344_v2 = vld [vmem:[%s342_s23] sm:$0xff]  ;;  %v15549_v34 = vsub.s32 6, %v15505_v17  ;;  %v15566_v46 = vsub.s32 4, %v15505_v17  ;;  %v15578_v60 = vsub.s32 5, %v15505_v17  ;;  %s17727_s21 = scalar_lea.vmem [#allocation2], %s11736_s16  ;;  %s15352_s19 = smov 16  }
  0x1d   : > { %414 = vperm.xlu1 %15083, %v344_v2   ;;  %432 = vperm.xlu0 %15081, %v344_v2   ;;  %18094 = vst [vmem:[#allocation5_spill] sm:$0xff] %v15513_v18  ;;  %18095 = vst [vmem:[#allocation6_spill] sm:$0xff] %v15516_v19  ;;  %v15518_v20 = vld [vmem:[%s335_s22] sm:$0x7f]  ;;  %s15351_s22 = smov 8   ;;  %s15353_s20 = smov 24  }
  0x1e   : > { %v15522_v21 = vrot.slane %v15518_v20, %v15513_v18  ;;  %v15526_v22 = vrot.slane %v15518_v20, %v15516_v19  ;;  %18096 = vst [vmem:[#allocation7_spill] sm:$0xff] %v15529_v23  ;;  %18097 = vst [vmem:[#allocation8_spill] sm:$0xff] %v15532_v24  ;;  %v15542_v31 = vrot.slane %v15518_v20, %v15529_v23  ;;  %s15354_s23 = smov 32   ;;  %s15356_s25 = smov 48  }
  0x1f   : > { %v15546_v32 = vrot.slane %v15518_v20, %v15532_v24  ;;  %v353_v43 = vrot.slane %v15518_v20, %v15549_v34  ;;  %18098 = vst [vmem:[#allocation9_spill] sm:$0xff] %v15566_v46  ;;  %18102 = vst [vmem:[#allocation11_spill] sm:$0xff] %v15578_v60  ;;  %v391_v63 = vrot.slane %v15518_v20, %v15566_v46  ;;  %s15357_s26 = smov 56   ;;  %s11746_s11 = sshll.u32 %s15334_s30, 9 }
  0x20   : > { %s11644_s12 = sshll.u32 %s17727_s21, 4  ;;  %s17932_s30 = scalar_lea.sflag [#allocation3], %s329_s14  ;;  %s17926_s12 = int_to_ptr.vmem [resolvable:$true] %s11644_s12 }
  0x21   : > { %15084 = vset.pattern.permute.xlu1 %v15346_v3  ;;  %15082 = vset.pattern.permute.xlu0 %v15347_v4 }
  0x22   : > { %423 = vperm.xlu1 %15084, %v344_v2   ;;  %405 = vperm.xlu0 %15082, %v344_v2  }
  0x26   : > { %15085 = vset.pattern.permute.xlu1 %v15348_v5  ;;  %15086 = vset.pattern.permute.xlu0 %v15349_v6 }
  0x27   : > { %347 = vperm.xlu1 %15085, %v344_v2   ;;  %363 = vperm.xlu0 %15086, %v344_v2  }
  0x2b   : > { %15087 = vset.pattern.permute.xlu1 %v15350_v8  ;;  %15089 = vset.pattern.permute.xlu0 %v15347_v4 }
  0x2c   : > { %385 = vperm.xlu1 %15087, %v344_v2   ;;  %578 = vperm.xlu0 %15089, %v548_v7  }
  0x30   : > { %15088 = vset.pattern.permute.xlu1 %v15347_v4  ;;  %588 = vperm.xlu0 %15089, %v550_v9  }
  0x31   : > { %573 = vperm.xlu1 %15088, %v547_v10  }
  0x34   : > { %611 = vperm.xlu0 %15089, %v553_v11  }
  0x35   : > { %601 = vperm.xlu1 %15088, %v551_v12  }
  0x38   : > { %15093 = vset.pattern.permute.xlu0 %v15345_v1 }
  0x39   : > { %606 = vperm.xlu1 %15088, %v552_v13   ;;  %624 = vperm.xlu0 %15093, %v547_v10   ;;  %v369_v13 = vrot.slane %v15518_v20, %v15578_v60 }
  0x3d   : > { %15090 = vset.pattern.permute.xlu1 %v15345_v1  ;;  %632 = vperm.xlu0 %15093, %v549_v14  }
  0x3e   : > { %628 = vperm.xlu1 %15090, %v548_v7  }
  0x41   : > { %15097 = vset.pattern.permute.xlu0 %v15344_v0 }
  0x42   : > { %15091 = vset.pattern.permute.xlu1 %v15347_v4  ;;  %684 = vperm.xlu0 %15097, %v548_v7  }
  0x43   : > { %583 = vperm.xlu1 %15091, %v549_v14  }
  0x46   : > { %692 = vperm.xlu0 %15097, %v550_v9  }
  0x47   : > { %15092 = vset.pattern.permute.xlu1 %v15346_v3 }
  0x48   : > { %652 = vperm.xlu1 %15092, %v547_v10  }
  0x4a   : > { %15101 = vset.pattern.permute.xlu0 %v15350_v8 }
  0x4b   : > { %708 = vperm.xlu0 %15101, %v547_v10  }
  0x4c   : > { %656 = vperm.xlu1 %15092, %v548_v7  }
  0x4f   : > { %716 = vperm.xlu0 %15101, %v549_v14  }
  0x50   : > { %15094 = vset.pattern.permute.xlu1 %v15347_v4 }
  0x51   : > { %616 = vperm.xlu1 %15094, %v554_v15  }
  0x53   : > { %15105 = vset.pattern.permute.xlu0 %v15349_v6 }
  0x54   : > { %748 = vperm.xlu0 %15105, %v550_v9  }
  0x55   : > { %15095 = vset.pattern.permute.xlu1 %v15345_v1 }
  0x56   : > { %636 = vperm.xlu1 %15095, %v550_v9  }
  0x58   : > { %15107 = vset.pattern.permute.xlu0 %v15347_v4 }
  0x5a   : > { %15096 = vset.pattern.permute.xlu1 %v15344_v0 }
  0x5b   : > { %680 = vperm.xlu1 %15096, %v547_v10  }
  0x5f   : > { %15098 = vset.pattern.permute.xlu1 %v15346_v3 }
  0x60   : > { %660 = vperm.xlu1 %15098, %v549_v14  }
  0x64   : > { %664 = vperm.xlu1 %15098, %v550_v9  }
  0x68   : > { %15099 = vset.pattern.permute.xlu1 %v15350_v8 }
  0x69   : > { %712 = vperm.xlu1 %15099, %v548_v7  }
  0x6d   : > { %15100 = vset.pattern.permute.xlu1 %v15344_v0 }
  0x6e   : > { %688 = vperm.xlu1 %15100, %v549_v14  }
  0x72   : > { %15102 = vset.pattern.permute.xlu1 %v15349_v6 }
  0x73   : > { %736 = vperm.xlu1 %15102, %v547_v10  }
  0x77   : > { %740 = vperm.xlu1 %15102, %v548_v7  }
  0x7b   : > { %15103 = vset.pattern.permute.xlu1 %v15350_v8 }
  0x7c   : > { %720 = vperm.xlu1 %15103, %v550_v9  }
  0x80   : > { %15104 = vset.pattern.permute.xlu1 %v15349_v6 }
  0x81   : > { %744 = vperm.xlu1 %15104, %v549_v14  }
  0x85   : > { %15106 = vset.pattern.permute.xlu1 %v15347_v4 }
  0x9c   : > { %v433_v25 = vpop.permute.xlu0 %432  ;;  %v415_v26 = vpop.permute.xlu1 %414 }
  0x9d   : > { %v439_v27 = vadd.f32 %v15522_v21, %v433_v25  ;;  %v453_v28 = vsub.f32 %v433_v25, %v15522_v21  ;;  %v15537_v29 = vadd.f32 %v15526_v22, %v415_v26  ;;  %v451_v30 = vsub.f32 %v415_v26, %v15526_v22 }
  0x9f   : > { %v465_v33 = vmax.f32 %v439_v27, 1e-08  ;;  %v441_v35 = vmul.f32 %v15537_v29, %v15537_v29  ;;  %v456_v36 = vmul.f32 %v451_v30, %v451_v30  ;;  %vm540_vm0 = vcmp.eq.f32.partialorder %v451_v30, 0.0 }
  0xa0   : > { %vm544_vm4 = vcmp.eq.f32.partialorder %v453_v28, 0.0  ;;  %v445_v53 = vmul.f32 %v439_v27, %v439_v27  ;;  %v454_v56 = vmul.f32 %v453_v28, %v453_v28  ;;  %v470_v0 = vsub.f32 0.0, %v15537_v29 }
  0xa1   : > { %15108 = vrcp.f32 %v465_v33  ;;  %v406_v37 = vpop.permute.xlu0 %405  ;;  %v424_v38 = vpop.permute.xlu1 %423 }
  0xa2   : > { %v15554_v39 = vadd.f32 %v15542_v31, %v406_v37  ;;  %v450_v40 = vsub.f32 %v406_v37, %v15542_v31  ;;  %v15558_v41 = vadd.f32 %v15546_v32, %v424_v38  ;;  %v452_v42 = vsub.f32 %v424_v38, %v15546_v32 }
  0xa4   : > { %v440_v44 = vmul.f32 %v15554_v39, %v15554_v39  ;;  %v455_v45 = vmul.f32 %v450_v40, %v450_v40  ;;  %vm539_vm1 = vcmp.eq.f32.partialorder %v450_v40, 0.0  ;;  %v443_v47 = vmul.f32 %v15558_v41, %v15558_v41 }
  0xa5   : > { %vm541_vm2 = vmand %vm539_vm1, %vm540_vm0  ;;  %v458_v48 = vmul.f32 %v452_v42, %v452_v42  ;;  %vm542_vm3 = vcmp.eq.f32.partialorder %v452_v42, 0.0  ;;  %v468_v57 = vsub.f32 0.0, %v15554_v39  ;;  %v472_v61 = vsub.f32 0.0, %v15558_v41 }
  0xa6   : > { %v442_v49 = vadd.f32 %v441_v35, %v440_v44  ;;  %v457_v50 = vadd.f32 %v456_v36, %v455_v45  ;;  %vm543_vm5 = vmand %vm541_vm2, %vm542_vm3  ;;  %v348_v51 = vpop.permute.xlu1 %347  ;;  %v364_v52 = vpop.permute.xlu0 %363  ;;  %vm804_vm0 = vcmask 261120   ;;  %vm2097_vm1 = vcmask 64512  }
  0xa7   : > { %vm15570_vm6 = vmand %vm543_vm5, %vm544_vm4  ;;  %v354_v55 = vsub.f32 %v348_v51, %v353_v43  ;;  %v370_v35 = vsub.f32 %v364_v52, %v369_v13  ;;  %vm3458_vm2 = vcmask 130112   ;;  %vm4819_vm3 = vcmask 195712  }
  0xa8   : > { %v18100_v54 = vsel %vm15570_vm6, 4294967295, %v18099_v54  ;;  %v15575_v58 = vadd.f32 %v443_v47, %v442_v49  ;;  %v459_v59 = vadd.f32 %v458_v48, %v457_v50  ;;  %vm6180_vm4 = vcmask 261312  }
  0xa9   : > { %18101 = vst [vmem:[#allocation10_spill] sm:$0xff] %v18100_v54  ;;  %v355_v62 = vadd.f32 3.1415927, %v354_v55  ;;  %v371_v43 = vmul.f32 %v370_v35, %v370_v35  ;;  %v15620_v55 = vsub.s32 7, %v15505_v17  ;;  %vm7541_vm5 = vcmask 326912  }
  0xaa   : > { %v446_v1 = vsub.f32 %v445_v53, %v15575_v58  ;;  %v460_v2 = vsub.f32 %v454_v56, %v459_v59  ;;  %15110 = vrsqrt.f32 %v15575_v58  ;;  %vm525_vm8 = vcmp.eq.f32.partialorder %v15575_v58, inf }
  0xab   : > { %v15109_v3 = vpop.eup %15108  ;;  %v357_v4 = vmul.f32 0.15915494, %v355_v62  ;;  %v386_v5 = vpop.permute.xlu1 %385  ;;  %18103 = vst [vmem:[#allocation12_spill] sm:$0xff] %v15620_v55  ;;  %vm527_vm9 = vcmp.eq.f32.partialorder %v15575_v58, 0.0 }
  0xac   : > { %v15586_v6 = vpop.permute.xlu0 %578  ;;  %v15588_v7 = vmul.f32 %v15109_v3, %v470_v0  ;;  %v15590_v8 = vmul.f32 %v15109_v3, %v468_v57  ;;  %v447_v9 = vmax.f32 %v446_v1, 1e-08  ;;  %v461_v10 = vsub.f32 0.0, %v460_v2 }
  0xad   : > { %v15592_v11 = vmul.f32 %v15109_v3, %v472_v61  ;;  %v358_v12 = vfloor.f32 %v357_v4  ;;  %v397_v14 = vadd.f32 %v391_v63, %v386_v5  ;;  %v15624_v59 = vmin.f32 %v386_v5, %v391_v63 }
  0xae   : > { %v475_v15 = vmul.f32 %v15588_v7, %v15588_v7  ;;  %v474_v16 = vmul.f32 %v15590_v8, %v15590_v8  ;;  %15112 = vlog2.f32 %v447_v9  ;;  %v462_v25 = vmax.f32 %v461_v10, 1e-08 }
  0xaf   : > { %v477_v28 = vmul.f32 %v15592_v11, %v15592_v11  ;;  %v359_v30 = vmul.f32 6.2831855, %v358_v12  ;;  %v398_v33 = vmax.f32 %v397_v14, 1e-08  ;;  %v497_v44 = vmul.f32 %v15588_v7, %v15526_v22 }
  0xb0   : > { %v15600_v26 = vpop.permute.xlu0 %588  ;;  %v476_v27 = vadd.f32 %v475_v15, %v474_v16  ;;  %15114 = vlog2.f32 %v462_v25  ;;  %v496_v45 = vmul.f32 %v15590_v8, %v15542_v31  ;;  %v499_v1 = vmul.f32 %v15592_v11, %v15546_v32 }
  0xb1   : > { %v360_v36 = vsub.f32 %v355_v62, %v359_v30  ;;  %15116 = vrcp.f32 %v398_v33  ;;  %v528_v3 = vand.u32 2147483648, %v15575_v58 }
  0xb2   : > { %v15604_v20 = vadd.f32 %v477_v28, %v476_v27  ;;  %v498_v53 = vadd.f32 %v497_v44, %v496_v45  ;;  %v15684_v44 = vpop.permute.xlu1 %573 }
  0xb3   : > { %v11739_v40 = vadd.f32 -3.1415927, %v360_v36 }
  0xb4   : > { %v15606_v37 = vpop.permute.xlu0 %611  ;;  %v479_v38 = vsub.f32 1.0, %v15604_v20  ;;  %v15111_v42 = vpop.eup %15110  ;;  %vm490_vm7 = vcmp.eq.f32.partialorder %v15604_v20, 0.0  ;;  %v15638_v63 = vadd.f32 %v499_v1, %v498_v53 }
  0xb5   : > { %v372_v48 = vmul.f32 %v11739_v40, %v11739_v40  ;;  %v524_v49 = vmul.f32 %v15111_v42, %v15575_v58  ;;  %v491_v0 = vsel %vm490_vm7, 1.0, %v15604_v20 }
  0xb6   : > { %v480_v47 = vmax.f32 %v479_v38, 1e-08 }
  0xb7   : > { %v15617_v52 = vadd.f32 %v372_v48, %v371_v43  ;;  %v526_v17 = vsel %vm525_vm8, %v15575_v58, %v524_v49  ;;  %vm11624_vm8 = vcmask 523712  }
  0xb8   : > { %15118 = vrsqrt.f32 %v480_v47  ;;  %v15614_v50 = vpop.permute.xlu0 %624  ;;  %v15113_v51 = vpop.eup %15112  ;;  %vm483_vm10 = vcmp.eq.f32.partialorder %v480_v47, inf  ;;  %v15644_v9 = vsel %vm527_vm9, %v528_v3, %v526_v17  ;;  %vm485_vm11 = vcmp.eq.f32.partialorder %v480_v47, 0.0 }
  0xb9   : > { %v449_v56 = vmul.f32 0.6931472, %v15113_v51  ;;  %15120 = vrsqrt.f32 %v15617_v52  ;;  %v486_v28 = vand.u32 2147483648, %v480_v47  ;;  %vm376_vm12 = vcmp.eq.f32.partialorder %v15617_v52, inf }
  0xba   : > { %v15115_v57 = vpop.eup %15114  ;;  %15122 = vrcp.f32 %v491_v0  ;;  %vm378_vm13 = vcmp.eq.f32.partialorder %v15617_v52, 0.0  ;;  %v379_v43 = vand.u32 2147483648, %v15617_v52 }
  0xbb   : > { %v15117_v61 = vpop.eup %15116  ;;  %v15626_v62 = vmul.f32 0.6931472, %v15115_v57  ;;  %v15642_v5 = vrot.slane %v449_v56, %v15620_v55  ;;  %v15647_v12 = vrot.slane %v449_v56, %v15532_v24  ;;  %v15650_v13 = vrot.slane %v449_v56, %v15513_v18 }
  0xbc   : > { %v15634_v2 = vpop.permute.xlu0 %632  ;;  %v400_v4 = vmul.f32 %v15117_v61, %v15624_v59  ;;  %v15657_v15 = vrot.slane %v449_v56, %v15566_v46  ;;  %v15660_v16 = vrot.slane %v449_v56, %v15578_v60  ;;  %v15663_v25 = vrot.slane %v449_v56, %v15549_v34 }
  0xbd   : > { %18104 = vst [vmem:[#allocation13_spill] sm:$0xff] %v15642_v5  ;;  %18105 = vst [vmem:[#allocation14_spill] sm:$0xff] %v15647_v12  ;;  %v15654_v14 = vrot.slane %v15626_v62, %v15620_v55  ;;  %v15691_v51 = vrot.slane %v449_v56, %v15529_v23  ;;  %v15694_v53 = vrot.slane %v449_v56, %v15516_v19 }
  0xbe   : > { %v401_v10 = vmax.f32 %v400_v4, 1e-08  ;;  %18106 = vst [vmem:[#allocation15_spill] sm:$0xff] %v15650_v13  ;;  %18108 = vst [vmem:[#allocation17_spill] sm:$0xff] %v15657_v15  ;;  %v15698_v61 = vrot.slane %v15626_v62, %v15529_v23  ;;  %v15704_v17 = vrot.slane %v15626_v62, %v15516_v19  ;;  %v15708_v3 = vrot.slane %v15626_v62, %v15532_v24 }
  0xbf   : > { %18107 = vst [vmem:[#allocation16_spill] sm:$0xff] %v15654_v14  ;;  %18109 = vst [vmem:[#allocation18_spill] sm:$0xff] %v15660_v16  ;;  %v15743_v30 = vrot.slane %v15626_v62, %v15578_v60 }
  0xc0   : > { %15124 = vlog2.f32 %v401_v10  ;;  %18110 = vst [vmem:[#allocation19_spill] sm:$0xff] %v15663_v25  ;;  %18117 = vst [vmem:[#allocation26_spill] sm:$0xff] %v15691_v51 }
  0xc1   : > { %v685_v58 = vpop.permute.xlu0 %684  ;;  %18118 = vst [vmem:[#allocation27_spill] sm:$0xff] %v15694_v53  ;;  %18119 = vst [vmem:[#allocation28_spill] sm:$0xff] %v15698_v61 }
  0xc2   : > { %v15119_v27 = vpop.eup %15118  ;;  %v15667_v33 = vmul.f32 %v15647_v12, %v685_v58  ;;  %v15670_v35 = vmul.f32 %v15650_v13, %v685_v58  ;;  %v15673_v38 = vmul.f32 %v15657_v15, %v685_v58  ;;  %v15676_v40 = vmul.f32 %v15660_v16, %v685_v58  ;;  %18120 = vst [vmem:[#allocation29_spill] sm:$0xff] %v15704_v17 }
  0xc3   : > { %v482_v36 = vmul.f32 %v15119_v27, %v480_v47  ;;  %v15679_v42 = vmul.f32 %v15663_v25, %v685_v58  ;;  %v15687_v45 = vmul.f32 %v15642_v5, %v685_v58  ;;  %v15121_v48 = vpop.eup %15120  ;;  %18121 = vst [vmem:[#allocation30_spill] sm:$0xff] %v15708_v3  ;;  %18130 = vst [vmem:[#allocation39_spill] sm:$0xff] %v15743_v30 }
  0xc4   : > { %18111 = vst [vmem:[#allocation20_spill] sm:$0xff] %v15667_v33  ;;  %18112 = vst [vmem:[#allocation21_spill] sm:$0xff] %v15670_v35  ;;  %v375_v1 = vmul.f32 %v15121_v48, %v15617_v52  ;;  %v15123_v48 = vpop.eup %15122 }
  0xc5   : > { %18113 = vst [vmem:[#allocation22_spill] sm:$0xff] %v15673_v38  ;;  %18114 = vst [vmem:[#allocation23_spill] sm:$0xff] %v15676_v40  ;;  %v484_v49 = vsel %vm483_vm10, %v480_v47, %v482_v36  ;;  %v693_v57 = vpop.permute.xlu0 %692 }
  0xc6   : > { %18115 = vst [vmem:[#allocation24_spill] sm:$0xff] %v15679_v42  ;;  %18116 = vst [vmem:[#allocation25_spill] sm:$0xff] %v15687_v45  ;;  %v487_v0 = vsel %vm485_vm11, %v486_v28, %v484_v49  ;;  %v15711_v56 = vmul.f32 %v15647_v12, %v693_v57  ;;  %v15714_v4 = vmul.f32 %v15650_v13, %v693_v57 }
  0xc7   : > { %15126 = vrcp.f32 %v487_v0  ;;  %v15717_v47 = vmul.f32 %v15657_v15, %v693_v57  ;;  %v377_v10 = vsel %vm376_vm12, %v15617_v52, %v375_v1  ;;  %v15723_v27 = vmul.f32 %v15660_v16, %v693_v57 }
  0xc8   : > { %18122 = vst [vmem:[#allocation31_spill] sm:$0xff] %v15711_v56  ;;  %18123 = vst [vmem:[#allocation32_spill] sm:$0xff] %v15714_v4  ;;  %v15726_v28 = vmul.f32 %v15663_v25, %v693_v57  ;;  %v15729_v36 = vmul.f32 %v15642_v5, %v693_v57  ;;  %v380_v49 = vsel %vm378_vm13, %v379_v43, %v377_v10 }
  0xc9   : > { %18124 = vst [vmem:[#allocation33_spill] sm:$0xff] %v15717_v47  ;;  %18125 = vst [vmem:[#allocation34_spill] sm:$0xff] %v15723_v27  ;;  %v15735_v0 = vrot.slane %v15626_v62, %v15513_v18  ;;  %v15739_v1 = vrot.slane %v15626_v62, %v15566_v46  ;;  %v393_v27 = vmul.f32 %v15624_v59, %v380_v49 }
  0xca   : > { %18126 = vst [vmem:[#allocation35_spill] sm:$0xff] %v15726_v28  ;;  %18127 = vst [vmem:[#allocation36_spill] sm:$0xff] %v15729_v36  ;;  %v381_v28 = vmax.f32 %v380_v49, 1e-08  ;;  %v15746_v36 = vpop.permute.xlu1 %601  ;;  %v15749_v52 = vmul.f32 %v15691_v51, %v685_v58  ;;  %v709_v43 = vpop.permute.xlu0 %708  ;;  %v15753_v10 = vrot.slane %v15626_v62, %v15549_v34  ;;  %v15756_v4 = vmul.f32 %v15694_v53, %v685_v58 }
  0xcb   : > { %18128 = vst [vmem:[#allocation37_spill] sm:$0xff] %v15735_v0  ;;  %18129 = vst [vmem:[#allocation38_spill] sm:$0xff] %v15739_v1  ;;  %v15125_v47 = vpop.eup %15124  ;;  %v15759_v56 = vmul.f32 %v15691_v51, %v693_v57  ;;  %v15762_v45 = vmul.f32 %v15708_v3, %v709_v43  ;;  %v15765_v59 = vmul.f32 %v15735_v0, %v709_v43  ;;  %v394_v49 = vmax.f32 %v393_v27, 1e-08 }
  0xcc   : > { %18131 = vst [vmem:[#allocation40_spill] sm:$0xff] %v15749_v52  ;;  %18132 = vst [vmem:[#allocation41_spill] sm:$0xff] %v15753_v10  ;;  %15128 = vlog2.f32 %v381_v28  ;;  %v403_v42 = vmul.f32 0.6931472, %v15125_v47  ;;  %v15768_v40 = vmul.f32 %v15739_v1, %v709_v43  ;;  %v15771_v62 = vmul.f32 %v15694_v53, %v693_v57 }
  0xcd   : > { %18133 = vst [vmem:[#allocation42_spill] sm:$0xff] %v15756_v4  ;;  %18134 = vst [vmem:[#allocation43_spill] sm:$0xff] %v15759_v56  ;;  %v15774_v58 = vmul.f32 %v15743_v30, %v709_v43  ;;  %v15777_v56 = vmul.f32 %v15753_v10, %v709_v43  ;;  %15130 = vlog2.f32 %v394_v49  ;;  %v15816_v38 = vmul.f32 %v15704_v17, %v709_v43 }
  0xce   : > { %18135 = vst [vmem:[#allocation44_spill] sm:$0xff] %v15762_v45  ;;  %18136 = vst [vmem:[#allocation45_spill] sm:$0xff] %v15765_v59  ;;  %v15780_v45 = vmul.f32 %v15654_v14, %v709_v43  ;;  %v15783_v28 = vrot.slane %v403_v42, %v15529_v23  ;;  %v15786_v47 = vrot.slane %v403_v42, %v15516_v19 }
  0xcf   : > { %18137 = vst [vmem:[#allocation46_spill] sm:$0xff] %v15768_v40  ;;  %18138 = vst [vmem:[#allocation47_spill] sm:$0xff] %v15771_v62  ;;  %v15789_v27 = vrot.slane %v403_v42, %v15532_v24  ;;  %v15792_v57 = vrot.slane %v403_v42, %v15513_v18  ;;  %v15795_v62 = vrot.slane %v403_v42, %v15566_v46  ;;  %v15810_v40 = vpop.permute.xlu1 %606 }
  0xd0   : > { %18139 = vst [vmem:[#allocation48_spill] sm:$0xff] %v15774_v58  ;;  %18140 = vst [vmem:[#allocation49_spill] sm:$0xff] %v15777_v56  ;;  %v15798_v56 = vrot.slane %v403_v42, %v15578_v60  ;;  %v15801_v49 = vrot.slane %v403_v42, %v15549_v34  ;;  %v15808_v58 = vrot.slane %v403_v42, %v15620_v55 }
  0xd1   : > { %18141 = vst [vmem:[#allocation50_spill] sm:$0xff] %v15780_v45  ;;  %18142 = vst [vmem:[#allocation51_spill] sm:$0xff] %v15783_v28  ;;  %v15805_v45 = vmul.f32 %v15789_v27, %v15614_v50  ;;  %v15813_v59 = vmul.f32 %v15698_v61, %v709_v43  ;;  %v15127_v35 = vpop.eup %15126  ;;  %v15820_v33 = vmul.f32 %v15792_v57, %v15614_v50 }
  0xd2   : > { %18143 = vst [vmem:[#allocation52_spill] sm:$0xff] %v15786_v47  ;;  %18144 = vst [vmem:[#allocation53_spill] sm:$0xff] %v15789_v27  ;;  %v15824_v4 = vmul.f32 %v15795_v62, %v15614_v50  ;;  %v15828_v42 = vmul.f32 %v15798_v56, %v15614_v50  ;;  %v15832_v52 = vmul.f32 %v15801_v49, %v15614_v50 }
  0xd3   : > { %18145 = vst [vmem:[#allocation54_spill] sm:$0xff] %v15792_v57  ;;  %18146 = vst [vmem:[#allocation55_spill] sm:$0xff] %v15795_v62  ;;  %v15836_v43 = vmul.f32 %v15783_v28, %v15614_v50  ;;  %v15844_v5 = vmul.f32 %v15808_v58, %v15614_v50  ;;  %v502_v25 = vmul.f32 %v15127_v35, %v15522_v21 }
  0xd4   : > { %18147 = vst [vmem:[#allocation56_spill] sm:$0xff] %v15798_v56  ;;  %18148 = vst [vmem:[#allocation57_spill] sm:$0xff] %v15801_v49  ;;  %v15849_v16 = vmul.f32 %v15789_v27, %v15634_v2  ;;  %v15853_v15 = vmul.f32 %v15792_v57, %v15634_v2  ;;  %v15857_v13 = vmul.f32 %v15795_v62, %v15634_v2 }
  0xd5   : > { %18149 = vst [vmem:[#allocation58_spill] sm:$0xff] %v15808_v58  ;;  %18150 = vst [vmem:[#allocation59_spill] sm:$0xff] %v15813_v59  ;;  %v11740_v59 = vadd.f32 -1.0, %v15127_v35  ;;  %v15861_v53 = vmul.f32 %v15798_v56, %v15634_v2  ;;  %v15865_v21 = vmul.f32 %v15801_v49, %v15634_v2  ;;  %v629_v35 = vpop.permute.xlu1 %628 }
  0xd6   : > { %18151 = vst [vmem:[#allocation60_spill] sm:$0xff] %v15816_v38  ;;  %v15840_v38 = vmul.f32 %v15786_v47, %v15614_v50  ;;  %18152 = vst [vmem:[#allocation61_spill] sm:$0xff] %v15849_v16  ;;  %v15869_v50 = vmul.f32 %v15808_v58, %v15634_v2  ;;  %v15889_v16 = vmul.f32 %v15795_v62, %v629_v35 }
  0xd7   : > { %18153 = vst [vmem:[#allocation62_spill] sm:$0xff] %v15853_v15  ;;  %18154 = vst [vmem:[#allocation63_spill] sm:$0xff] %v15857_v13  ;;  %v494_v12 = vmul.f32 %v15123_v48, %v11740_v59  ;;  %v15873_v15 = vmul.f32 %v15783_v28, %v15634_v2  ;;  %v15876_v13 = vmul.f32 %v15786_v47, %v629_v35 }
  0xd8   : > { %18155 = vst [vmem:[#allocation64_spill] sm:$0xff] %v15861_v53  ;;  %18156 = vst [vmem:[#allocation65_spill] sm:$0xff] %v15865_v21  ;;  %v15879_v48 = vmul.f32 %v15789_v27, %v629_v35  ;;  %v15882_v59 = vmul.f32 %v15792_v57, %v629_v35  ;;  %v15884_v53 = vpop.permute.xlu0 %716  ;;  %v15129_v21 = vpop.eup %15128  ;;  %v15895_v51 = vmul.f32 %v15801_v49, %v629_v35 }
  0xd9   : > { %18157 = vst [vmem:[#allocation66_spill] sm:$0xff] %v15869_v50  ;;  %18158 = vst [vmem:[#allocation67_spill] sm:$0xff] %v15873_v15  ;;  %v495_v50 = vsel %vm490_vm7, 0.0, %v494_v12  ;;  %v15892_v15 = vmul.f32 %v15798_v56, %v629_v35  ;;  %v15898_v27 = vmul.f32 0.6931472, %v15129_v21  ;;  %v15902_v57 = vmul.f32 %v15786_v47, %v15634_v2  ;;  %v15131_v12 = vpop.eup %15130 }
  0xda   : > { %18159 = vst [vmem:[#allocation68_spill] sm:$0xff] %v15884_v53  ;;  %v501_v54 = vmul.f32 %v15638_v63, %v495_v50  ;;  %v15905_v20 = vmul.f32 %v15808_v58, %v629_v35  ;;  %v15908_v62 = vmul.f32 %v15783_v28, %v629_v35  ;;  %v15912_v56 = vmul.f32 %v15708_v3, %v15884_v53 }
  0xdb   : > { %18160 = vst [vmem:[#allocation69_spill] sm:$0xff] %v15898_v27  ;;  %18161 = vst [vmem:[#allocation70_spill] sm:$0xff] %v15902_v57  ;;  %v15916_v63 = vmul.f32 %v15735_v0, %v15884_v53  ;;  %v15920_v21 = vmul.f32 %v15739_v1, %v15884_v53  ;;  %v396_v50 = vmul.f32 0.6931472, %v15131_v12  ;;  %v15924_v57 = vmul.f32 %v15698_v61, %v15884_v53 }
  0xdc   : > { %18162 = vst [vmem:[#allocation71_spill] sm:$0xff] %v15912_v56  ;;  %v503_v2 = vadd.f32 %v502_v25, %v501_v54  ;;  %v15928_v35 = vmul.f32 %v15704_v17, %v15884_v53  ;;  %v15932_v56 = vrot.slane %v15898_v27, %v15529_v23  ;;  %v15940_v54 = vrot.slane %v15898_v27, %v15532_v24 }
  0xdd   : > { %18163 = vst [vmem:[#allocation72_spill] sm:$0xff] %v15916_v63  ;;  %18164 = vst [vmem:[#allocation73_spill] sm:$0xff] %v15920_v21  ;;  %v15936_v63 = vrot.slane %v15898_v27, %v15516_v19  ;;  %v15944_v25 = vrot.slane %v15898_v27, %v15513_v18  ;;  %v15954_v1 = vrot.slane %v396_v50, %v15516_v19  ;;  %vm10263_vm7 = vcmask 458112  }
  0xde   : > { %18165 = vst [vmem:[#allocation74_spill] sm:$0xff] %v15924_v57  ;;  %18166 = vst [vmem:[#allocation75_spill] sm:$0xff] %v15928_v35  ;;  %v504_v12 = vmul.f32 %v503_v2, %v15590_v8  ;;  %v506_v21 = vmul.f32 %v503_v2, %v15588_v7  ;;  %v508_v35 = vmul.f32 %v503_v2, %v15592_v11 }
  0xdf   : > { %v15951_v57 = vrot.slane %v15898_v27, %v15566_v46  ;;  %v15957_v0 = vrot.slane %v396_v50, %v15532_v24  ;;  %v15960_v3 = vrot.slane %v396_v50, %v15513_v18  ;;  %v15963_v17 = vrot.slane %v396_v50, %v15566_v46 }
  0xe0   : > { %v505_v7 = vadd.f32 %v504_v12, %v15542_v31  ;;  %v507_v8 = vadd.f32 %v506_v21, %v15526_v22  ;;  %v509_v11 = vadd.f32 %v508_v35, %v15546_v32  ;;  %v15970_v2 = vrot.slane %v15898_v27, %v15578_v60 }
  0xe1   : > { %v2107_v61 = vmul.f32 %v15954_v1, %v15586_v6  ;;  %v3468_v18 = vmul.f32 %v15957_v0, %v15586_v6  ;;  %v4829_v46 = vmul.f32 %v15960_v3, %v15586_v6  ;;  %v6190_v31 = vmul.f32 %v15963_v17, %v15586_v6 }
  0xe2   : > { %v510_v12 = vmul.f32 %v505_v7, %v505_v7  ;;  %v511_v22 = vmul.f32 %v507_v8, %v507_v8  ;;  %v531_v32 = vmul.f32 %v505_v7, %v15554_v39  ;;  %v15982_v21 = vrot.slane %v396_v50, %v15529_v23  ;;  %v15999_v7 = vpop.permute.xlu1 %583 }
  0xe3   : > { %v532_v35 = vmul.f32 %v507_v8, %v15537_v29  ;;  %v534_v24 = vmul.f32 %v509_v11, %v15558_v41  ;;  %v15987_v19 = vrot.slane %v396_v50, %v15578_v60  ;;  %v15990_v58 = vrot.slane %v396_v50, %v15549_v34 }
  0xe4   : > { %v512_v49 = vadd.f32 %v511_v22, %v510_v12  ;;  %v513_v47 = vmul.f32 %v509_v11, %v509_v11  ;;  %v15993_v28 = vrot.slane %v396_v50, %v15620_v55  ;;  %v15997_v39 = vmul.f32 %v15954_v1, %v15600_v26 }
  0xe5   : > { %v533_v29 = vadd.f32 %v532_v35, %v531_v32  ;;  %v7551_v41 = vmul.f32 %v15987_v19, %v15586_v6  ;;  %v8912_v8 = vmul.f32 %v15990_v58, %v15586_v6  ;;  %v16007_v12 = vmul.f32 %v15957_v0, %v15600_v26 }
  0xe6   : > { %18167 = vst [vmem:[#allocation76_spill] sm:$0xff] %v15997_v39  ;;  %v16009_v11 = vadd.f32 %v513_v47, %v512_v49  ;;  %v10273_v50 = vmul.f32 %v15993_v28, %v15586_v6  ;;  %v16015_v22 = vmul.f32 %v15960_v3, %v15600_v26  ;;  %v16019_v32 = vmul.f32 %v15963_v17, %v15600_v26 }
  0xe7   : > { %18168 = vst [vmem:[#allocation77_spill] sm:$0xff] %v16007_v12  ;;  %v16021_v35 = vadd.f32 %v534_v24, %v533_v29  ;;  %v16025_v60 = vmul.f32 %v15987_v19, %v15600_v26  ;;  %v16029_v47 = vmul.f32 %v15990_v58, %v15600_v26  ;;  %v16033_v49 = vmul.f32 %v15993_v28, %v15600_v26  ;;  %v16059_v12 = vpop.permute.xlu1 %652 }
  0xe8   : > { %18169 = vst [vmem:[#allocation78_spill] sm:$0xff] %v16015_v22  ;;  %18170 = vst [vmem:[#allocation79_spill] sm:$0xff] %v16019_v32  ;;  %15132 = vrsqrt.f32 %v16009_v11  ;;  %v520_v23 = vand.u32 2147483648, %v16009_v11  ;;  %v596_v24 = vmul.f32 %v15982_v21, %v15586_v6  ;;  %v16041_v29 = vmul.f32 %v15982_v21, %v15600_v26 }
  0xe9   : > { %18171 = vst [vmem:[#allocation80_spill] sm:$0xff] %v16021_v35  ;;  %18172 = vst [vmem:[#allocation81_spill] sm:$0xff] %v16025_v60  ;;  %v595_v35 = vmul.f32 %v15982_v21, %v15684_v44  ;;  %v4828_v60 = vmul.f32 %v15960_v3, %v15684_v44  ;;  %v6189_v32 = vmul.f32 %v15963_v17, %v15684_v44  ;;  %vm517_vm14 = vcmp.eq.f32.partialorder %v16009_v11, inf }
  0xea   : > { %18173 = vst [vmem:[#allocation82_spill] sm:$0xff] %v16029_v47  ;;  %18174 = vst [vmem:[#allocation83_spill] sm:$0xff] %v16033_v49  ;;  %v2106_v47 = vmul.f32 %v15954_v1, %v15684_v44  ;;  %v3467_v49 = vmul.f32 %v15957_v0, %v15684_v44  ;;  %v7550_v6 = vmul.f32 %v15987_v19, %v15684_v44  ;;  %vm519_vm15 = vcmp.eq.f32.partialorder %v16009_v11, 0.0 }
  0xeb   : > { %18175 = vst [vmem:[#allocation84_spill] sm:$0xff] %v16041_v29  ;;  %v8911_v26 = vmul.f32 %v15990_v58, %v15684_v44  ;;  %v10272_v22 = vmul.f32 %v15993_v28, %v15684_v44  ;;  %v619_v39 = vadd.f32 %v15746_v36, %v595_v35  ;;  %v4832_v10 = vadd.f32 %v4828_v60, %v15746_v36 }
  0xec   : > { %v2110_v29 = vadd.f32 %v2106_v47, %v15746_v36  ;;  %v3471_v14 = vadd.f32 %v3467_v49, %v15746_v36  ;;  %v6193_v30 = vadd.f32 %v6189_v32, %v15746_v36  ;;  %v7554_v53 = vadd.f32 %v7550_v6, %v15746_v36 }
  0xed   : > { %v8915_v55 = vadd.f32 %v8911_v26, %v15746_v36  ;;  %v10276_v44 = vadd.f32 %v10272_v22, %v15746_v36  ;;  %v647_v35 = vadd.f32 %v15836_v43, %v619_v39  ;;  %v4844_v60 = vadd.f32 %v15820_v33, %v4832_v10 }
  0xee   : > { %v2122_v47 = vadd.f32 %v15840_v38, %v2110_v29  ;;  %v3483_v49 = vadd.f32 %v15805_v45, %v3471_v14  ;;  %v6205_v27 = vadd.f32 %v15824_v4, %v6193_v30  ;;  %v7566_v32 = vadd.f32 %v15828_v42, %v7554_v53  ;;  %v16091_v53 = vpop.permute.xlu1 %656 }
  0xef   : > { %v16078_v6 = vadd.f32 %v15832_v52, %v8915_v55  ;;  %v16081_v26 = vadd.f32 %v15844_v5, %v10276_v44  ;;  %v620_v36 = vadd.f32 %v15810_v40, %v596_v24  ;;  %v2111_v43 = vadd.f32 %v2107_v61, %v15810_v40 }
  0xf0   : > { %v3472_v38 = vadd.f32 %v3468_v18, %v15810_v40  ;;  %v4833_v14 = vadd.f32 %v4829_v46, %v15810_v40  ;;  %v6194_v33 = vadd.f32 %v6190_v31, %v15810_v40  ;;  %v7555_v30 = vadd.f32 %v7551_v41, %v15810_v40 }
  0xf1   : > { %v8916_v45 = vadd.f32 %v8912_v8, %v15810_v40  ;;  %v10277_v55 = vadd.f32 %v10273_v50, %v15810_v40  ;;  %v648_v5 = vadd.f32 %v15908_v62, %v620_v36  ;;  %v2123_v4 = vadd.f32 %v15876_v13, %v2111_v43 }
  0xf2   : > { %v3484_v61 = vadd.f32 %v15879_v48, %v3472_v38  ;;  %v4845_v18 = vadd.f32 %v15882_v59, %v4833_v14  ;;  %v15133_v52 = vpop.eup %15132  ;;  %v6206_v46 = vadd.f32 %v15889_v16, %v6194_v33  ;;  %v7567_v10 = vadd.f32 %v15892_v15, %v7555_v30  ;;  %v617_v39 = vpop.permute.xlu1 %616 }
  0xf3   : > { %v16100_v42 = vadd.f32 %v15895_v51, %v8916_v45  ;;  %v16103_v40 = vadd.f32 %v15905_v20, %v10277_v55  ;;  %v516_v31 = vmul.f32 %v15133_v52, %v16009_v11  ;;  %v597_v13 = vmul.f32 %v15982_v21, %v15999_v7 }
  0xf4   : > { %v2108_v62 = vmul.f32 %v15954_v1, %v15999_v7  ;;  %v3469_v48 = vmul.f32 %v15957_v0, %v15999_v7  ;;  %v4830_v15 = vmul.f32 %v15960_v3, %v15999_v7  ;;  %v6191_v16 = vmul.f32 %v15963_v17, %v15999_v7 }
  0xf5   : > { %v7552_v51 = vmul.f32 %v15987_v19, %v15999_v7  ;;  %v8913_v59 = vmul.f32 %v15990_v58, %v15999_v7  ;;  %v518_v20 = vsel %vm517_vm14, %v16009_v11, %v516_v31  ;;  %v16124_v1 = vadd.f32 %v15606_v37, %v597_v13 }
  0xf6   : > { %v16127_v0 = vadd.f32 %v2108_v62, %v15606_v37  ;;  %v16130_v3 = vadd.f32 %v3469_v48, %v15606_v37  ;;  %v521_v17 = vsel %vm519_vm15, %v520_v23, %v518_v20  ;;  %v16135_v19 = vadd.f32 %v4830_v15, %v15606_v37 }
  0xf7   : > { %v16138_v58 = vadd.f32 %v6191_v16, %v15606_v37  ;;  %v16141_v21 = vadd.f32 %v7552_v51, %v15606_v37  ;;  %v522_v41 = vmax.f32 %v521_v17, 1e-08  ;;  %v16144_v8 = vadd.f32 %v8913_v59, %v15606_v37 }
  0xf8   : > { %v10274_v50 = vmul.f32 %v15993_v28, %v15999_v7  ;;  %v671_v23 = vmul.f32 %v15932_v56, %v16059_v12  ;;  %v2130_v11 = vmul.f32 %v15936_v63, %v16059_v12  ;;  %v3491_v22 = vmul.f32 %v15940_v54, %v16059_v12 }
  0xf9   : > { %v4852_v24 = vmul.f32 %v15944_v25, %v16059_v12  ;;  %v6213_v29 = vmul.f32 %v15951_v57, %v16059_v12  ;;  %v18176_v44 = vmax.f32 %v15644_v9, 1e-08  ;;  %v7574_v43 = vmul.f32 %v15970_v2, %v16059_v12  ;;  %v18177_v9 = vld [vmem:[#allocation69_spill] sm:$0xff] }
  0xfa   : > { %v16161_v28 = vadd.f32 %v10274_v50, %v15606_v37  ;;  %v16163_v7 = vadd.f32 %v671_v23, %v647_v35  ;;  %v16167_v38 = vadd.f32 %v2130_v11, %v2122_v47  ;;  %v16169_v14 = vadd.f32 %v3491_v22, %v3483_v49  ;;  %v18178_v35 = vld [vmem:[#allocation12_spill] sm:$0xff] }
  0xfb   : > { %v536_v36 = vmul.f32 %v18176_v44, %v522_v41  ;;  %v16171_v33 = vadd.f32 %v4852_v24, %v4844_v60  ;;  %v16173_v30 = vadd.f32 %v6213_v29, %v6205_v27  ;;  %v16175_v45 = vadd.f32 %v7574_v43, %v7566_v32  ;;  %v637_v32 = vpop.permute.xlu1 %636  ;;  %v18180_v41 = vld [vmem:[#allocation39_spill] sm:$0xff]  ;;  %v18187_v11 = vld [vmem:[#allocation76_spill] sm:$0xff]  ;;  %v18188_v24 = vld [vmem:[#allocation77_spill] sm:$0xff] }
  0xfc   : > { %v16179_v37 = vrot.slane %v18177_v9, %v15549_v34  ;;  %v16183_v55 = vrot.slane %v18177_v9, %v18178_v35  ;;  %v672_v47 = vmul.f32 %v15932_v56, %v16091_v53  ;;  %v2131_v49 = vmul.f32 %v15936_v63, %v16091_v53  ;;  %v18191_v9 = vld [vmem:[#allocation79_spill] sm:$0xff] }
  0xfd   : > { %15134 = vrcp.f32 %v536_v36  ;;  %v3492_v27 = vmul.f32 %v15940_v54, %v16091_v53  ;;  %v4853_v60 = vmul.f32 %v15944_v25, %v16091_v53  ;;  %v6214_v13 = vmul.f32 %v15951_v57, %v16091_v53  ;;  %v18190_v36 = vld [vmem:[#allocation78_spill] sm:$0xff] }
  0xfe   : > { %v8935_v52 = vmul.f32 %v16179_v37, %v16059_v12  ;;  %v10296_v31 = vmul.f32 %v16183_v55, %v16059_v12  ;;  %v7575_v62 = vmul.f32 %v15970_v2, %v16091_v53  ;;  %v16201_v48 = vadd.f32 %v672_v47, %v648_v5 }
  0xff   : > { %v16203_v15 = vadd.f32 %v2131_v49, %v2123_v4  ;;  %v16205_v16 = vadd.f32 %v3492_v27, %v3484_v61  ;;  %v16207_v51 = vadd.f32 %v4853_v60, %v4845_v18  ;;  %v16215_v12 = vadd.f32 %v6214_v13, %v6206_v46  ;;  %v18179_v61 = vld [vmem:[#allocation68_spill] sm:$0xff]  ;;  %v681_v49 = vpop.permute.xlu1 %680  ;;  %v18192_v27 = vld [vmem:[#allocation81_spill] sm:$0xff]  ;;  %v18194_v13 = vld [vmem:[#allocation83_spill] sm:$0xff] }
 0x100   : > { %v16210_v59 = vadd.f32 %v8935_v52, %v16078_v6  ;;  %v16213_v20 = vadd.f32 %v10296_v31, %v16081_v26  ;;  %v16217_v17 = vadd.f32 %v7575_v62, %v7567_v10  ;;  %v8936_v5 = vmul.f32 %v16179_v37, %v16091_v53  ;;  %v18182_v6 = vld [vmem:[#allocation41_spill] sm:$0xff]  ;;  %v18184_v26 = vld [vmem:[#allocation16_spill] sm:$0xff]  ;;  %v18193_v52 = vld [vmem:[#allocation82_spill] sm:$0xff] }
 0x101   : > { %v10297_v4 = vmul.f32 %v16183_v55, %v16091_v53  ;;  %v16225_v18 = vmul.f32 %v18180_v41, %v18179_v61  ;;  %v16229_v50 = vmul.f32 %v18182_v6, %v18179_v61  ;;  %v16233_v46 = vmul.f32 %v18184_v26, %v18179_v61  ;;  %v18186_v10 = vld [vmem:[#allocation84_spill] sm:$0xff]  ;;  %v18195_v61 = vld [vmem:[#allocation51_spill] sm:$0xff] }
 0x102   : > { %v622_v23 = vadd.f32 %v617_v39, %v18186_v10  ;;  %v2113_v22 = vadd.f32 %v18187_v11, %v617_v39  ;;  %v3474_v29 = vadd.f32 %v18188_v24, %v617_v39  ;;  %v16239_v53 = vadd.f32 %v8936_v5, %v16100_v42  ;;  %v18196_v11 = vld [vmem:[#allocation52_spill] sm:$0xff]  ;;  %v18197_v42 = vld [vmem:[#allocation53_spill] sm:$0xff] }
 0x103   : > { %18181 = vst [vmem:[#allocation69_spill] sm:$0xff] %v16225_v18  ;;  %18183 = vst [vmem:[#allocation12_spill] sm:$0xff] %v16229_v50  ;;  %v16242_v44 = vadd.f32 %v10297_v4, %v16103_v40  ;;  %v4835_v43 = vadd.f32 %v18190_v36, %v617_v39  ;;  %v6196_v47 = vadd.f32 %v18191_v9, %v617_v39  ;;  %v18199_v4 = vld [vmem:[#allocation55_spill] sm:$0xff]  ;;  %v18200_v9 = vld [vmem:[#allocation56_spill] sm:$0xff] }
 0x104   : > { %18185 = vst [vmem:[#allocation68_spill] sm:$0xff] %v16233_v46  ;;  %v7557_v60 = vadd.f32 %v18192_v27, %v617_v39  ;;  %v8918_v31 = vadd.f32 %v18193_v52, %v617_v39  ;;  %v10279_v62 = vadd.f32 %v18194_v13, %v617_v39  ;;  %v646_v10 = vmul.f32 %v18195_v61, %v637_v32  ;;  %v18198_v46 = vld [vmem:[#allocation54_spill] sm:$0xff]  ;;  %v18201_v27 = vld [vmem:[#allocation57_spill] sm:$0xff]  ;;  %v18203_v39 = vld [vmem:[#allocation80_spill] sm:$0xff] }
 0x105   : > { %18189 = vst [vmem:[#allocation39_spill] sm:$0xff] %v16242_v44  ;;  %v2121_v24 = vmul.f32 %v18196_v11, %v637_v32  ;;  %v3482_v5 = vmul.f32 %v18197_v42, %v637_v32  ;;  %v4843_v40 = vmul.f32 %v18198_v46, %v637_v32  ;;  %v6204_v50 = vmul.f32 %v18199_v4, %v637_v32  ;;  %v18202_v52 = vld [vmem:[#allocation58_spill] sm:$0xff] }
 0x106   : > { %v16254_v18 = vadd.f32 %v646_v10, %v622_v23  ;;  %v7565_v26 = vmul.f32 %v18200_v9, %v637_v32  ;;  %v8926_v44 = vmul.f32 %v18201_v27, %v637_v32  ;;  %v10287_v6 = vmul.f32 %v18202_v52, %v637_v32  ;;  %v18205_v32 = vld [vmem:[#allocation26_spill] sm:$0xff] }
 0x107   : > { %v15135_v36 = vpop.eup %15134  ;;  %v16260_v61 = vadd.f32 %v2121_v24, %v2113_v22  ;;  %v16262_v11 = vadd.f32 %v3482_v5, %v3474_v29  ;;  %v16264_v42 = vadd.f32 %v4843_v40, %v4835_v43  ;;  %v16266_v46 = vadd.f32 %v6204_v50, %v6196_v47  ;;  %v18207_v24 = vld [vmem:[#allocation14_spill] sm:$0xff]  ;;  %v661_v5 = vpop.permute.xlu1 %660  ;;  %v18208_v43 = vld [vmem:[#allocation7_spill] sm:$0xff] }
 0x108   : > { %v538_v13 = vmul.f32 %v15135_v36, %v18203_v39  ;;  %v16268_v4 = vadd.f32 %v7565_v26, %v7557_v60  ;;  %v16270_v23 = vadd.f32 %v8926_v44, %v8918_v31  ;;  %v16272_v10 = vadd.f32 %v10287_v6, %v10279_v62  ;;  %v18206_v36 = vld [vmem:[#allocation27_spill] sm:$0xff]  ;;  %v18209_v50 = vld [vmem:[#allocation6_spill] sm:$0xff]  ;;  %v18211_v44 = vld [vmem:[#allocation8_spill] sm:$0xff] }
 0x109   : > { %v699_v52 = vmul.f32 %v18205_v32, %v681_v49  ;;  %v2142_v22 = vmul.f32 %v18206_v36, %v681_v49  ;;  %v3503_v29 = vmul.f32 %v18207_v24, %v681_v49  ;;  %v18213_v6 = vld [vmem:[#allocation5_spill] sm:$0xff]  ;;  %v18217_v39 = vld [vmem:[#allocation11_spill] sm:$0xff] }
 0x10a   : > { %v546_v27 = vsel %vm15570_vm6, 0.0, %v538_v13  ;;  %v18215_v31 = vld [vmem:[#allocation9_spill] sm:$0xff]  ;;  %vm8902_vm6 = vcmask 392512  }
 0x10b   : > { %v16280_v40 = vrot.slane %v546_v27, %v18208_v43  ;;  %v16283_v26 = vrot.slane %v546_v27, %v18209_v50  ;;  %v16286_v47 = vrot.slane %v546_v27, %v18211_v44  ;;  %v16289_v60 = vrot.slane %v546_v27, %v18213_v6 }
 0x10c   : > { %v16292_v62 = vrot.slane %v546_v27, %v18215_v31  ;;  %v16295_v13 = vrot.slane %v546_v27, %v18217_v39  ;;  %v16298_v9 = vrot.slane %v546_v27, %v15549_v34  ;;  %v16301_v43 = vrot.slane %v546_v27, %v18178_v35  ;;  %v18222_v31 = vld [vmem:[#allocation15_spill] sm:$0xff] }
 0x10d   : > { %18210 = vst [vmem:[#allocation84_spill] sm:$0xff] %v16283_v26  ;;  %18212 = vst [vmem:[#allocation76_spill] sm:$0xff] %v16286_v47  ;;  %v16304_v50 = vadd.f32 %v699_v52, %v16163_v7  ;;  %v16307_v44 = vadd.f32 %v2142_v22, %v16167_v38  ;;  %v16310_v6 = vadd.f32 %v3503_v29, %v16169_v14  ;;  %v18225_v34 = vld [vmem:[#allocation19_spill] sm:$0xff]  ;;  %v18226_v26 = vld [vmem:[#allocation13_spill] sm:$0xff] }
 0x10e   : > { %18214 = vst [vmem:[#allocation77_spill] sm:$0xff] %v16289_v60  ;;  %18216 = vst [vmem:[#allocation78_spill] sm:$0xff] %v16292_v62  ;;  %v4864_v62 = vmul.f32 %v18222_v31, %v681_v49  ;;  %v18223_v60 = vld [vmem:[#allocation17_spill] sm:$0xff]  ;;  %v10308_v35 = vmul.f32 %v18226_v26, %v681_v49  ;;  %v18227_v7 = vld [vmem:[#allocation67_spill] sm:$0xff]  ;;  %v673_v52 = vmul.f32 %v15932_v56, %v661_v5 }
 0x10f   : > { %18218 = vst [vmem:[#allocation79_spill] sm:$0xff] %v16295_v13  ;;  %18219 = vst [vmem:[#allocation81_spill] sm:$0xff] %v16298_v9  ;;  %v6225_v39 = vmul.f32 %v18223_v60, %v681_v49  ;;  %v18224_v13 = vld [vmem:[#allocation18_spill] sm:$0xff]  ;;  %v8947_v9 = vmul.f32 %v18225_v34, %v681_v49  ;;  %v649_v38 = vadd.f32 %v18227_v7, %v16124_v1  ;;  %v18233_v7 = vld [vmem:[#allocation61_spill] sm:$0xff] }
 0x110   : > { %18220 = vst [vmem:[#allocation82_spill] sm:$0xff] %v16301_v43  ;;  %18221 = vst [vmem:[#allocation83_spill] sm:$0xff] %v16310_v6  ;;  %v7586_v47 = vmul.f32 %v18224_v13, %v681_v49  ;;  %v16318_v27 = vadd.f32 %v4864_v62, %v16171_v33  ;;  %v18228_v14 = vld [vmem:[#allocation70_spill] sm:$0xff]  ;;  %v16335_v33 = vadd.f32 %v10308_v35, %v16213_v20  ;;  %v665_v49 = vpop.permute.xlu1 %664 }
 0x111   : > { %v2124_v22 = vadd.f32 %v18228_v14, %v16127_v0  ;;  %v16326_v29 = vadd.f32 %v6225_v39, %v16173_v30  ;;  %v16332_v6 = vadd.f32 %v8947_v9, %v16210_v59  ;;  %v16337_v62 = vadd.f32 %v673_v52, %v649_v38  ;;  %v18234_v39 = vld [vmem:[#allocation62_spill] sm:$0xff]  ;;  %v18235_v59 = vld [vmem:[#allocation63_spill] sm:$0xff]  ;;  %v18236_v52 = vld [vmem:[#allocation64_spill] sm:$0xff] }
 0x112   : > { %v16329_v43 = vadd.f32 %v7586_v47, %v16175_v45  ;;  %18232 = vst [vmem:[#allocation54_spill] sm:$0xff] %v16335_v33  ;;  %v2132_v1 = vmul.f32 %v15936_v63, %v661_v5  ;;  %v3485_v0 = vadd.f32 %v18233_v7, %v16130_v3  ;;  %v3493_v30 = vmul.f32 %v15940_v54, %v661_v5 }
 0x113   : > { %18229 = vst [vmem:[#allocation51_spill] sm:$0xff] %v16326_v29  ;;  %18231 = vst [vmem:[#allocation53_spill] sm:$0xff] %v16332_v6  ;;  %v4846_v45 = vadd.f32 %v18234_v39, %v16135_v19  ;;  %v4854_v47 = vmul.f32 %v15944_v25, %v661_v5  ;;  %v6207_v9 = vadd.f32 %v18235_v59, %v16138_v58  ;;  %v18237_v6 = vld [vmem:[#allocation65_spill] sm:$0xff]  ;;  %v18238_v29 = vld [vmem:[#allocation66_spill] sm:$0xff] }
 0x114   : > { %18230 = vst [vmem:[#allocation52_spill] sm:$0xff] %v16329_v43  ;;  %v6215_v20 = vmul.f32 %v15951_v57, %v661_v5  ;;  %v2136_v35 = vadd.f32 %v2132_v1, %v2124_v22  ;;  %v3497_v38 = vadd.f32 %v3493_v30, %v3485_v0  ;;  %v7568_v14 = vadd.f32 %v18236_v52, %v16141_v21 }
 0x115   : > { %v7576_v33 = vmul.f32 %v15970_v2, %v661_v5  ;;  %v4858_v3 = vadd.f32 %v4854_v47, %v4846_v45  ;;  %v8929_v43 = vadd.f32 %v18237_v6, %v16144_v8  ;;  %v8937_v19 = vmul.f32 %v16179_v37, %v661_v5  ;;  %v713_v45 = vpop.permute.xlu1 %712 }
 0x116   : > { %v6219_v7 = vadd.f32 %v6215_v20, %v6207_v9  ;;  %v10290_v58 = vadd.f32 %v18238_v29, %v16161_v28  ;;  %v10298_v59 = vmul.f32 %v16183_v55, %v661_v5  ;;  %v674_v22 = vmul.f32 %v15932_v56, %v665_v49 }
 0x117   : > { %v7580_v39 = vadd.f32 %v7576_v33, %v7568_v14  ;;  %v8941_v1 = vadd.f32 %v8937_v19, %v8929_v43  ;;  %v2133_v21 = vmul.f32 %v15936_v63, %v665_v49  ;;  %v3494_v0 = vmul.f32 %v15940_v54, %v665_v49  ;;  %v18246_v19 = vld [vmem:[#allocation37_spill] sm:$0xff] }
 0x118   : > { %v4855_v30 = vmul.f32 %v15944_v25, %v665_v49  ;;  %v10302_v47 = vadd.f32 %v10298_v59, %v10290_v58  ;;  %v16363_v8 = vadd.f32 %v674_v22, %v16254_v18  ;;  %v6216_v6 = vmul.f32 %v15951_v57, %v665_v49 }
 0x119   : > { %v7577_v28 = vmul.f32 %v15970_v2, %v665_v49  ;;  %v16368_v5 = vadd.f32 %v2133_v21, %v16260_v61  ;;  %v16371_v56 = vadd.f32 %v3494_v0, %v16262_v11  ;;  %v8938_v54 = vmul.f32 %v16179_v37, %v665_v49  ;;  %v18239_v2 = vld [vmem:[#allocation40_spill] sm:$0xff]  ;;  %v18242_v37 = vld [vmem:[#allocation29_spill] sm:$0xff]  ;;  %v689_v22 = vpop.permute.xlu1 %688  ;;  %v18248_v21 = vld [vmem:[#allocation38_spill] sm:$0xff] }
 0x11a   : > { %v16374_v63 = vadd.f32 %v4855_v30, %v16264_v42  ;;  %v16378_v25 = vadd.f32 %v6216_v6, %v16266_v46  ;;  %v10299_v57 = vmul.f32 %v16183_v55, %v665_v49  ;;  %v704_v61 = vadd.f32 %v18239_v2, %v16201_v48  ;;  %v18240_v11 = vld [vmem:[#allocation28_spill] sm:$0xff]  ;;  %v18241_v42 = vld [vmem:[#allocation42_spill] sm:$0xff]  ;;  %v18245_v48 = vld [vmem:[#allocation21_spill] sm:$0xff] }
 0x11b   : > { %v16381_v18 = vadd.f32 %v7577_v28, %v16268_v4  ;;  %v16387_v43 = vadd.f32 %v8938_v54, %v16270_v23  ;;  %v728_v29 = vmul.f32 %v18240_v11, %v713_v45  ;;  %v2147_v33 = vadd.f32 %v18241_v42, %v16203_v15  ;;  %v18243_v4 = vld [vmem:[#allocation20_spill] sm:$0xff]  ;;  %v18244_v55 = vld [vmem:[#allocation30_spill] sm:$0xff] }
 0x11c   : > { %v2155_v9 = vmul.f32 %v18242_v37, %v713_v45  ;;  %v16394_v46 = vadd.f32 %v10299_v57, %v16272_v10  ;;  %v3508_v20 = vadd.f32 %v18243_v4, %v16205_v16  ;;  %v3516_v49 = vmul.f32 %v18244_v55, %v713_v45  ;;  %v18247_v15 = vld [vmem:[#allocation22_spill] sm:$0xff]  ;;  %v18249_v16 = vld [vmem:[#allocation23_spill] sm:$0xff]  ;;  %v18250_v28 = vld [vmem:[#allocation24_spill] sm:$0xff] }
 0x11d   : > { %v4869_v52 = vadd.f32 %v18245_v48, %v16207_v51  ;;  %v16401_v23 = vadd.f32 %v728_v29, %v704_v61  ;;  %v4877_v58 = vmul.f32 %v18246_v19, %v713_v45  ;;  %v6230_v59 = vadd.f32 %v18247_v15, %v16215_v12  ;;  %v18251_v57 = vld [vmem:[#allocation41_spill] sm:$0xff]  ;;  %v18252_v61 = vld [vmem:[#allocation39_spill] sm:$0xff] }
 0x11e   : > { %v16403_v14 = vadd.f32 %v2155_v9, %v2147_v33  ;;  %v16408_v10 = vadd.f32 %v3516_v49, %v3508_v20  ;;  %v6238_v0 = vmul.f32 %v18248_v21, %v713_v45  ;;  %v7591_v30 = vadd.f32 %v18249_v16, %v16217_v17  ;;  %v18253_v29 = vld [vmem:[#allocation25_spill] sm:$0xff]  ;;  %v18254_v9 = vld [vmem:[#allocation16_spill] sm:$0xff] }
 0x11f   : > { %v7599_v6 = vmul.f32 %v18180_v41, %v713_v45  ;;  %v16414_v51 = vadd.f32 %v4877_v58, %v4869_v52  ;;  %v8952_v54 = vadd.f32 %v18250_v28, %v16239_v53  ;;  %v8960_v2 = vmul.f32 %v18251_v57, %v713_v45 }
 0x120   : > { %v10313_v12 = vadd.f32 %v18253_v29, %v18252_v61  ;;  %v16421_v42 = vadd.f32 %v6238_v0, %v6230_v59  ;;  %v10321_v4 = vmul.f32 %v18254_v9, %v713_v45  ;;  %v701_v17 = vmul.f32 %v18205_v32, %v689_v22  ;;  %v18262_v29 = vld [vmem:[#allocation77_spill] sm:$0xff] }
 0x121   : > { %v16423_v33 = vadd.f32 %v7599_v6, %v7591_v30  ;;  %v16427_v20 = vadd.f32 %v8960_v2, %v8952_v54  ;;  %v2144_v49 = vmul.f32 %v18206_v36, %v689_v22  ;;  %v3505_v48 = vmul.f32 %v18207_v24, %v689_v22  ;;  %v18255_v30 = vld [vmem:[#allocation59_spill] sm:$0xff]  ;;  %v18260_v2 = vld [vmem:[#allocation76_spill] sm:$0xff] }
 0x122   : > { %v4866_v53 = vmul.f32 %v18222_v31, %v689_v22  ;;  %v16432_v52 = vadd.f32 %v10321_v4, %v10313_v12  ;;  %v16435_v58 = vadd.f32 %v701_v17, %v16337_v62  ;;  %v6227_v15 = vmul.f32 %v18223_v60, %v689_v22  ;;  %v737_v62 = vpop.permute.xlu1 %736  ;;  %v18263_v4 = vld [vmem:[#allocation51_spill] sm:$0xff] }
 0x123   : > { %v7588_v59 = vmul.f32 %v18224_v13, %v689_v22  ;;  %v16439_v45 = vadd.f32 %v2144_v49, %v2136_v35  ;;  %v16441_v32 = vadd.f32 %v3505_v48, %v3497_v38  ;;  %v8949_v36 = vmul.f32 %v18225_v34, %v689_v22  ;;  %v18256_v35 = vld [vmem:[#allocation60_spill] sm:$0xff] }
 0x124   : > { %v16443_v0 = vadd.f32 %v4866_v53, %v4858_v3  ;;  %v16446_v24 = vadd.f32 %v6227_v15, %v6219_v7  ;;  %v10310_v16 = vmul.f32 %v18226_v26, %v689_v22  ;;  %v731_v60 = vadd.f32 %v18255_v30, %v16304_v50  ;;  %v18257_v3 = vld [vmem:[#allocation84_spill] sm:$0xff]  ;;  %v18258_v7 = vld [vmem:[#allocation83_spill] sm:$0xff]  ;;  %v18261_v22 = vld [vmem:[#allocation45_spill] sm:$0xff] }
 0x125   : > { %v16448_v31 = vadd.f32 %v7588_v59, %v7580_v39  ;;  %v16453_v6 = vadd.f32 %v8949_v36, %v8941_v1  ;;  %v755_v13 = vmul.f32 %v16280_v40, %v737_v62  ;;  %v2158_v38 = vadd.f32 %v18256_v35, %v16307_v44  ;;  %v18259_v39 = vld [vmem:[#allocation44_spill] sm:$0xff]  ;;  %v18264_v44 = vld [vmem:[#allocation46_spill] sm:$0xff]  ;;  %v18268_v36 = vld [vmem:[#allocation79_spill] sm:$0xff] }
 0x126   : > { %v2166_v28 = vmul.f32 %v18257_v3, %v737_v62  ;;  %v16459_v34 = vadd.f32 %v10310_v16, %v10302_v47  ;;  %v3519_v54 = vadd.f32 %v18259_v39, %v18258_v7  ;;  %v3527_v26 = vmul.f32 %v18260_v2, %v737_v62  ;;  %v18265_v47 = vld [vmem:[#allocation78_spill] sm:$0xff]  ;;  %v18266_v53 = vld [vmem:[#allocation52_spill] sm:$0xff]  ;;  %v18270_v35 = vld [vmem:[#allocation49_spill] sm:$0xff] }
 0x127   : > { %v4880_v61 = vadd.f32 %v18261_v22, %v16318_v27  ;;  %v16466_v50 = vadd.f32 %v755_v13, %v731_v60  ;;  %v4888_v12 = vmul.f32 %v18262_v29, %v737_v62  ;;  %v6241_v17 = vadd.f32 %v18264_v44, %v18263_v4  ;;  %v18267_v15 = vld [vmem:[#allocation48_spill] sm:$0xff]  ;;  %v18269_v13 = vld [vmem:[#allocation53_spill] sm:$0xff]  ;;  %v18273_v4 = vld [vmem:[#allocation54_spill] sm:$0xff] }
 0x128   : > { %v16468_v1 = vadd.f32 %v2166_v28, %v2158_v38  ;;  %v16473_v49 = vadd.f32 %v3527_v26, %v3519_v54  ;;  %v6249_v48 = vmul.f32 %v18265_v47, %v737_v62  ;;  %v7602_v59 = vadd.f32 %v18267_v15, %v18266_v53  ;;  %v18272_v54 = vld [vmem:[#allocation81_spill] sm:$0xff]  ;;  %v18274_v44 = vld [vmem:[#allocation50_spill] sm:$0xff] }
 0x129   : > { %v7610_v16 = vmul.f32 %v18268_v36, %v737_v62  ;;  %v768_v27 = vmul.f32 0.70710677, %v16466_v50  ;;  %v16481_v60 = vadd.f32 %v4888_v12, %v4880_v61  ;;  %v8963_v38 = vadd.f32 %v18270_v35, %v18269_v13  ;;  %v18275_v15 = vld [vmem:[#allocation82_spill] sm:$0xff]  ;;  %v741_v12 = vpop.permute.xlu1 %740 }
 0x12a   : > { %v2178_v30 = vmul.f32 0.70710677, %v16468_v1  ;;  %v3539_v28 = vmul.f32 0.70710677, %v16473_v49  ;;  %v16486_v7 = vadd.f32 %v6249_v48, %v6241_v17  ;;  %v8971_v26 = vmul.f32 %v18272_v54, %v737_v62 }
 0x12b   : > { %v16488_v39 = vadd.f32 %v7610_v16, %v7602_v59  ;;  %15136 = verf.f32 %v768_v27  ;;  %v4900_v22 = vmul.f32 0.70710677, %v16481_v60  ;;  %v10324_v53 = vadd.f32 %v18274_v44, %v18273_v4 }
 0x12c   : > { %v10332_v61 = vmul.f32 %v18275_v15, %v737_v62  ;;  %15138 = verf.f32 %v2178_v30  ;;  %v6261_v13 = vmul.f32 0.70710677, %v16486_v7  ;;  %v16497_v17 = vadd.f32 %v8971_v26, %v8963_v38 }
 0x12d   : > { %18271 = vst [vmem:[#allocation55_spill] sm:$0xff] %v16488_v39  ;;  %v7622_v35 = vmul.f32 0.70710677, %v16488_v39  ;;  %15140 = verf.f32 %v3539_v28  ;;  %v756_v59 = vmul.f32 %v16280_v40, %v741_v12  ;;  %v2167_v16 = vmul.f32 %v18257_v3, %v741_v12 }
 0x12e   : > { %18276 = vst [vmem:[#allocation56_spill] sm:$0xff] %v16497_v17  ;;  %v16499_v48 = vadd.f32 %v10332_v61, %v10324_v53  ;;  %15142 = verf.f32 %v4900_v22  ;;  %v8983_v27 = vmul.f32 0.70710677, %v16497_v17  ;;  %v3528_v62 = vmul.f32 %v18260_v2, %v741_v12 }
 0x12f   : > { %v4889_v30 = vmul.f32 %v18262_v29, %v741_v12  ;;  %15144 = verf.f32 %v6261_v13  ;;  %v16508_v38 = vadd.f32 %v756_v59, %v16401_v23  ;;  %v16511_v28 = vadd.f32 %v2167_v16, %v16403_v14  ;;  %v721_v13 = vpop.permute.xlu1 %720 }
 0x130   : > { %18277 = vst [vmem:[#allocation57_spill] sm:$0xff] %v16499_v48  ;;  %v10344_v4 = vmul.f32 0.70710677, %v16499_v48  ;;  %15146 = verf.f32 %v7622_v35  ;;  %v16514_v26 = vadd.f32 %v3528_v62, %v16408_v10  ;;  %v6250_v44 = vmul.f32 %v18265_v47, %v741_v12  ;;  %v18279_v62 = vld [vmem:[#allocation43_spill] sm:$0xff] }
 0x131   : > { %v16517_v22 = vadd.f32 %v4889_v30, %v16414_v51  ;;  %15148 = verf.f32 %v8983_v27  ;;  %v769_v53 = vmul.f32 0.70710677, %v16508_v38  ;;  %v2179_v61 = vmul.f32 0.70710677, %v16511_v28 }
 0x132   : > { %v7611_v23 = vmul.f32 %v18268_v36, %v741_v12  ;;  %15150 = verf.f32 %v10344_v4  ;;  %v3540_v14 = vmul.f32 0.70710677, %v16514_v26  ;;  %v16526_v10 = vadd.f32 %v6250_v44, %v16421_v42 }
 0x133   : > { %v4901_v35 = vmul.f32 0.70710677, %v16517_v22  ;;  %15152 = verf.f32 %v769_v53  ;;  %v8972_v59 = vmul.f32 %v18272_v54, %v741_v12  ;;  %v10333_v16 = vmul.f32 %v18275_v15, %v741_v12 }
 0x134   : > { %v16529_v51 = vadd.f32 %v7611_v23, %v16423_v33  ;;  %15154 = verf.f32 %v2179_v61  ;;  %v6262_v27 = vmul.f32 0.70710677, %v16526_v10  ;;  %v706_v30 = vadd.f32 %v18279_v62, %v16363_v8  ;;  %v18282_v8 = vld [vmem:[#allocation47_spill] sm:$0xff] }
 0x135   : > { %v730_v4 = vmul.f32 %v18240_v11, %v721_v13  ;;  %v16537_v48 = vpop.eup %15136  ;;  %15156 = verf.f32 %v3540_v14  ;;  %v16541_v33 = vadd.f32 %v8972_v59, %v16427_v20  ;;  %v16544_v44 = vadd.f32 %v10333_v16, %v16432_v52  ;;  %v18283_v52 = vld [vmem:[#allocation31_spill] sm:$0xff] }
 0x136   : > { %18278 = vst [vmem:[#allocation58_spill] sm:$0xff] %v16529_v51  ;;  %v7623_v42 = vmul.f32 0.70710677, %v16529_v51  ;;  %v16546_v12 = vpop.eup %15138  ;;  %15158 = verf.f32 %v4901_v35  ;;  %v2149_v61 = vadd.f32 %v18282_v8, %v16368_v5  ;;  %v2157_v11 = vmul.f32 %v18242_v37, %v721_v13  ;;  %v18284_v5 = vld [vmem:[#allocation32_spill] sm:$0xff] }
 0x137   : > { %18280 = vst [vmem:[#allocation80_spill] sm:$0xff] %v16541_v33  ;;  %18281 = vst [vmem:[#allocation10_spill] sm:$0xff] %v16544_v44  ;;  %v16548_v53 = vadd.f32 %v730_v4, %v706_v30  ;;  %v16553_v23 = vpop.eup %15140  ;;  %15160 = verf.f32 %v6262_v27  ;;  %v8984_v14 = vmul.f32 0.70710677, %v16541_v33  ;;  %v10345_v20 = vmul.f32 0.70710677, %v16544_v44 }
 0x138   : > { %v3510_v59 = vadd.f32 %v18283_v52, %v16371_v56  ;;  %v16559_v16 = vpop.eup %15142  ;;  %15162 = verf.f32 %v7623_v42  ;;  %v16561_v35 = vadd.f32 %v2157_v11, %v2149_v61  ;;  %v3518_v62 = vmul.f32 %v18244_v55, %v721_v13  ;;  %v18285_v4 = vld [vmem:[#allocation33_spill] sm:$0xff]  ;;  %v18287_v55 = vld [vmem:[#allocation34_spill] sm:$0xff]  ;;  %v745_v11 = vpop.permute.xlu1 %744 }
 0x139   : > { %v4871_v37 = vadd.f32 %v18284_v5, %v16374_v63  ;;  %v16566_v30 = vpop.eup %15144  ;;  %15164 = verf.f32 %v8984_v14  ;;  %v4879_v27 = vmul.f32 %v18246_v19, %v721_v13  ;;  %v6232_v8 = vadd.f32 %v18285_v4, %v16378_v25  ;;  %v18289_v25 = vld [vmem:[#allocation35_spill] sm:$0xff] }
 0x13a   : > { %v6240_v56 = vmul.f32 %v18248_v21, %v721_v13  ;;  %v16572_v52 = vpop.eup %15146  ;;  %15166 = verf.f32 %v10345_v20  ;;  %v16574_v42 = vadd.f32 %v3518_v62, %v3510_v59  ;;  %v7593_v61 = vadd.f32 %v18287_v55, %v16381_v18  ;;  %v18291_v18 = vld [vmem:[#allocation36_spill] sm:$0xff]  ;;  %v18292_v55 = vld [vmem:[#allocation74_spill] sm:$0xff] }
 0x13b   : > { %18286 = vst [vmem:[#allocation26_spill] sm:$0xff] %v16572_v52  ;;  %v7601_v63 = vmul.f32 %v18180_v41, %v721_v13  ;;  %v16579_v5 = vpop.eup %15148  ;;  %v16581_v14 = vadd.f32 %v4879_v27, %v4871_v37  ;;  %v8954_v21 = vadd.f32 %v18289_v25, %v16387_v43  ;;  %v8962_v4 = vmul.f32 %v18251_v57, %v721_v13  ;;  %v18293_v57 = vld [vmem:[#allocation75_spill] sm:$0xff] }
 0x13c   : > { %18288 = vst [vmem:[#allocation27_spill] sm:$0xff] %v16579_v5  ;;  %v16583_v19 = vadd.f32 %v6240_v56, %v6232_v8  ;;  %v16588_v20 = vpop.eup %15150  ;;  %v10315_v62 = vadd.f32 %v18291_v18, %v16394_v46  ;;  %v10323_v41 = vmul.f32 %v18254_v9, %v721_v13  ;;  %v733_v37 = vadd.f32 %v18292_v55, %v16435_v58  ;;  %v18294_v46 = vld [vmem:[#allocation71_spill] sm:$0xff]  ;;  %v18295_v13 = vld [vmem:[#allocation72_spill] sm:$0xff]  ;;  %v749_v5 = vpop.permute.xlu0 %748 }
 0x13d   : > { %18290 = vst [vmem:[#allocation14_spill] sm:$0xff] %v16588_v20  ;;  %v16590_v59 = vadd.f32 %v7601_v63, %v7593_v61  ;;  %v16597_v27 = vpop.eup %15152  ;;  %v16599_v8 = vadd.f32 %v8962_v4, %v8954_v21  ;;  %v757_v43 = vmul.f32 %v16280_v40, %v745_v11  ;;  %v2160_v56 = vadd.f32 %v18293_v57, %v16439_v45  ;;  %v18296_v57 = vld [vmem:[#allocation73_spill] sm:$0xff] }
 0x13e   : > { %v2168_v61 = vmul.f32 %v18257_v3, %v745_v11  ;;  %v16605_v63 = vpop.eup %15154  ;;  %v16607_v25 = vadd.f32 %v10323_v41, %v10315_v62  ;;  %v3521_v9 = vadd.f32 %v18294_v46, %v16441_v32  ;;  %v3529_v58 = vmul.f32 %v18260_v2, %v745_v11  ;;  %v18297_v46 = vld [vmem:[#allocation69_spill] sm:$0xff] }
 0x13f   : > { %v4882_v21 = vadd.f32 %v18295_v13, %v16443_v0  ;;  %v16614_v4 = vpop.eup %15156  ;;  %v16616_v18 = vadd.f32 %v757_v43, %v733_v37  ;;  %v4890_v45 = vmul.f32 %v18262_v29, %v745_v11  ;;  %v6243_v62 = vadd.f32 %v18296_v57, %v16446_v24  ;;  %v18299_v24 = vld [vmem:[#allocation12_spill] sm:$0xff] }
 0x140   : > { %v16618_v55 = vadd.f32 %v2168_v61, %v2160_v56  ;;  %v16623_v41 = vpop.eup %15158  ;;  %v16625_v20 = vadd.f32 %v3529_v58, %v3521_v9  ;;  %v6251_v32 = vmul.f32 %v18265_v47, %v745_v11  ;;  %v7604_v0 = vadd.f32 %v18297_v46, %v16448_v31 }
 0x141   : > { %v7612_v13 = vmul.f32 %v18268_v36, %v745_v11  ;;  %v16631_v37 = vpop.eup %15160  ;;  %v770_v43 = vmul.f32 0.70710677, %v16616_v18  ;;  %v16635_v61 = vadd.f32 %v4890_v45, %v4882_v21  ;;  %v8965_v57 = vadd.f32 %v18299_v24, %v16453_v6  ;;  %v18304_v45 = vld [vmem:[#allocation68_spill] sm:$0xff] }
 0x142   : > { %18298 = vst [vmem:[#allocation7_spill] sm:$0xff] %v16631_v37  ;;  %v2180_v56 = vmul.f32 0.70710677, %v16618_v55  ;;  %v16639_v9 = vpop.eup %15162  ;;  %v3541_v58 = vmul.f32 0.70710677, %v16625_v20  ;;  %v16642_v44 = vadd.f32 %v6251_v32, %v6243_v62  ;;  %v8973_v46 = vmul.f32 %v18272_v54, %v745_v11 }
 0x143   : > { %18300 = vst [vmem:[#allocation6_spill] sm:$0xff] %v16639_v9  ;;  %v16644_v31 = vadd.f32 %v7612_v13, %v7604_v0  ;;  %v16647_v33 = vpop.eup %15164  ;;  %15168 = verf.f32 %v770_v43  ;;  %v4902_v21 = vmul.f32 0.70710677, %v16635_v61  ;;  %v10326_v17 = vadd.f32 %v18304_v45, %v16459_v34 }
 0x144   : > { %18301 = vst [vmem:[#allocation8_spill] sm:$0xff] %v16642_v44  ;;  %18303 = vst [vmem:[#allocation9_spill] sm:$0xff] %v16647_v33  ;;  %v10334_v6 = vmul.f32 %v18275_v15, %v745_v11  ;;  %v16653_v24 = vpop.eup %15166  ;;  %15170 = verf.f32 %v2180_v56  ;;  %v6263_v62 = vmul.f32 0.70710677, %v16642_v44  ;;  %v16657_v0 = vadd.f32 %v8973_v46, %v8965_v57 }
 0x145   : > { %18302 = vst [vmem:[#allocation5_spill] sm:$0xff] %v16644_v31  ;;  %18305 = vst [vmem:[#allocation11_spill] sm:$0xff] %v16653_v24  ;;  %v7624_v32 = vmul.f32 0.70710677, %v16644_v31  ;;  %15172 = verf.f32 %v3541_v58  ;;  %v758_v43 = vmul.f32 %v16280_v40, %v749_v5  ;;  %v2169_v33 = vmul.f32 %v18257_v3, %v749_v5 }
 0x146   : > { %18306 = vst [vmem:[#allocation15_spill] sm:$0xff] %v16657_v0  ;;  %v16659_v13 = vadd.f32 %v10334_v6, %v10326_v17  ;;  %15174 = verf.f32 %v4902_v21  ;;  %v8985_v34 = vmul.f32 0.70710677, %v16657_v0  ;;  %v3530_v11 = vmul.f32 %v18260_v2, %v749_v5 }
 0x147   : > { %v4891_v56 = vmul.f32 %v18262_v29, %v749_v5  ;;  %15176 = verf.f32 %v6263_v62  ;;  %v762_v57 = vadd.f32 %v758_v43, %v16548_v53  ;;  %v16669_v58 = vadd.f32 %v2169_v33, %v16561_v35  ;;  %v555_v43 = vld [vmem:[%s17983_s4] sm:$0xff] }
 0x148   : > { %18307 = vst [vmem:[#allocation17_spill] sm:$0xff] %v16659_v13  ;;  %v10346_v45 = vmul.f32 0.70710677, %v16659_v13  ;;  %15178 = verf.f32 %v7624_v32  ;;  %v16672_v40 = vadd.f32 %v3530_v11, %v16574_v42  ;;  %v6252_v17 = vmul.f32 %v18265_v47, %v749_v5 }
 0x149   : > { %v16675_v3 = vadd.f32 %v4891_v56, %v16581_v14  ;;  %15180 = verf.f32 %v8985_v34  ;;  %v771_v2 = vmul.f32 0.70710677, %v762_v57  ;;  %v2181_v29 = vmul.f32 0.70710677, %v16669_v58 }
 0x14a   : > { %v7613_v46 = vmul.f32 %v18268_v36, %v749_v5  ;;  %15182 = verf.f32 %v10346_v45  ;;  %v3542_v53 = vmul.f32 0.70710677, %v16672_v40  ;;  %v16683_v35 = vadd.f32 %v6252_v17, %v16583_v19  ;;  %v559_v36 = vld [vmem:[%s17984_s5] sm:$0xff]  ;;  %v556_v17 = vld [vmem:[%s17983_s4 + $0x8] sm:$0xff] }
 0x14b   : > { %v4903_v33 = vmul.f32 0.70710677, %v16675_v3  ;;  %15184 = verf.f32 %v771_v2  ;;  %v8974_v47 = vmul.f32 %v18272_v54, %v749_v5  ;;  %v10335_v14 = vmul.f32 %v18275_v15, %v749_v5  ;;  %786 = vperm.xlu1 %15106, %v559_v36   ;;  %v557_v2 = vld [vmem:[%s17983_s4 + $0x10] sm:$0xff] }
 0x14c   : > { %18308 = vst [vmem:[#allocation18_spill] sm:$0xff] %v16683_v35  ;;  %v16686_v42 = vadd.f32 %v7613_v46, %v16590_v59  ;;  %15186 = verf.f32 %v2181_v29  ;;  %v6264_v21 = vmul.f32 0.70710677, %v16683_v35  ;;  %v763_v6 = vmul.f32 0.5, %v16466_v50 }
 0x14d   : > { %v764_v19 = vmul.f32 0.5, %v16508_v38  ;;  %v15169_v62 = vpop.eup %15168  ;;  %15188 = verf.f32 %v3542_v53  ;;  %v16698_v54 = vadd.f32 %v8974_v47, %v16599_v8  ;;  %v16701_v15 = vadd.f32 %v10335_v14, %v16607_v25 }
 0x14e   : > { %18309 = vst [vmem:[#allocation19_spill] sm:$0xff] %v16686_v42  ;;  %v7625_v59 = vmul.f32 0.70710677, %v16686_v42  ;;  %v16703_v5 = vpop.eup %15170  ;;  %15190 = verf.f32 %v4903_v33  ;;  %v776_v32 = vadd.f32 1.0, %v16537_v48  ;;  %v777_v50 = vadd.f32 1.0, %v16597_v27  ;;  %v560_v48 = vld [vmem:[%s17984_s5 + $0x8] sm:$0xff] }
 0x14f   : > { %18310 = vst [vmem:[#allocation13_spill] sm:$0xff] %v16698_v54  ;;  %18311 = vst [vmem:[#allocation67_spill] sm:$0xff] %v16701_v15  ;;  %v765_v38 = vmul.f32 0.5, %v16616_v18  ;;  %v16711_v34 = vpop.eup %15172  ;;  %15192 = verf.f32 %v6264_v21  ;;  %v8986_v8 = vmul.f32 0.70710677, %v16698_v54  ;;  %v766_v11 = vmul.f32 0.5, %v762_v57  ;;  %791 = vperm.xlu1 %15106, %v560_v48  }
 0x150   : > { %v10347_v25 = vmul.f32 0.70710677, %v16701_v15  ;;  %v16718_v56 = vpop.eup %15174  ;;  %15194 = verf.f32 %v7625_v59  ;;  %v780_v27 = vmul.f32 %v776_v32, %v763_v6  ;;  %v781_v18 = vmul.f32 %v777_v50, %v764_v19  ;;  %v558_v57 = vld [vmem:[%s17983_s4 + $0x18] sm:$0xff] }
 0x151   : > { %v778_v45 = vadd.f32 1.0, %v15169_v62  ;;  %v16729_v29 = vpop.eup %15176  ;;  %15196 = verf.f32 %v8986_v8  ;;  %v16732_v46 = vmul.f32 0.5, %v16468_v1  ;;  %v16735_v53 = vmul.f32 0.5, %v16511_v28  ;;  %v562_v28 = vld [vmem:[%s17984_s5 + $0x18] sm:$0xff] }
 0x152   : > { %18312 = vst [vmem:[#allocation70_spill] sm:$0xff] %v16729_v29  ;;  %v16737_v33 = vpop.eup %15178  ;;  %15198 = verf.f32 %v10347_v25  ;;  %v818_v47 = vand.u32 4294901760, %v780_v27  ;;  %v821_v14 = vand.u32 4294901760, %v781_v18  ;;  %v806_v6 = vsel %vm804_vm0, %v555_v43, 0  ;;  %v561_v29 = vld [vmem:[%s17984_s5 + $0x10] sm:$0xff] }
 0x153   : > { %18313 = vst [vmem:[#allocation61_spill] sm:$0xff] %v16737_v33  ;;  %v782_v36 = vmul.f32 %v778_v45, %v765_v38  ;;  %v16739_v21 = vpop.eup %15180  ;;  %v809_v19 = vsel %vm804_vm0, %v556_v17, 0  ;;  %v812_v62 = vsel %vm804_vm0, %v557_v2, 0  ;;  %v815_v1 = vsel %vm804_vm0, %v558_v57, 0  ;;  %801 = vperm.xlu1 %15106, %v562_v28   ;;  %796 = vperm.xlu0 %15107, %v561_v29   ;;  %v568_v29 = vld [vmem:[%s17986_s7 + $0x8] sm:$0xff] }
 0x154   : > { %18314 = vst [vmem:[#allocation62_spill] sm:$0xff] %v16739_v21  ;;  %v16748_v59 = vpop.eup %15182  ;;  %v16750_v32 = vpack.c.bf16 %v821_v14, %v818_v47  ;;  %v16752_v38 = vand.u32 4294901760, %v806_v6  ;;  %v16754_v8 = vand.u32 4294901760, %v809_v19  ;;  %v928_v25 = vsub.f32 %v780_v27, %v818_v47 }
 0x155   : > { %18315 = vst [vmem:[#allocation63_spill] sm:$0xff] %v16748_v59  ;;  %v824_v50 = vand.u32 4294901760, %v782_v36  ;;  %v15185_v43 = vpop.eup %15184  ;;  %v935_v48 = vsub.f32 %v781_v18, %v821_v14  ;;  %v16756_v45 = vand.u32 4294901760, %v812_v62  ;;  %v16758_v17 = vand.u32 4294901760, %v815_v1 }
 0x156   : > { %v15187_v2 = vpop.eup %15186  ;;  %13860 = vmatprep.subr.bf16.mxu0 %v16750_v32  ;;  %v779_v57 = vadd.f32 1.0, %v15185_v43  ;;  %v16762_v59 = vsub.f32 %v806_v6, %v16752_v38  ;;  %v16765_v15 = vsub.f32 %v809_v19, %v16754_v8  ;;  %v929_v27 = vand.u32 4294901760, %v928_v25  ;;  %v567_v6 = vld [vmem:[%s17986_s7] sm:$0xff] }
 0x157   : > { %v942_v13 = vsub.f32 %v782_v36, %v824_v50  ;;  %v16767_v24 = vpop.eup %15188  ;;  %13862 = vmatpush3.bf16.msra.mxu0 %v16750_v32  ;;  %v936_v18 = vand.u32 4294901760, %v935_v48  ;;  %v16771_v47 = vsub.f32 %v812_v62, %v16756_v45  ;;  %v16774_v14 = vsub.f32 %v815_v1, %v16758_v17  ;;  %1453 = vperm.xlu1 %15106, %v567_v6  }
 0x158   : > { %v16779_v28 = vpop.eup %15190  ;;  %v783_v19 = vmul.f32 %v779_v57, %v766_v11  ;;  %v16782_v36 = vand.u32 4294901760, %v16762_v59  ;;  %v16785_v43 = vand.u32 4294901760, %v16765_v15  ;;  %v930_v54 = vsub.f32 %v928_v25, %v929_v27  ;;  %1458 = vperm.xlu0 %15107, %v568_v29  }
 0x159   : > { %v943_v21 = vand.u32 4294901760, %v942_v13  ;;  %v16787_v62 = vpop.eup %15192  ;;  %v937_v1 = vsub.f32 %v935_v48, %v936_v18  ;;  %v16790_v0 = vand.u32 4294901760, %v16771_v47  ;;  %v16793_v33 = vand.u32 4294901760, %v16774_v14 }
 0x15a   : > { %18316 = vst [vmem:[#allocation64_spill] sm:$0xff] %v16785_v43  ;;  %18317 = vst [vmem:[#allocation65_spill] sm:$0xff] %v16787_v62  ;;  %v16795_v42 = vpop.eup %15194  ;;  %v827_v11 = vand.u32 4294901760, %v783_v19  ;;  %v889_v57 = vsub.f32 %v16762_v59, %v16782_v36  ;;  %v899_v31 = vsub.f32 %v16765_v15, %v16785_v43  ;;  %v931_v52 = vand.u32 4294901760, %v930_v54 }
 0x15b   : > { %18318 = vst [vmem:[#allocation66_spill] sm:$0xff] %v16790_v0  ;;  %18319 = vst [vmem:[#allocation40_spill] sm:$0xff] %v16793_v33  ;;  %v944_v6 = vsub.f32 %v942_v13, %v943_v21  ;;  %v16801_v9 = vpop.eup %15196  ;;  %v938_v51 = vand.u32 4294901760, %v937_v1  ;;  %v909_v39 = vsub.f32 %v16771_v47, %v16790_v0  ;;  %v919_v62 = vsub.f32 %v16774_v14, %v16793_v33 }
 0x15c   : > { %18320 = vst [vmem:[#allocation28_spill] sm:$0xff] %v16795_v42  ;;  %18321 = vst [vmem:[#allocation42_spill] sm:$0xff] %v16801_v9  ;;  %v569_v42 = vld [vmem:[%s17986_s7 + $0x10] sm:$0xff]  ;;  %v16813_v35 = vpop.eup %15198  ;;  %v16815_v44 = vpack.c.bf16 %v827_v11, %v824_v50  ;;  %v16817_v54 = vand.u32 4294901760, %v889_v57  ;;  %v16819_v1 = vand.u32 4294901760, %v899_v31  ;;  %v949_v0 = vsub.f32 %v783_v19, %v827_v11 }
 0x15d   : > { %18322 = vst [vmem:[#allocation29_spill] sm:$0xff] %v16813_v35  ;;  %v945_v9 = vand.u32 4294901760, %v944_v6  ;;  %1463 = vperm.xlu1 %15106, %v569_v42   ;;  %v13867_v33 = vpack.c.bf16 %v938_v51, %v931_v52  ;;  %v16821_v37 = vand.u32 4294901760, %v909_v39  ;;  %v16823_v43 = vand.u32 4294901760, %v919_v62 }
 0x15e   : > { %13864 = vmatprep.subr.bf16.mxu0 %v16815_v44  ;;  %12523 = vmatprep.mubr.f32.mxu0 %v16817_v54  ;;  %v16827_v35 = vpack.c.bf16 %v935_v48, %v928_v25  ;;  %v16829_v50 = vpack.c.bf16 %v936_v18, %v929_v27  ;;  %v2186_v31 = vadd.f32 1.0, %v16546_v12  ;;  %v2187_v57 = vadd.f32 1.0, %v16605_v63 }
 0x15f   : > { %13866 = vmatpush3.bf16.msra.mxu0 %v16815_v44  ;;  %v950_v51 = vand.u32 4294901760, %v949_v0  ;;  %v16834_v52 = vpack.c.bf16 %v949_v0, %v942_v13  ;;  %v2176_v39 = vmul.f32 0.5, %v16618_v55  ;;  %v2177_v42 = vmul.f32 0.5, %v16669_v58 }
 0x160   : > { %13868 = vmatprep.subr.bf16.mxu0 %v13867_v33  ;;  %v2190_v25 = vmul.f32 %v2186_v31, %v16732_v46  ;;  %v2191_v12 = vmul.f32 %v2187_v57, %v16735_v53  ;;  %v2188_v63 = vadd.f32 1.0, %v16703_v5  ;;  %v2189_v48 = vadd.f32 1.0, %v15187_v2 }
 0x161   : > { %v951_v27 = vsub.f32 %v949_v0, %v950_v51  ;;  %v16844_v13 = vpack.c.bf16 %v950_v51, %v943_v21  ;;  %v3535_v55 = vmul.f32 0.5, %v16473_v49  ;;  %v3536_v58 = vmul.f32 0.5, %v16514_v26  ;;  %v570_v49 = vld [vmem:[%s17986_s7 + $0x18] sm:$0xff] }
 0x162   : > { %12524 = vmatmul.mubr.f32.vlgmr.msra.gmra.mrb[0].mxu0 %v16819_v1  ;;  %v2195_v18 = vand.u32 4294901760, %v2190_v25  ;;  %v2198_v19 = vand.u32 4294901760, %v2191_v12  ;;  %v2192_v62 = vmul.f32 %v2188_v63, %v2176_v39  ;;  %v2193_v11 = vmul.f32 %v2189_v48, %v2177_v42  ;;  %1468 = vperm.xlu0 %15107, %v570_v49  }
 0x163   : > { %13870 = vmatpush3.bf16.msra.mxu0 %v13867_v33  ;;  %v952_v46 = vand.u32 4294901760, %v951_v27  ;;  %12526 = vmatprep.mubr.f32.mxu0 %v16821_v37  ;;  %v3547_v5 = vadd.f32 1.0, %v16553_v23  ;;  %v3548_v0 = vadd.f32 1.0, %v16614_v4  ;;  %v3537_v53 = vmul.f32 0.5, %v16625_v20 }
 0x164   : > { %v16856_v26 = vpack.c.bf16 %v2198_v19, %v2195_v18  ;;  %v2201_v21 = vand.u32 4294901760, %v2192_v62  ;;  %v2204_v2 = vand.u32 4294901760, %v2193_v11  ;;  %v2305_v6 = vsub.f32 %v2190_v25, %v2195_v18 }
 0x165   : > { %v13871_v33 = vpack.c.bf16 %v952_v46, %v945_v9  ;;  %v2312_v31 = vsub.f32 %v2191_v12, %v2198_v19  ;;  %v3551_v57 = vmul.f32 %v3547_v5, %v3535_v55  ;;  %v3552_v51 = vmul.f32 %v3548_v0, %v3536_v58 }
 0x166   : > { %12527 = vmatmul.mubr.f32.gmra.mrb[2].mxu0 %v16823_v43  ;;  %v16859_v23 = vpack.c.bf16 %v2204_v2, %v2201_v21  ;;  %v2306_v4 = vand.u32 4294901760, %v2305_v6  ;;  %v2319_v20 = vsub.f32 %v2192_v62, %v2201_v21  ;;  %v2326_v39 = vsub.f32 %v2193_v11, %v2204_v2 }
 0x167   : > { %13872 = vmatprep.subr.bf16.mxu0 %v13871_v33  ;;  %12537 = vmatprep.mubr.f32.mxu0 %v16752_v38  ;;  %v2313_v42 = vand.u32 4294901760, %v2312_v31  ;;  %v16862_v29 = vpack.c.bf16 %v2312_v31, %v2305_v6  ;;  %v3556_v63 = vand.u32 4294901760, %v3551_v57  ;;  %v3559_v25 = vand.u32 4294901760, %v3552_v51 }
 0x168   : > { %13874 = vmatpush3.bf16.msra.mxu0 %v13871_v33  ;;  %v2307_v9 = vsub.f32 %v2305_v6, %v2306_v4  ;;  %v2320_v12 = vand.u32 4294901760, %v2319_v20  ;;  %v2327_v48 = vand.u32 4294901760, %v2326_v39  ;;  %v16864_v27 = vpack.c.bf16 %v2326_v39, %v2319_v20 }
 0x169   : > { %13876 = vmatprep.subr.bf16.mxu0 %v16827_v35  ;;  %v2314_v55 = vsub.f32 %v2312_v31, %v2313_v42  ;;  %v16867_v58 = vpack.c.bf16 %v2313_v42, %v2306_v4  ;;  %v16869_v18 = vpack.c.bf16 %v3559_v25, %v3556_v63  ;;  %v3538_v19 = vmul.f32 0.5, %v16672_v40 }
 0x16a   : > { %v2308_v62 = vand.u32 4294901760, %v2307_v9  ;;  %v2321_v11 = vsub.f32 %v2319_v20, %v2320_v12  ;;  %v2328_v46 = vsub.f32 %v2326_v39, %v2327_v48  ;;  %v16872_v5 = vpack.c.bf16 %v2327_v48, %v2320_v12 }
 0x16b   : > { %12538 = vmatmul.mubr.f32.vlgmr.msra.gmra.mrb[0].mxu0 %v16754_v8  ;;  %v2315_v0 = vand.u32 4294901760, %v2314_v55  ;;  %v3549_v49 = vadd.f32 1.0, %v16711_v34  ;;  %v3550_v21 = vadd.f32 1.0, %v16767_v24  ;;  %v3666_v2 = vsub.f32 %v3551_v57, %v3556_v63 }
 0x16c   : > { %13878 = vmatpush3.bf16.msra.mxu0 %v16827_v35  ;;  %12540 = vmatprep.mubr.f32.mxu0 %v16756_v45  ;;  %v2322_v6 = vand.u32 4294901760, %v2321_v11  ;;  %v2329_v33 = vand.u32 4294901760, %v2328_v46  ;;  %v3673_v40 = vsub.f32 %v3552_v51, %v3559_v25  ;;  %v4896_v31 = vmul.f32 0.5, %v16481_v60 }
 0x16d   : > { %13880 = vmatprep.subr.bf16.mxu0 %v16834_v52  ;;  %v16881_v4 = vpack.c.bf16 %v2315_v0, %v2308_v62  ;;  %v3553_v20 = vmul.f32 %v3549_v49, %v3537_v53  ;;  %v3554_v39 = vmul.f32 %v3550_v21, %v3538_v19  ;;  %v3667_v42 = vand.u32 4294901760, %v3666_v2 }
 0x16e   : > { %v16883_v34 = vpack.c.bf16 %v2329_v33, %v2322_v6  ;;  %v3674_v24 = vand.u32 4294901760, %v3673_v40  ;;  %v16885_v57 = vpack.c.bf16 %v3673_v40, %v3666_v2  ;;  %v4897_v35 = vmul.f32 0.5, %v16517_v22 }
 0x16f   : > { %12541 = vmatmul.mubr.f32.gmra.mrb[2].mxu0 %v16758_v17  ;;  %v3562_v63 = vand.u32 4294901760, %v3553_v20  ;;  %v3565_v51 = vand.u32 4294901760, %v3554_v39  ;;  %v3668_v25 = vsub.f32 %v3666_v2, %v3667_v42  ;;  %v4908_v60 = vadd.f32 1.0, %v16559_v16 }
 0x170   : > { %13882 = vmatpush3.bf16.msra.mxu0 %v16834_v52  ;;  %12551 = vmatprep.mubr.f32.mxu0 %v16762_v59  ;;  %v3675_v53 = vsub.f32 %v3673_v40, %v3674_v24  ;;  %v16892_v9 = vpack.c.bf16 %v3674_v24, %v3667_v42  ;;  %v4909_v12 = vadd.f32 1.0, %v16623_v41  ;;  %v4898_v48 = vmul.f32 0.5, %v16635_v61 }
 0x171   : > { %13884 = vmatprep.subr.bf16.mxu0 %v16750_v32  ;;  %v16897_v22 = vpack.c.bf16 %v3565_v51, %v3562_v63  ;;  %v3669_v55 = vand.u32 4294901760, %v3668_v25  ;;  %v3680_v19 = vsub.f32 %v3553_v20, %v3562_v63  ;;  %v3687_v62 = vsub.f32 %v3554_v39, %v3565_v51 }
 0x172   : > { %v3676_v11 = vand.u32 4294901760, %v3675_v53  ;;  %v4912_v16 = vmul.f32 %v4908_v60, %v4896_v31  ;;  %v4913_v46 = vmul.f32 %v4909_v12, %v4897_v35  ;;  %v4899_v52 = vmul.f32 0.5, %v16675_v3 }
 0x173   : > { %12552 = vmatmul.mubr.f32.vlgmr.msra.gmra.mrb[0].mxu0 %v16765_v15  ;;  %v3681_v0 = vand.u32 4294901760, %v3680_v19  ;;  %v3688_v49 = vand.u32 4294901760, %v3687_v62  ;;  %v16901_v21 = vpack.c.bf16 %v3687_v62, %v3680_v19  ;;  %v4910_v41 = vadd.f32 1.0, %v16718_v56 }
 0x174   : > { %13886 = vmatpush3.bf16.msra.mxu0 %v16750_v32  ;;  %12554 = vmatprep.mubr.f32.mxu0 %v16771_v47  ;;  %v16906_v61 = vpack.c.bf16 %v3676_v11, %v3669_v55  ;;  %v4917_v2 = vand.u32 4294901760, %v4912_v16  ;;  %v4920_v6 = vand.u32 4294901760, %v4913_v46  ;;  %v4911_v33 = vadd.f32 1.0, %v16779_v28 }
 0x175   : > { %13888 = vmatprep.subr.bf16.mxu0 %v16815_v44  ;;  %v3682_v3 = vsub.f32 %v3680_v19, %v3681_v0  ;;  %v3689_v40 = vsub.f32 %v3687_v62, %v3688_v49  ;;  %v16910_v31 = vpack.c.bf16 %v3688_v49, %v3681_v0  ;;  %v4914_v20 = vmul.f32 %v4910_v41, %v4898_v48  ;;  %v18326_v41 = vld [vmem:[#allocation7_spill] sm:$0xff] }
 0x176   : > { %v16912_v39 = vpack.c.bf16 %v4920_v6, %v4917_v2  ;;  %v4915_v56 = vmul.f32 %v4911_v33, %v4899_v52  ;;  %v5027_v42 = vsub.f32 %v4912_v16, %v4917_v2  ;;  %v5034_v24 = vsub.f32 %v4913_v46, %v4920_v6  ;;  %v18324_v52 = vld [vmem:[#allocation64_spill] sm:$0xff]  ;;  %v18327_v33 = vld [vmem:[#allocation66_spill] sm:$0xff] }
 0x177   : > { %12555 = vmatmul.mubr.f32.gmra.mrb[2].mxu0 %v16774_v14  ;;  %v3683_v35 = vand.u32 4294901760, %v3682_v3  ;;  %v3690_v63 = vand.u32 4294901760, %v3689_v40  ;;  %v4923_v51 = vand.u32 4294901760, %v4914_v20  ;;  %v6257_v25 = vmul.f32 0.5, %v16486_v7 }
 0x178   : > { %13890 = vmatpush3.bf16.msra.mxu0 %v16815_v44  ;;  %12565 = vmatprep.mubr.f32.mxu0 %v16782_v36  ;;  %v4926_v28 = vand.u32 4294901760, %v4915_v56  ;;  %v5028_v60 = vand.u32 4294901760, %v5027_v42  ;;  %v5035_v53 = vand.u32 4294901760, %v5034_v24  ;;  %v16918_v12 = vpack.c.bf16 %v5034_v24, %v5027_v42 }
 0x179   : > { %13892 = vmatprep.subr.bf16.mxu0 %v16829_v50  ;;  %v16921_v48 = vpack.c.bf16 %v3690_v63, %v3683_v35  ;;  %v5041_v55 = vsub.f32 %v4914_v20, %v4923_v51  ;;  %v6258_v19 = vmul.f32 0.5, %v16526_v10  ;;  %v6269_v62 = vadd.f32 1.0, %v16566_v30 }
 0x17a   : > { %18323 = vst [vmem:[#allocation20_spill] sm:$0xff] %v16918_v12  ;;  %v16925_v11 = vpack.c.bf16 %v4926_v28, %v4923_v51  ;;  %v5029_v7 = vsub.f32 %v5027_v42, %v5028_v60  ;;  %v5036_v16 = vsub.f32 %v5034_v24, %v5035_v53  ;;  %v5048_v46 = vsub.f32 %v4915_v56, %v4926_v28  ;;  %v18329_v24 = vld [vmem:[#allocation8_spill] sm:$0xff] }
 0x17b   : > { %12566 = vmatmul.mubr.f32.vlgmr.msra.gmra.mrb[0].mxu0 %v18324_v52  ;;  %v5042_v0 = vand.u32 4294901760, %v5041_v55  ;;  %v16928_v49 = vpack.c.bf16 %v5035_v53, %v5028_v60  ;;  %v6270_v2 = vadd.f32 1.0, %v18326_v41  ;;  %v6273_v6 = vmul.f32 %v6269_v62, %v6257_v25  ;;  %v18332_v60 = vld [vmem:[#allocation40_spill] sm:$0xff]  ;;  %v18334_v41 = vld [vmem:[#allocation65_spill] sm:$0xff] }
 0x17c   : > { %13894 = vmatpush3.bf16.msra.mxu0 %v16829_v50  ;;  %12568 = vmatprep.mubr.f32.mxu0 %v18327_v33  ;;  %v5030_v10 = vand.u32 4294901760, %v5029_v7  ;;  %v5037_v3 = vand.u32 4294901760, %v5036_v16  ;;  %v5049_v30 = vand.u32 4294901760, %v5048_v46  ;;  %v16933_v40 = vpack.c.bf16 %v5048_v46, %v5041_v55  ;;  %v18331_v50 = vld [vmem:[#allocation18_spill] sm:$0xff]  ;;  %v18350_v12 = vld [vmem:[#allocation80_spill] sm:$0xff] }
 0x17d   : > { %18325 = vst [vmem:[#allocation30_spill] sm:$0xff] %v16928_v49  ;;  %13896 = vmatprep.subr.bf16.mxu0 %v16844_v13  ;;  %v5043_v20 = vsub.f32 %v5041_v55, %v5042_v0  ;;  %v6274_v56 = vmul.f32 %v6270_v2, %v6258_v19  ;;  %v6278_v42 = vand.u32 4294901760, %v6273_v6  ;;  %v6259_v35 = vmul.f32 0.5, %v18329_v24  ;;  %v18333_v7 = vld [vmem:[#allocation70_spill] sm:$0xff]  ;;  %v18335_v2 = vld [vmem:[#allocation55_spill] sm:$0xff] }
 0x17e   : > { %18328 = vst [vmem:[#allocation21_spill] sm:$0xff] %v16933_v40  ;;  %v16937_v63 = vpack.c.bf16 %v5037_v3, %v5030_v10  ;;  %v5050_v51 = vsub.f32 %v5048_v46, %v5049_v30  ;;  %v16939_v25 = vpack.c.bf16 %v5049_v30, %v5042_v0  ;;  %v6260_v28 = vmul.f32 0.5, %v18331_v50  ;;  %v18336_v0 = vld [vmem:[#allocation58_spill] sm:$0xff] }
 0x17f   : > { %12569 = vmatmul.mubr.f32.gmra.mrb[2].mxu0 %v18332_v60  ;;  %v5044_v53 = vand.u32 4294901760, %v5043_v20  ;;  %v6281_v62 = vand.u32 4294901760, %v6274_v56  ;;  %v6271_v16 = vadd.f32 1.0, %v18333_v7  ;;  %v6272_v49 = vadd.f32 1.0, %v18334_v41  ;;  %v18338_v41 = vld [vmem:[#allocation26_spill] sm:$0xff] }
 0x180   : > { %18330 = vst [vmem:[#allocation37_spill] sm:$0xff] %v16939_v25  ;;  %13898 = vmatpush3.bf16.msra.mxu0 %v16844_v13  ;;  %12579 = vmatprep.mubr.f32.mxu0 %v16752_v38  ;;  %v5051_v55 = vand.u32 4294901760, %v5050_v51  ;;  %v6388_v19 = vsub.f32 %v6273_v6, %v6278_v42  ;;  %v7618_v46 = vmul.f32 0.5, %v18335_v2  ;;  %v7619_v10 = vmul.f32 0.5, %v18336_v0  ;;  %v18339_v25 = vld [vmem:[#allocation6_spill] sm:$0xff] }
 0x181   : > { %13900 = vmatprep.subr.bf16.mxu0 %v16750_v32  ;;  %v16950_v3 = vpack.c.bf16 %v6281_v62, %v6278_v42  ;;  %v6275_v30 = vmul.f32 %v6271_v16, %v6259_v35  ;;  %v6276_v20 = vmul.f32 %v6272_v49, %v6260_v28  ;;  %v6395_v24 = vsub.f32 %v6274_v56, %v6281_v62  ;;  %v18341_v35 = vld [vmem:[#allocation5_spill] sm:$0xff] }
 0x182   : > { %v16952_v50 = vpack.c.bf16 %v5051_v55, %v5044_v53  ;;  %v6389_v7 = vand.u32 4294901760, %v6388_v19  ;;  %v7630_v13 = vadd.f32 1.0, %v18338_v41  ;;  %v7631_v40 = vadd.f32 1.0, %v18339_v25 }
 0x183   : > { %18337 = vst [vmem:[#allocation22_spill] sm:$0xff] %v16950_v3  ;;  %12580 = vmatmul.mubr.f32.vlgmr.msra.gmra.mrb[0].mxu0 %v16754_v8  ;;  %v6284_v6 = vand.u32 4294901760, %v6275_v30  ;;  %v6287_v51 = vand.u32 4294901760, %v6276_v20  ;;  %v6396_v2 = vand.u32 4294901760, %v6395_v24  ;;  %v16957_v0 = vpack.c.bf16 %v6395_v24, %v6388_v19 }
 0x184   : > { %13902 = vmatpush3.bf16.msra.mxu0 %v16750_v32  ;;  %12582 = vmatprep.mubr.f32.mxu0 %v16756_v45  ;;  %v6390_v49 = vsub.f32 %v6388_v19, %v6389_v7  ;;  %v7634_v56 = vmul.f32 %v7630_v13, %v7618_v46  ;;  %v7635_v42 = vmul.f32 %v7631_v40, %v7619_v10  ;;  %v7620_v28 = vmul.f32 0.5, %v18341_v35  ;;  %v18348_v13 = vld [vmem:[#allocation28_spill] sm:$0xff] }
 0x185   : > { %18340 = vst [vmem:[#allocation38_spill] sm:$0xff] %v16957_v0  ;;  %13904 = vmatprep.subr.bf16.mxu0 %v16815_v44  ;;  %v16963_v53 = vpack.c.bf16 %v6287_v51, %v6284_v6  ;;  %v6397_v25 = vsub.f32 %v6395_v24, %v6396_v2  ;;  %v6402_v62 = vsub.f32 %v6275_v30, %v6284_v6  ;;  %v18346_v30 = vld [vmem:[#allocation19_spill] sm:$0xff]  ;;  %v18347_v24 = vld [vmem:[#allocation61_spill] sm:$0xff]  ;;  %v7633_v6 = vadd.f32 1.0, %v18348_v13 }
 0x186   : > { %v6409_v16 = vsub.f32 %v6276_v20, %v6287_v51  ;;  %v6391_v55 = vand.u32 4294901760, %v6390_v49  ;;  %v16965_v41 = vpack.c.bf16 %v6396_v2, %v6389_v7  ;;  %v7639_v0 = vand.u32 4294901760, %v7634_v56 }
 0x187   : > { %18342 = vst [vmem:[#allocation23_spill] sm:$0xff] %v16963_v53  ;;  %v7642_v3 = vand.u32 4294901760, %v7635_v42  ;;  %12583 = vmatmul.mubr.f32.gmra.mrb[2].mxu0 %v16758_v17  ;;  %v6398_v32 = vand.u32 4294901760, %v6397_v25  ;;  %v6403_v19 = vand.u32 4294901760, %v6402_v62  ;;  %v7621_v20 = vmul.f32 0.5, %v18346_v30  ;;  %v18349_v53 = vld [vmem:[#allocation56_spill] sm:$0xff] }
 0x188   : > { %18343 = vst [vmem:[#allocation24_spill] sm:$0xff] %v16965_v41  ;;  %v6410_v46 = vand.u32 4294901760, %v6409_v16  ;;  %v16968_v40 = vpack.c.bf16 %v6409_v16, %v6402_v62  ;;  %13906 = vmatpush3.bf16.msra.mxu0 %v16815_v44  ;;  %12593 = vmatprep.mubr.f32.mxu0 %v16752_v38  ;;  %v7632_v7 = vadd.f32 1.0, %v18347_v24  ;;  %v7749_v41 = vsub.f32 %v7634_v56, %v7639_v0  ;;  %v18352_v56 = vld [vmem:[#allocation27_spill] sm:$0xff] }
 0x189   : > { %v16972_v10 = vpack.c.bf16 %v7642_v3, %v7639_v0  ;;  %13956 = vmatprep.subr.bf16.mxu0 %v16856_v26  ;;  %v16978_v51 = vpack.c.bf16 %v6398_v32, %v6391_v55  ;;  %v6404_v2 = vsub.f32 %v6402_v62, %v6403_v19  ;;  %v7637_v44 = vmul.f32 %v7633_v6, %v7621_v20 }
 0x18a   : > { %18344 = vst [vmem:[#allocation41_spill] sm:$0xff] %v16968_v40  ;;  %v6411_v49 = vsub.f32 %v6409_v16, %v6410_v46  ;;  %v16980_v35 = vpack.c.bf16 %v6410_v46, %v6403_v19  ;;  %v7636_v25 = vmul.f32 %v7632_v7, %v7620_v28  ;;  %v7756_v40 = vsub.f32 %v7635_v42, %v7642_v3  ;;  %v18353_v28 = vld [vmem:[#allocation9_spill] sm:$0xff] }
 0x18b   : > { %18345 = vst [vmem:[#allocation39_spill] sm:$0xff] %v16972_v10  ;;  %12594 = vmatmul.mubr.f32.vlgmr.msra.gmra.mrb[0].mxu0 %v16754_v8  ;;  %v6405_v10 = vand.u32 4294901760, %v6404_v2  ;;  %v8979_v24 = vmul.f32 0.5, %v18349_v53  ;;  %v8980_v13 = vmul.f32 0.5, %v18350_v12  ;;  %v7648_v16 = vand.u32 4294901760, %v7637_v44 }
 0x18c   : > { %v6412_v30 = vand.u32 4294901760, %v6411_v49  ;;  %13958 = vmatpush3.bf16.msra.mxu0 %v16856_v26  ;;  %12596 = vmatprep.mubr.f32.mxu0 %v16756_v45  ;;  %v7645_v62 = vand.u32 4294901760, %v7636_v25  ;;  %v7750_v55 = vand.u32 4294901760, %v7749_v41  ;;  %v7757_v32 = vand.u32 4294901760, %v7756_v40 }
 0x18d   : > { %13960 = vmatprep.subr.bf16.mxu0 %v16859_v23  ;;  %v16990_v3 = vpack.c.bf16 %v7756_v40, %v7749_v41  ;;  %v8991_v42 = vadd.f32 1.0, %v18352_v56  ;;  %v8992_v53 = vadd.f32 1.0, %v18353_v28  ;;  %v7770_v7 = vsub.f32 %v7637_v44, %v7648_v16  ;;  %v18355_v28 = vld [vmem:[#allocation15_spill] sm:$0xff] }
 0x18e   : > { %v16988_v0 = vpack.c.bf16 %v6412_v30, %v6405_v10  ;;  %v16994_v19 = vpack.c.bf16 %v7648_v16, %v7645_v62  ;;  %v7751_v12 = vsub.f32 %v7749_v41, %v7750_v55  ;;  %v7758_v46 = vsub.f32 %v7756_v40, %v7757_v32 }
 0x18f   : > { %18351 = vst [vmem:[#allocation25_spill] sm:$0xff] %v16990_v3  ;;  %v7763_v20 = vsub.f32 %v7636_v25, %v7645_v62  ;;  %12597 = vmatmul.mubr.f32.gmra.mrb[2].mxu0 %v16758_v17  ;;  %v16997_v6 = vpack.c.bf16 %v7757_v32, %v7750_v55  ;;  %v8995_v2 = vmul.f32 %v8991_v42, %v8979_v24  ;;  %v8981_v3 = vmul.f32 0.5, %v18355_v28  ;;  %v18359_v55 = vld [vmem:[#allocation62_spill] sm:$0xff] }
 0x190   : > { %v8996_v49 = vmul.f32 %v8992_v53, %v8980_v13  ;;  %13962 = vmatpush3.bf16.msra.mxu0 %v16859_v23  ;;  %12691 = vmatprep.mubr.f32.mxu0 %v16817_v54  ;;  %v7752_v10 = vand.u32 4294901760, %v7751_v12  ;;  %v7759_v30 = vand.u32 4294901760, %v7758_v46  ;;  %v7771_v41 = vand.u32 4294901760, %v7770_v7  ;;  %v18358_v13 = vld [vmem:[#allocation13_spill] sm:$0xff]  ;;  %v18362_v46 = vld [vmem:[#allocation42_spill] sm:$0xff] }
 0x191   : > { %18354 = vst [vmem:[#allocation16_spill] sm:$0xff] %v16997_v6  ;;  %v7764_v56 = vand.u32 4294901760, %v7763_v20  ;;  %13964 = vmatprep.subr.bf16.mxu0 %v16881_v4  ;;  %v17003_v40 = vpack.c.bf16 %v7770_v7, %v7763_v20  ;;  %v9000_v25 = vand.u32 4294901760, %v8995_v2  ;;  %v8982_v16 = vmul.f32 0.5, %v18358_v13 }
 0x192   : > { %v9003_v44 = vand.u32 4294901760, %v8996_v49  ;;  %v17005_v62 = vpack.c.bf16 %v7759_v30, %v7752_v10  ;;  %v8993_v32 = vadd.f32 1.0, %v18359_v55  ;;  %v7772_v42 = vsub.f32 %v7770_v7, %v7771_v41 }
 0x193   : > { %18356 = vst [vmem:[#allocation59_spill] sm:$0xff] %v17003_v40  ;;  %v7765_v24 = vsub.f32 %v7763_v20, %v7764_v56  ;;  %12692 = vmatmul.mubr.f32.vlgmr.msra.gmra.mrb[4].mxu0 %v16819_v1  ;;  %v17010_v53 = vpack.c.bf16 %v7771_v41, %v7764_v56  ;;  %v8994_v28 = vadd.f32 1.0, %v18362_v46  ;;  %v9110_v20 = vsub.f32 %v8995_v2, %v9000_v25  ;;  %v18363_v40 = vld [vmem:[#allocation57_spill] sm:$0xff]  ;;  %v18364_v56 = vld [vmem:[#allocation10_spill] sm:$0xff] }
 0x194   : > { %18357 = vst [vmem:[#allocation60_spill] sm:$0xff] %v17005_v62  ;;  %v17012_v12 = vpack.c.bf16 %v9003_v44, %v9000_v25  ;;  %13966 = vmatpush3.bf16.msra.mxu0 %v16881_v4  ;;  %12694 = vmatprep.mubr.f32.mxu0 %v16821_v37  ;;  %v8997_v30 = vmul.f32 %v8993_v32, %v8981_v3  ;;  %v7773_v13 = vand.u32 4294901760, %v7772_v42  ;;  %v10340_v7 = vmul.f32 0.5, %v18363_v40  ;;  %v18367_v2 = vld [vmem:[#allocation14_spill] sm:$0xff]  ;;  %v18368_v25 = vld [vmem:[#allocation11_spill] sm:$0xff]  ;;  %v18369_v32 = vld [vmem:[#allocation17_spill] sm:$0xff] }
 0x195   : > { %18360 = vst [vmem:[#allocation84_spill] sm:$0xff] %v17010_v53  ;;  %v7766_v10 = vand.u32 4294901760, %v7765_v24  ;;  %v9117_v6 = vsub.f32 %v8996_v49, %v9003_v44  ;;  %13968 = vmatprep.subr.bf16.mxu0 %v16883_v34  ;;  %v8998_v55 = vmul.f32 %v8994_v28, %v8982_v16  ;;  %v10341_v41 = vmul.f32 0.5, %v18364_v56 }
 0x196   : > { %18361 = vst [vmem:[#allocation83_spill] sm:$0xff] %v17012_v12  ;;  %v9006_v53 = vand.u32 4294901760, %v8997_v30  ;;  %v9111_v12 = vand.u32 4294901760, %v9110_v20  ;;  %v10352_v49 = vadd.f32 1.0, %v18367_v2  ;;  %v10353_v44 = vadd.f32 1.0, %v18368_v25 }
 0x197   : > { %v9118_v62 = vand.u32 4294901760, %v9117_v6  ;;  %v17020_v46 = vpack.c.bf16 %v9117_v6, %v9110_v20  ;;  %12695 = vmatmul.mubr.f32.gmra.mrb[6].mxu0 %v16823_v43  ;;  %v17023_v4 = vpack.c.bf16 %v7773_v13, %v7766_v10  ;;  %v9009_v3 = vand.u32 4294901760, %v8998_v55 }
 0x198   : > { %13970 = vmatpush3.bf16.msra.mxu0 %v16883_v34  ;;  %12705 = vmatprep.mubr.f32.mxu0 %v16752_v38  ;;  %v9112_v40 = vsub.f32 %v9110_v20, %v9111_v12  ;;  %v9124_v16 = vsub.f32 %v8997_v30, %v9006_v53  ;;  %v10342_v42 = vmul.f32 0.5, %v18369_v32  ;;  %v10356_v56 = vmul.f32 %v10352_v49, %v10340_v7  ;;  %v18371_v30 = vld [vmem:[#allocation67_spill] sm:$0xff]  ;;  %v18373_v49 = vld [vmem:[#allocation29_spill] sm:$0xff] }
 0x199   : > { %18365 = vst [vmem:[#allocation44_spill] sm:$0xff] %v17020_v46  ;;  %18366 = vst [vmem:[#allocation76_spill] sm:$0xff] %v17023_v4  ;;  %v9119_v24 = vsub.f32 %v9117_v6, %v9118_v62  ;;  %13972 = vmatprep.subr.bf16.mxu0 %v16862_v29  ;;  %v17031_v28 = vpack.c.bf16 %v9009_v3, %v9006_v53  ;;  %v9131_v10 = vsub.f32 %v8998_v55, %v9009_v3  ;;  %v18372_v55 = vld [vmem:[#allocation63_spill] sm:$0xff] }
 0x19a   : > { %v17033_v13 = vpack.c.bf16 %v9118_v62, %v9111_v12  ;;  %v9113_v2 = vand.u32 4294901760, %v9112_v40  ;;  %v9125_v25 = vand.u32 4294901760, %v9124_v16  ;;  %v10357_v4 = vmul.f32 %v10353_v44, %v10341_v41 }
 0x19b   : > { %v9120_v46 = vand.u32 4294901760, %v9119_v24  ;;  %12706 = vmatmul.mubr.f32.vlgmr.msra.gmra.mrb[4].mxu0 %v16754_v8  ;;  %v9132_v34 = vand.u32 4294901760, %v9131_v10  ;;  %v17036_v20 = vpack.c.bf16 %v9131_v10, %v9124_v16  ;;  %v10361_v6 = vand.u32 4294901760, %v10356_v56 }
 0x19c   : > { %18370 = vst [vmem:[#allocation45_spill] sm:$0xff] %v17033_v13  ;;  %v10343_v32 = vmul.f32 0.5, %v18371_v30  ;;  %13974 = vmatpush3.bf16.msra.mxu0 %v16862_v29  ;;  %12708 = vmatprep.mubr.f32.mxu0 %v16756_v45  ;;  %v9126_v62 = vsub.f32 %v9124_v16, %v9125_v25  ;;  %v10364_v12 = vand.u32 4294901760, %v10357_v4  ;;  %v10354_v7 = vadd.f32 1.0, %v18372_v55 }
 0x19d   : > { %v17041_v53 = vpack.c.bf16 %v9120_v46, %v9113_v2  ;;  %13976 = vmatprep.subr.bf16.mxu0 %v16864_v27  ;;  %v9133_v41 = vsub.f32 %v9131_v10, %v9132_v34  ;;  %v17045_v3 = vpack.c.bf16 %v9132_v34, %v9125_v25  ;;  %v10355_v44 = vadd.f32 1.0, %v18373_v49 }
 0x19e   : > { %v10471_v40 = vsub.f32 %v10356_v56, %v10361_v6  ;;  %v9127_v24 = vand.u32 4294901760, %v9126_v62  ;;  %v17048_v30 = vpack.c.bf16 %v10364_v12, %v10361_v6  ;;  %v10358_v29 = vmul.f32 %v10354_v7, %v10342_v42 }
 0x19f   : > { %v10478_v13 = vsub.f32 %v10357_v4, %v10364_v12  ;;  %12709 = vmatmul.mubr.f32.gmra.mrb[6].mxu0 %v16758_v17  ;;  %v9134_v46 = vand.u32 4294901760, %v9133_v41  ;;  %v10359_v16 = vmul.f32 %v10355_v44, %v10343_v32 }
 0x1a0   : > { %v10472_v2 = vand.u32 4294901760, %v10471_v40  ;;  %13978 = vmatpush3.bf16.msra.mxu0 %v16864_v27  ;;  %12719 = vmatprep.mubr.f32.mxu0 %v16762_v59  ;;  %v10367_v10 = vand.u32 4294901760, %v10358_v29 }
 0x1a1   : > { %v10479_v25 = vand.u32 4294901760, %v10478_v13  ;;  %v17053_v34 = vpack.c.bf16 %v10478_v13, %v10471_v40  ;;  %13980 = vmatprep.subr.bf16.mxu0 %v16856_v26  ;;  %v17056_v56 = vpack.c.bf16 %v9134_v46, %v9127_v24  ;;  %v10370_v6 = vand.u32 4294901760, %v10359_v16 }
 0x1a2   : > { %v10473_v42 = vsub.f32 %v10471_v40, %v10472_v2  ;;  %v10485_v62 = vsub.f32 %v10358_v29, %v10367_v10 }
 0x1a3   : > { %18374 = vst [vmem:[#allocation77_spill] sm:$0xff] %v17053_v34  ;;  %v10480_v4 = vsub.f32 %v10478_v13, %v10479_v25  ;;  %v17058_v12 = vpack.c.bf16 %v10479_v25, %v10472_v2  ;;  %12720 = vmatmul.mubr.f32.vlgmr.msra.gmra.mrb[4].mxu0 %v16765_v15  ;;  %v17061_v32 = vpack.c.bf16 %v10370_v6, %v10367_v10  ;;  %v18391_v25 = vld [vmem:[#allocation25_spill] sm:$0xff] }
 0x1a4   : > { %v10474_v27 = vand.u32 4294901760, %v10473_v42  ;;  %v10492_v55 = vsub.f32 %v10359_v16, %v10370_v6  ;;  %13982 = vmatpush3.bf16.msra.mxu0 %v16856_v26  ;;  %12722 = vmatprep.mubr.f32.mxu0 %v16771_v47  ;;  %v10486_v41 = vand.u32 4294901760, %v10485_v62  ;;  %v18392_v42 = vld [vmem:[#allocation59_spill] sm:$0xff] }
 0x1a5   : > { %18375 = vst [vmem:[#allocation51_spill] sm:$0xff] %v17058_v12  ;;  %v10481_v7 = vand.u32 4294901760, %v10480_v4  ;;  %13984 = vmatprep.subr.bf16.mxu0 %v16859_v23 }
 0x1a6   : > { %v10493_v49 = vand.u32 4294901760, %v10492_v55  ;;  %v17066_v44 = vpack.c.bf16 %v10492_v55, %v10485_v62  ;;  %v10487_v40 = vsub.f32 %v10485_v62, %v10486_v41 }
 0x1a7   : > { %v17068_v13 = vpack.c.bf16 %v10481_v7, %v10474_v27  ;;  %12723 = vmatmul.mubr.f32.gmra.mrb[6].mxu0 %v16774_v14 }
 0x1a8   : > { %18376 = vst [vmem:[#allocation46_spill] sm:$0xff] %v17066_v44  ;;  %v10494_v24 = vsub.f32 %v10492_v55, %v10493_v49  ;;  %v17071_v29 = vpack.c.bf16 %v10493_v49, %v10486_v41  ;;  %13986 = vmatpush3.bf16.msra.mxu0 %v16859_v23  ;;  %12733 = vmatprep.mubr.f32.mxu0 %v16782_v36  ;;  %v10488_v46 = vand.u32 4294901760, %v10487_v40 }
 0x1a9   : > { %13988 = vmatprep.subr.bf16.mxu0 %v16867_v58 }
 0x1aa   : > { %18377 = vst [vmem:[#allocation78_spill] sm:$0xff] %v17071_v29  ;;  %v10495_v16 = vand.u32 4294901760, %v10494_v24 }
 0x1ab   : > { %12734 = vmatmul.mubr.f32.vlgmr.msra.gmra.mrb[4].mxu0 %v18324_v52 }
 0x1ac   : > { %v17077_v2 = vpack.c.bf16 %v10495_v16, %v10488_v46  ;;  %13990 = vmatpush3.bf16.msra.mxu0 %v16867_v58  ;;  %12736 = vmatprep.mubr.f32.mxu0 %v18327_v33  ;;  %v563_v58 = vld [vmem:[%s17985_s6] sm:$0xff] }
 0x1ad   : > { %13992 = vmatprep.subr.bf16.mxu0 %v16872_v5 }
 0x1ae   : > { %18378 = vst [vmem:[#allocation52_spill] sm:$0xff] %v17077_v2 }
 0x1af   : > { %12737 = vmatmul.mubr.f32.gmra.mrb[6].mxu0 %v18332_v60 }
 0x1b0   : > { %13994 = vmatpush3.bf16.msra.mxu0 %v16872_v5  ;;  %12747 = vmatprep.mubr.f32.mxu0 %v16752_v38 }
 0x1b1   : > { %13996 = vmatprep.subr.bf16.mxu0 %v16856_v26 }
 0x1b3   : > { %12748 = vmatmul.mubr.f32.vlgmr.msra.gmra.mrb[4].mxu0 %v16754_v8 }
 0x1b4   : > { %13998 = vmatpush3.bf16.msra.mxu0 %v16856_v26  ;;  %12750 = vmatprep.mubr.f32.mxu0 %v16756_v45  ;;  %v18379_v26 = vld [vmem:[#allocation20_spill] sm:$0xff] }
 0x1b5   : > { %14000 = vmatprep.subr.bf16.mxu0 %v16859_v23 }
 0x1b7   : > { %12751 = vmatmul.mubr.f32.gmra.mrb[6].mxu0 %v16758_v17 }
 0x1b8   : > { %14002 = vmatpush3.bf16.msra.mxu0 %v16859_v23  ;;  %12761 = vmatprep.mubr.f32.mxu0 %v16752_v38  ;;  %v18380_v23 = vld [vmem:[#allocation21_spill] sm:$0xff] }
 0x1b9   : > { %14052 = vmatprep.subr.bf16.mxu0 %v16869_v18 }
 0x1bb   : > { %12762 = vmatmul.mubr.f32.vlgmr.msra.gmra.mrb[4].mxu0 %v16754_v8 }
 0x1bc   : > { %14054 = vmatpush3.bf16.msra.mxu0 %v16869_v18  ;;  %12764 = vmatprep.mubr.f32.mxu0 %v16756_v45 }
 0x1bd   : > { %14056 = vmatprep.subr.bf16.mxu0 %v16897_v22 }
 0x1bf   : > { %12765 = vmatmul.mubr.f32.gmra.mrb[6].mxu0 %v16758_v17 }
 0x1c0   : > { %14058 = vmatpush3.bf16.msra.mxu0 %v16897_v22  ;;  %12859 = vmatprep.mubr.f32.mxu0 %v16817_v54 }
 0x1c1   : > { %14060 = vmatprep.subr.bf16.mxu0 %v16906_v61 }
 0x1c3   : > { %12860 = vmatmul.mubr.f32.vlgmr.msra.gmra.mrb[8].mxu0 %v16819_v1 }
 0x1c4   : > { %14062 = vmatpush3.bf16.msra.mxu0 %v16906_v61  ;;  %12862 = vmatprep.mubr.f32.mxu0 %v16821_v37  ;;  %v18381_v61 = vld [vmem:[#allocation30_spill] sm:$0xff] }
 0x1c5   : > { %14064 = vmatprep.subr.bf16.mxu0 %v16921_v48 }
 0x1c7   : > { %12863 = vmatmul.mubr.f32.gmra.mrb[10].mxu0 %v16823_v43 }
 0x1c8   : > { %14066 = vmatpush3.bf16.msra.mxu0 %v16921_v48  ;;  %12873 = vmatprep.mubr.f32.mxu0 %v16752_v38  ;;  %v18383_v48 = vld [vmem:[#allocation22_spill] sm:$0xff] }
 0x1c9   : > { %14068 = vmatprep.subr.bf16.mxu0 %v16885_v57 }
 0x1ca   : > { %v17267_v10 = vpop.permute.xlu1 %786 }
 0x1cb   : > { %12874 = vmatmul.mubr.f32.vlgmr.msra.gmra.mrb[8].mxu0 %v16754_v8 }
 0x1cc   : > { %14070 = vmatpush3.bf16.msra.mxu0 %v16885_v57  ;;  %12876 = vmatprep.mubr.f32.mxu0 %v16756_v45 }
 0x1cd   : > { %14072 = vmatprep.subr.bf16.mxu0 %v16901_v21 }
 0x1ce   : > { %v17274_v6 = vpop.permute.xlu1 %791 }
 0x1cf   : > { %12877 = vmatmul.mubr.f32.gmra.mrb[10].mxu0 %v16758_v17 }
 0x1d0   : > { %14074 = vmatpush3.bf16.msra.mxu0 %v16901_v21  ;;  %12887 = vmatprep.mubr.f32.mxu0 %v16762_v59 }
 0x1d1   : > { %14076 = vmatprep.subr.bf16.mxu0 %v16869_v18 }
 0x1d2   : > { %v17285_v41 = vpop.permute.xlu1 %801  ;;  %v17287_v24 = vpop.permute.xlu0 %796 }
 0x1d3   : > { %12888 = vmatmul.mubr.f32.vlgmr.msra.gmra.mrb[8].mxu0 %v16765_v15 }
 0x1d4   : > { %14078 = vmatpush3.bf16.msra.mxu0 %v16869_v18  ;;  %12890 = vmatprep.mubr.f32.mxu0 %v16771_v47 }
 0x1d5   : > { %14080 = vmatprep.subr.bf16.mxu0 %v16897_v22 }
 0x1d7   : > { %12891 = vmatmul.mubr.f32.gmra.mrb[10].mxu0 %v16774_v14 }
 0x1d8   : > { %14082 = vmatpush3.bf16.msra.mxu0 %v16897_v22  ;;  %12901 = vmatprep.mubr.f32.mxu0 %v16782_v36 }
 0x1d9   : > { %14084 = vmatprep.subr.bf16.mxu0 %v16892_v9 }
 0x1db   : > { %12902 = vmatmul.mubr.f32.vlgmr.msra.gmra.mrb[8].mxu0 %v18324_v52 }
 0x1dc   : > { %14086 = vmatpush3.bf16.msra.mxu0 %v16892_v9  ;;  %12904 = vmatprep.mubr.f32.mxu0 %v18327_v33 }
 0x1dd   : > { %14088 = vmatprep.subr.bf16.mxu0 %v16910_v31 }
 0x1df   : > { %12905 = vmatmul.mubr.f32.gmra.mrb[10].mxu0 %v18332_v60 }
 0x1e0   : > { %14090 = vmatpush3.bf16.msra.mxu0 %v16910_v31  ;;  %12915 = vmatprep.mubr.f32.mxu0 %v16752_v38  ;;  %v18382_v31 = vld [vmem:[#allocation37_spill] sm:$0xff] }
 0x1e1   : > { %14092 = vmatprep.subr.bf16.mxu0 %v16869_v18 }
 0x1e3   : > { %12916 = vmatmul.mubr.f32.vlgmr.msra.gmra.mrb[8].mxu0 %v16754_v8 }
 0x1e4   : > { %14094 = vmatpush3.bf16.msra.mxu0 %v16869_v18  ;;  %12918 = vmatprep.mubr.f32.mxu0 %v16756_v45  ;;  %v1472_v18 = vsel %vm804_vm0, %v563_v58, 0 }
 0x1e5   : > { %14096 = vmatprep.subr.bf16.mxu0 %v16897_v22  ;;  %v17167_v5 = vand.u32 4294901760, %v1472_v18 }
 0x1e7   : > { %12919 = vmatmul.mubr.f32.gmra.mrb[10].mxu0 %v16758_v17  ;;  %v17173_v57 = vsub.f32 %v1472_v18, %v17167_v5 }
 0x1e8   : > { %14098 = vmatpush3.bf16.msra.mxu0 %v16897_v22  ;;  %12929 = vmatprep.mubr.f32.mxu0 %v16752_v38 }
 0x1e9   : > { %14148 = vmatprep.subr.bf16.mxu0 %v16912_v39  ;;  %v17177_v9 = vand.u32 4294901760, %v17173_v57 }
 0x1eb   : > { %12930 = vmatmul.mubr.f32.vlgmr.msra.gmra.mrb[8].mxu0 %v16754_v8  ;;  %v1555_v22 = vsub.f32 %v17173_v57, %v17177_v9 }
 0x1ec   : > { %14150 = vmatpush3.bf16.msra.mxu0 %v16912_v39  ;;  %12932 = vmatprep.mubr.f32.mxu0 %v16756_v45 }
 0x1ed   : > { %14152 = vmatprep.subr.bf16.mxu0 %v16925_v11  ;;  %v17185_v21 = vand.u32 4294901760, %v1555_v22  ;;  %v565_v22 = vld [vmem:[%s17985_s6 + $0x10] sm:$0xff] }
 0x1ef   : > { %12933 = vmatmul.mubr.f32.gmra.mrb[10].mxu0 %v16758_v17  ;;  %12607 = vmatprep.mubr.f32.mxu1 %v17185_v21 }
 0x1f0   : > { %14154 = vmatpush3.bf16.msra.mxu0 %v16925_v11  ;;  %13027 = vmatprep.mubr.f32.mxu0 %v16817_v54 }
 0x1f1   : > { %14156 = vmatprep.subr.bf16.mxu0 %v16937_v63 }
 0x1f3   : > { %13028 = vmatmul.mubr.f32.vlgmr.msra.gmra.mrb[12].mxu0 %v16819_v1 }
 0x1f4   : > { %14158 = vmatpush3.bf16.msra.mxu0 %v16937_v63  ;;  %13030 = vmatprep.mubr.f32.mxu0 %v16821_v37  ;;  %v18384_v63 = vld [vmem:[#allocation23_spill] sm:$0xff] }
 0x1f5   : > { %14160 = vmatprep.subr.bf16.mxu0 %v16952_v50 }
 0x1f7   : > { %13031 = vmatmul.mubr.f32.gmra.mrb[14].mxu0 %v16823_v43 }
 0x1f8   : > { %14162 = vmatpush3.bf16.msra.mxu0 %v16952_v50  ;;  %13041 = vmatprep.mubr.f32.mxu0 %v16752_v38  ;;  %v18387_v50 = vld [vmem:[#allocation24_spill] sm:$0xff] }
 0x1f9   : > { %14164 = vmatprep.subr.bf16.mxu0 %v18379_v26 }
 0x1fb   : > { %13042 = vmatmul.mubr.f32.vlgmr.msra.gmra.mrb[12].mxu0 %v16754_v8 }
 0x1fc   : > { %14166 = vmatpush3.bf16.msra.mxu0 %v18379_v26  ;;  %13044 = vmatprep.mubr.f32.mxu0 %v16756_v45 }
 0x1fd   : > { %14168 = vmatprep.subr.bf16.mxu0 %v18380_v23 }
 0x1ff   : > { %13045 = vmatmul.mubr.f32.gmra.mrb[14].mxu0 %v16758_v17 }
 0x200   : > { %14170 = vmatpush3.bf16.msra.mxu0 %v18380_v23  ;;  %13055 = vmatprep.mubr.f32.mxu0 %v16762_v59  ;;  %v564_v23 = vld [vmem:[%s17985_s6 + $0x8] sm:$0xff] }
 0x201   : > { %14172 = vmatprep.subr.bf16.mxu0 %v16912_v39 }
 0x203   : > { %13056 = vmatmul.mubr.f32.vlgmr.msra.gmra.mrb[12].mxu0 %v16765_v15 }
 0x204   : > { %14174 = vmatpush3.bf16.msra.mxu0 %v16912_v39  ;;  %13058 = vmatprep.mubr.f32.mxu0 %v16771_v47 }
 0x205   : > { %14176 = vmatprep.subr.bf16.mxu0 %v16925_v11 }
 0x207   : > { %13059 = vmatmul.mubr.f32.gmra.mrb[14].mxu0 %v16774_v14 }
 0x208   : > { %14178 = vmatpush3.bf16.msra.mxu0 %v16925_v11  ;;  %13069 = vmatprep.mubr.f32.mxu0 %v16782_v36 }
 0x209   : > { %14180 = vmatprep.subr.bf16.mxu0 %v18381_v61 }
 0x20b   : > { %13070 = vmatmul.mubr.f32.vlgmr.msra.gmra.mrb[12].mxu0 %v18324_v52 }
 0x20c   : > { %14182 = vmatpush3.bf16.msra.mxu0 %v18381_v61  ;;  %13072 = vmatprep.mubr.f32.mxu0 %v18327_v33  ;;  %v1475_v61 = vsel %vm804_vm0, %v564_v23, 0 }
 0x20d   : > { %14184 = vmatprep.subr.bf16.mxu0 %v18382_v31 }
 0x20f   : > { %13073 = vmatmul.mubr.f32.gmra.mrb[14].mxu0 %v18332_v60 }
 0x210   : > { %14186 = vmatpush3.bf16.msra.mxu0 %v18382_v31  ;;  %13083 = vmatprep.mubr.f32.mxu0 %v16752_v38  ;;  %v18393_v31 = vld [vmem:[#allocation16_spill] sm:$0xff] }
 0x211   : > { %14188 = vmatprep.subr.bf16.mxu0 %v16912_v39 }
 0x213   : > { %13084 = vmatmul.mubr.f32.vlgmr.msra.gmra.mrb[12].mxu0 %v16754_v8 }
 0x214   : > { %14190 = vmatpush3.bf16.msra.mxu0 %v16912_v39  ;;  %13086 = vmatprep.mubr.f32.mxu0 %v16756_v45  ;;  %v18385_v39 = vld [vmem:[#allocation38_spill] sm:$0xff] }
 0x215   : > { %14192 = vmatprep.subr.bf16.mxu0 %v16925_v11 }
 0x217   : > { %13087 = vmatmul.mubr.f32.gmra.mrb[14].mxu0 %v16758_v17 }
 0x218   : > { %14194 = vmatpush3.bf16.msra.mxu0 %v16925_v11  ;;  %13097 = vmatprep.mubr.f32.mxu0 %v16752_v38  ;;  %v18386_v11 = vld [vmem:[#allocation41_spill] sm:$0xff] }
 0x219   : > { %14244 = vmatprep.subr.bf16.mxu0 %v18383_v48 }
 0x21b   : > { %13098 = vmatmul.mubr.f32.vlgmr.msra.gmra.mrb[12].mxu0 %v16754_v8 }
 0x21c   : > { %14246 = vmatpush3.bf16.msra.mxu0 %v18383_v48  ;;  %13100 = vmatprep.mubr.f32.mxu0 %v16756_v45 }
 0x21d   : > { %14248 = vmatprep.subr.bf16.mxu0 %v18384_v63 }
 0x21f   : > { %13101 = vmatmul.mubr.f32.gmra.mrb[14].mxu0 %v16758_v17 }
 0x220   : > { %14250 = vmatpush3.bf16.msra.mxu0 %v18384_v63  ;;  %13195 = vmatprep.mubr.f32.mxu0 %v16817_v54 }
 0x221   : > { %14252 = vmatprep.subr.bf16.mxu0 %v16978_v51 }
 0x223   : > { %13196 = vmatmul.mubr.f32.vlgmr.msra.gmra.mrb[16].mxu0 %v16819_v1 }
 0x224   : > { %14254 = vmatpush3.bf16.msra.mxu0 %v16978_v51  ;;  %13198 = vmatprep.mubr.f32.mxu0 %v16821_v37  ;;  %v18388_v51 = vld [vmem:[#allocation39_spill] sm:$0xff] }
 0x225   : > { %14256 = vmatprep.subr.bf16.mxu0 %v16988_v0 }
 0x227   : > { %13199 = vmatmul.mubr.f32.gmra.mrb[18].mxu0 %v16823_v43 }
 0x228   : > { %14258 = vmatpush3.bf16.msra.mxu0 %v16988_v0  ;;  %13209 = vmatprep.mubr.f32.mxu0 %v16752_v38  ;;  %v18390_v0 = vld [vmem:[#allocation76_spill] sm:$0xff] }
 0x229   : > { %14260 = vmatprep.subr.bf16.mxu0 %v18385_v39 }
 0x22b   : > { %13210 = vmatmul.mubr.f32.vlgmr.msra.gmra.mrb[16].mxu0 %v16754_v8 }
 0x22c   : > { %14262 = vmatpush3.bf16.msra.mxu0 %v18385_v39  ;;  %13212 = vmatprep.mubr.f32.mxu0 %v16756_v45  ;;  %v17310_v39 = vand.u32 4294901760, %v1475_v61 }
 0x22d   : > { %14264 = vmatprep.subr.bf16.mxu0 %v18386_v11 }
 0x22f   : > { %13213 = vmatmul.mubr.f32.gmra.mrb[18].mxu0 %v16758_v17 }
 0x230   : > { %14266 = vmatpush3.bf16.msra.mxu0 %v18386_v11  ;;  %13223 = vmatprep.mubr.f32.mxu0 %v16762_v59 }
 0x231   : > { %14268 = vmatprep.subr.bf16.mxu0 %v18383_v48 }
 0x233   : > { %13224 = vmatmul.mubr.f32.vlgmr.msra.gmra.mrb[16].mxu0 %v16765_v15 }
 0x234   : > { %14270 = vmatpush3.bf16.msra.mxu0 %v18383_v48  ;;  %13226 = vmatprep.mubr.f32.mxu0 %v16771_v47 }
 0x235   : > { %14272 = vmatprep.subr.bf16.mxu0 %v18384_v63 }
 0x237   : > { %13227 = vmatmul.mubr.f32.gmra.mrb[18].mxu0 %v16774_v14 }
 0x238   : > { %14274 = vmatpush3.bf16.msra.mxu0 %v18384_v63  ;;  %13237 = vmatprep.mubr.f32.mxu0 %v16782_v36 }
 0x239   : > { %14276 = vmatprep.subr.bf16.mxu0 %v18387_v50 }
 0x23b   : > { %13238 = vmatmul.mubr.f32.vlgmr.msra.gmra.mrb[16].mxu0 %v18324_v52 }
 0x23c   : > { %14278 = vmatpush3.bf16.msra.mxu0 %v18387_v50  ;;  %13240 = vmatprep.mubr.f32.mxu0 %v18327_v33 }
 0x23d   : > { %14280 = vmatprep.subr.bf16.mxu0 %v16980_v35 }
 0x23f   : > { %13241 = vmatmul.mubr.f32.gmra.mrb[18].mxu0 %v18332_v60 }
 0x240   : > { %14282 = vmatpush3.bf16.msra.mxu0 %v16980_v35  ;;  %13251 = vmatprep.mubr.f32.mxu0 %v16752_v38  ;;  %v18389_v35 = vld [vmem:[#allocation60_spill] sm:$0xff] }
 0x241   : > { %14284 = vmatprep.subr.bf16.mxu0 %v18383_v48 }
 0x243   : > { %13252 = vmatmul.mubr.f32.vlgmr.msra.gmra.mrb[16].mxu0 %v16754_v8 }
 0x244   : > { %14286 = vmatpush3.bf16.msra.mxu0 %v18383_v48  ;;  %13254 = vmatprep.mubr.f32.mxu0 %v16756_v45  ;;  %v1478_v48 = vsel %vm804_vm0, %v565_v22, 0 }
 0x245   : > { %14288 = vmatprep.subr.bf16.mxu0 %v18384_v63  ;;  %v17315_v11 = vand.u32 4294901760, %v1478_v48 }
 0x247   : > { %13255 = vmatmul.mubr.f32.gmra.mrb[18].mxu0 %v16758_v17  ;;  %v17328_v23 = vsub.f32 %v1478_v48, %v17315_v11 }
 0x248   : > { %14290 = vmatpush3.bf16.msra.mxu0 %v18384_v63  ;;  %13265 = vmatprep.mubr.f32.mxu0 %v16752_v38  ;;  %v566_v63 = vld [vmem:[%s17985_s6 + $0x18] sm:$0xff] }
 0x249   : > { %14340 = vmatprep.subr.bf16.mxu0 %v18388_v51  ;;  %v1481_v50 = vsel %vm804_vm0, %v566_v63, 0 }
 0x24b   : > { %13266 = vmatmul.mubr.f32.vlgmr.msra.gmra.mrb[16].mxu0 %v16754_v8 }
 0x24c   : > { %14342 = vmatpush3.bf16.msra.mxu0 %v18388_v51  ;;  %13268 = vmatprep.mubr.f32.mxu0 %v16756_v45 }
 0x24d   : > { %14344 = vmatprep.subr.bf16.mxu0 %v16994_v19 }
 0x24f   : > { %13269 = vmatmul.mubr.f32.gmra.mrb[18].mxu0 %v16758_v17 }
 0x250   : > { %14346 = vmatpush3.bf16.msra.mxu0 %v16994_v19  ;;  %13363 = vmatprep.mubr.f32.mxu0 %v16817_v54 }
 0x251   : > { %14348 = vmatprep.subr.bf16.mxu0 %v18389_v35 }
 0x253   : > { %13364 = vmatmul.mubr.f32.vlgmr.msra.gmra.mrb[20].mxu0 %v16819_v1 }
 0x254   : > { %14350 = vmatpush3.bf16.msra.mxu0 %v18389_v35  ;;  %13366 = vmatprep.mubr.f32.mxu0 %v16821_v37 }
 0x255   : > { %14352 = vmatprep.subr.bf16.mxu0 %v18390_v0 }
 0x257   : > { %13367 = vmatmul.mubr.f32.gmra.mrb[22].mxu0 %v16823_v43 }
 0x258   : > { %14354 = vmatpush3.bf16.msra.mxu0 %v18390_v0  ;;  %13377 = vmatprep.mubr.f32.mxu0 %v16752_v38  ;;  %v18394_v0 = vld [vmem:[#allocation84_spill] sm:$0xff] }
 0x259   : > { %14356 = vmatprep.subr.bf16.mxu0 %v18391_v25 }
 0x25b   : > { %13378 = vmatmul.mubr.f32.vlgmr.msra.gmra.mrb[20].mxu0 %v16754_v8 }
 0x25c   : > { %14358 = vmatpush3.bf16.msra.mxu0 %v18391_v25  ;;  %13380 = vmatprep.mubr.f32.mxu0 %v16756_v45 }
 0x25d   : > { %14360 = vmatprep.subr.bf16.mxu0 %v18392_v42 }
 0x25e   : > { %v12595_v4 = vpop.f32.mrb[0].mxu0 }
 0x25f   : > { %v14627_v62 = vadd.f32 %v12595_v4, %v17274_v6  ;;  %v1409_v27 = vpop.f32.mrb[1].mxu0  ;;  %13381 = vmatmul.mubr.f32.gmra.mrb[22].mxu0 %v16758_v17 }
 0x260   : > { %v14628_v55 = vadd.f32 %v1409_v27, %v17267_v10  ;;  %14362 = vmatpush3.bf16.msra.mxu0 %v18392_v42  ;;  %13391 = vmatprep.mubr.f32.mxu0 %v16762_v59  ;;  %v17320_v27 = vsub.f32 %v1475_v61, %v17310_v39 }
 0x261   : > { %v1436_v7 = vmul.f32 0.70710677, %v14627_v62  ;;  %14364 = vmatprep.subr.bf16.mxu0 %v18388_v51  ;;  %v1432_v42 = vmul.f32 0.5, %v14627_v62 }
 0x262   : > { %v1435_v49 = vmul.f32 0.70710677, %v14628_v55  ;;  %v12598_v40 = vpop.f32.mrb[2].mxu0 }
 0x263   : > { %15200 = verf.f32 %v1436_v7  ;;  %v14629_v46 = vadd.f32 %v12598_v40, %v17285_v41  ;;  %v1421_v16 = vpop.f32.mrb[3].mxu0  ;;  %13392 = vmatmul.mubr.f32.vlgmr.msra.gmra.mrb[20].mxu0 %v16765_v15  ;;  %v1431_v7 = vmul.f32 0.5, %v14628_v55  ;;  %v17323_v40 = vand.u32 4294901760, %v1481_v50 }
 0x264   : > { %15202 = verf.f32 %v1435_v49  ;;  %v14630_v26 = vadd.f32 %v1421_v16, %v17287_v24  ;;  %14366 = vmatpush3.bf16.msra.mxu0 %v18388_v51  ;;  %13394 = vmatprep.mubr.f32.mxu0 %v16771_v47 }
 0x265   : > { %v1438_v58 = vmul.f32 0.70710677, %v14629_v46  ;;  %14368 = vmatprep.subr.bf16.mxu0 %v16994_v19  ;;  %v1434_v55 = vmul.f32 0.5, %v14629_v46  ;;  %v17341_v46 = vand.u32 4294901760, %v17328_v23 }
 0x266   : > { %v1437_v18 = vmul.f32 0.70710677, %v14630_v26 }
 0x267   : > { %15204 = verf.f32 %v1438_v58  ;;  %13395 = vmatmul.mubr.f32.gmra.mrb[22].mxu0 %v16774_v14 }
 0x268   : > { %15206 = verf.f32 %v1437_v18  ;;  %14370 = vmatpush3.bf16.msra.mxu0 %v16994_v19  ;;  %13405 = vmatprep.mubr.f32.mxu0 %v16782_v36 }
 0x269   : > { %14372 = vmatprep.subr.bf16.mxu0 %v18393_v31 }
 0x26b   : > { %13406 = vmatmul.mubr.f32.vlgmr.msra.gmra.mrb[20].mxu0 %v18324_v52 }
 0x26c   : > { %14374 = vmatpush3.bf16.msra.mxu0 %v18393_v31  ;;  %13408 = vmatprep.mubr.f32.mxu0 %v18327_v33  ;;  %v17332_v31 = vand.u32 4294901760, %v17320_v27 }
 0x26d   : > { %v15201_v35 = vpop.eup %15200  ;;  %14376 = vmatprep.subr.bf16.mxu0 %v18394_v0 }
 0x26e   : > { %v15203_v25 = vpop.eup %15202  ;;  %v1444_v4 = vadd.f32 1.0, %v15201_v35  ;;  %v1433_v35 = vmul.f32 0.5, %v14630_v26 }
 0x26f   : > { %v1443_v49 = vadd.f32 1.0, %v15203_v25  ;;  %13409 = vmatmul.mubr.f32.gmra.mrb[22].mxu0 %v18332_v60 }
 0x270   : > { %v1448_v16 = vmul.f32 %v1444_v4, %v1432_v42  ;;  %14378 = vmatpush3.bf16.msra.mxu0 %v18394_v0  ;;  %13419 = vmatprep.mubr.f32.mxu0 %v16752_v38  ;;  %v17336_v0 = vsub.f32 %v1481_v50, %v17323_v40  ;;  %v1565_v50 = vsub.f32 %v17320_v27, %v17332_v31 }
 0x271   : > { %v15205_v58 = vpop.eup %15204  ;;  %v1447_v62 = vmul.f32 %v1443_v49, %v1431_v7  ;;  %14380 = vmatprep.subr.bf16.mxu0 %v18388_v51 }
 0x272   : > { %v15207_v18 = vpop.eup %15206  ;;  %v1487_v22 = vand.u32 4294901760, %v1448_v16  ;;  %v1446_v61 = vadd.f32 1.0, %v15205_v58  ;;  %v17361_v12 = vand.u32 4294901760, %v1565_v50 }
 0x273   : > { %v1484_v63 = vand.u32 4294901760, %v1447_v62  ;;  %v1445_v25 = vadd.f32 1.0, %v15207_v18  ;;  %13420 = vmatmul.mubr.f32.vlgmr.msra.gmra.mrb[20].mxu0 %v16754_v8  ;;  %v17351_v18 = vand.u32 4294901760, %v17336_v0 }
 0x274   : > { %v1601_v48 = vsub.f32 %v1448_v16, %v1487_v22  ;;  %v1450_v42 = vmul.f32 %v1446_v61, %v1434_v55  ;;  %14382 = vmatpush3.bf16.msra.mxu0 %v18388_v51  ;;  %13422 = vmatprep.mubr.f32.mxu0 %v16756_v45  ;;  %v1575_v61 = vsub.f32 %v17328_v23, %v17341_v46 }
 0x275   : > { %v17343_v4 = vpack.c.bf16 %v1487_v22, %v1484_v63  ;;  %v1594_v7 = vsub.f32 %v1447_v62, %v1484_v63  ;;  %v1449_v49 = vmul.f32 %v1445_v25, %v1433_v35  ;;  %14384 = vmatprep.subr.bf16.mxu0 %v16994_v19  ;;  %v18395_v25 = vld [vmem:[#allocation83_spill] sm:$0xff] }
 0x276   : > { %v1493_v26 = vand.u32 4294901760, %v1450_v42  ;;  %v1602_v58 = vand.u32 4294901760, %v1601_v48 }
 0x277   : > { %v1490_v16 = vand.u32 4294901760, %v1449_v49  ;;  %13908 = vmatprep.subr.bf16.mxu1 %v17343_v4  ;;  %13423 = vmatmul.mubr.f32.gmra.mrb[22].mxu0 %v16758_v17  ;;  %v1595_v51 = vand.u32 4294901760, %v1594_v7  ;;  %v13923_v22 = vpack.c.bf16 %v1601_v48, %v1594_v7 }
 0x278   : > { %v1615_v55 = vsub.f32 %v1450_v42, %v1493_v26  ;;  %13910 = vmatpush3.bf16.msra.mxu1 %v17343_v4  ;;  %14386 = vmatpush3.bf16.msra.mxu0 %v16994_v19  ;;  %v1603_v62 = vsub.f32 %v1601_v48, %v1602_v58  ;;  %v1585_v48 = vsub.f32 %v17336_v0, %v17351_v18 }
 0x279   : > { %v17357_v63 = vpack.c.bf16 %v1493_v26, %v1490_v16  ;;  %v1608_v35 = vsub.f32 %v1449_v49, %v1490_v16  ;;  %14436 = vmatprep.subr.bf16.mxu0 %v18395_v25  ;;  %13433 = vmatprep.mubr.f32.mxu0 %v16752_v38  ;;  %v1596_v29 = vsub.f32 %v1594_v7, %v1595_v51 }
 0x27a   : > { %v1604_v44 = vand.u32 4294901760, %v1603_v62  ;;  %v1616_v42 = vand.u32 4294901760, %v1615_v55  ;;  %v17363_v34 = vpack.c.bf16 %v1602_v58, %v1595_v51  ;;  %v17373_v58 = vand.u32 4294901760, %v1575_v61 }
 0x27b   : > { %13912 = vmatprep.subr.bf16.mxu1 %v17357_v63  ;;  %13434 = vmatmul.mubr.f32.vlgmr.msra.gmra.mrb[20].mxu0 %v16754_v8  ;;  %v1597_v19 = vand.u32 4294901760, %v1596_v29  ;;  %v1609_v49 = vand.u32 4294901760, %v1608_v35  ;;  %v13927_v26 = vpack.c.bf16 %v1615_v55, %v1608_v35  ;;  %v17378_v62 = vand.u32 4294901760, %v1585_v48 }
 0x27c   : > { %13914 = vmatpush3.bf16.msra.mxu1 %v17357_v63  ;;  %14438 = vmatpush3.bf16.msra.mxu0 %v18395_v25  ;;  %v1617_v7 = vsub.f32 %v1615_v55, %v1616_v42 }
 0x27d   : > { %14440 = vmatprep.subr.bf16.mxu0 %v17031_v28  ;;  %13436 = vmatprep.mubr.f32.mxu0 %v16756_v45  ;;  %v13915_v50 = vpack.c.bf16 %v1604_v44, %v1597_v19  ;;  %v1610_v16 = vsub.f32 %v1608_v35, %v1609_v49  ;;  %v17375_v51 = vpack.c.bf16 %v1616_v42, %v1609_v49 }
 0x27e   : > { %v1618_v29 = vand.u32 4294901760, %v1617_v7  ;;  %v18397_v7 = vld [vmem:[#allocation45_spill] sm:$0xff] }
 0x27f   : > { %12608 = vmatmul.mubr.f32.vlgmr.msra.gmra.mrb[0].mxu1 %v17361_v12  ;;  %13916 = vmatprep.subr.bf16.mxu1 %v13915_v50  ;;  %v1611_v2 = vand.u32 4294901760, %v1610_v16 }
 0x280   : > { %13437 = vmatmul.mubr.f32.gmra.mrb[22].mxu0 %v16758_v17  ;;  %13918 = vmatpush3.bf16.msra.mxu1 %v13915_v50 }
 0x281   : > { %14442 = vmatpush3.bf16.msra.mxu0 %v17031_v28  ;;  %12610 = vmatprep.mubr.f32.mxu1 %v17373_v58  ;;  %v13919_v44 = vpack.c.bf16 %v1618_v29, %v1611_v2  ;;  %v18396_v2 = vld [vmem:[#allocation44_spill] sm:$0xff] }
 0x282   : > { %14444 = vmatprep.subr.bf16.mxu0 %v17041_v53  ;;  %13531 = vmatprep.mubr.f32.mxu0 %v16817_v54 }
 0x283   : > { %12611 = vmatmul.mubr.f32.gmra.mrb[2].mxu1 %v17378_v62  ;;  %13920 = vmatprep.subr.bf16.mxu1 %v13919_v44 }
 0x284   : > { %13532 = vmatmul.mubr.f32.vlgmr.msra.gmra.mrb[24].mxu0 %v16819_v1  ;;  %13922 = vmatpush3.bf16.msra.mxu1 %v13919_v44 }
 0x285   : > { %14446 = vmatpush3.bf16.msra.mxu0 %v17041_v53  ;;  %13924 = vmatprep.subr.bf16.mxu1 %v13923_v22 }
 0x286   : > { %14448 = vmatprep.subr.bf16.mxu0 %v17056_v56  ;;  %12621 = vmatprep.mubr.f32.mxu1 %v17167_v5 }
 0x287   : > { %13534 = vmatprep.mubr.f32.mxu0 %v16821_v37  ;;  %12622 = vmatmul.mubr.f32.vlgmr.msra.gmra.mrb[0].mxu1 %v17310_v39 }
 0x288   : > { %13535 = vmatmul.mubr.f32.gmra.mrb[26].mxu0 %v16823_v43  ;;  %13926 = vmatpush3.bf16.msra.mxu1 %v13923_v22 }
 0x289   : > { %14450 = vmatpush3.bf16.msra.mxu0 %v17056_v56  ;;  %13928 = vmatprep.subr.bf16.mxu1 %v13927_v26 }
 0x28a   : > { %14452 = vmatprep.subr.bf16.mxu0 %v18396_v2  ;;  %12624 = vmatprep.mubr.f32.mxu1 %v17315_v11 }
 0x28b   : > { %13545 = vmatprep.mubr.f32.mxu0 %v16752_v38  ;;  %12625 = vmatmul.mubr.f32.gmra.mrb[2].mxu1 %v17323_v40 }
 0x28c   : > { %13546 = vmatmul.mubr.f32.vlgmr.msra.gmra.mrb[24].mxu0 %v16754_v8  ;;  %13930 = vmatpush3.bf16.msra.mxu1 %v13927_v26 }
 0x28d   : > { %14454 = vmatpush3.bf16.msra.mxu0 %v18396_v2  ;;  %13932 = vmatprep.subr.bf16.mxu1 %v17343_v4 }
 0x28e   : > { %14456 = vmatprep.subr.bf16.mxu0 %v17036_v20  ;;  %12635 = vmatprep.mubr.f32.mxu1 %v17173_v57  ;;  %v12763_v53 = vpop.f32.mrb[4].mxu0 }
 0x28f   : > { %v14635_v56 = vadd.f32 %v12763_v53, %v17274_v6  ;;  %13548 = vmatprep.mubr.f32.mxu0 %v16756_v45  ;;  %12636 = vmatmul.mubr.f32.vlgmr.msra.gmra.mrb[0].mxu1 %v17320_v27  ;;  %v2786_v22 = vpop.f32.mrb[5].mxu0 }
 0x290   : > { %v14636_v55 = vadd.f32 %v2786_v22, %v17267_v10  ;;  %13549 = vmatmul.mubr.f32.gmra.mrb[26].mxu0 %v16758_v17  ;;  %13934 = vmatpush3.bf16.msra.mxu1 %v17343_v4 }
 0x291   : > { %v2813_v61 = vmul.f32 0.70710677, %v14635_v56  ;;  %14458 = vmatpush3.bf16.msra.mxu0 %v17036_v20  ;;  %13936 = vmatprep.subr.bf16.mxu1 %v17357_v63  ;;  %v2809_v16 = vmul.f32 0.5, %v14635_v56 }
 0x292   : > { %v2812_v35 = vmul.f32 0.70710677, %v14636_v55  ;;  %14460 = vmatprep.subr.bf16.mxu0 %v18395_v25  ;;  %12638 = vmatprep.mubr.f32.mxu1 %v17328_v23  ;;  %v12766_v42 = vpop.f32.mrb[6].mxu0  ;;  %v2808_v44 = vmul.f32 0.5, %v14636_v55 }
 0x293   : > { %15208 = verf.f32 %v2813_v61  ;;  %v14637_v19 = vadd.f32 %v12766_v42, %v17285_v41  ;;  %13559 = vmatprep.mubr.f32.mxu0 %v16762_v59  ;;  %12639 = vmatmul.mubr.f32.gmra.mrb[2].mxu1 %v17336_v0  ;;  %v2798_v48 = vpop.f32.mrb[7].mxu0 }
 0x294   : > { %15210 = verf.f32 %v2812_v35  ;;  %v14638_v49 = vadd.f32 %v2798_v48, %v17287_v24  ;;  %13560 = vmatmul.mubr.f32.vlgmr.msra.gmra.mrb[24].mxu0 %v16765_v15  ;;  %13938 = vmatpush3.bf16.msra.mxu1 %v17357_v63 }
 0x295   : > { %v2815_v20 = vmul.f32 0.70710677, %v14637_v19  ;;  %14462 = vmatpush3.bf16.msra.mxu0 %v18395_v25  ;;  %13940 = vmatprep.subr.bf16.mxu1 %v17363_v34  ;;  %v2811_v35 = vmul.f32 0.5, %v14637_v19 }
 0x296   : > { %v2814_v26 = vmul.f32 0.70710677, %v14638_v49  ;;  %14464 = vmatprep.subr.bf16.mxu0 %v17031_v28  ;;  %12649 = vmatprep.mubr.f32.mxu1 %v17177_v9  ;;  %v2810_v48 = vmul.f32 0.5, %v14638_v49 }
 0x297   : > { %15212 = verf.f32 %v2815_v20  ;;  %13562 = vmatprep.mubr.f32.mxu0 %v16771_v47  ;;  %12650 = vmatmul.mubr.f32.vlgmr.msra.gmra.mrb[0].mxu1 %v17332_v31 }
 0x298   : > { %15214 = verf.f32 %v2814_v26  ;;  %13563 = vmatmul.mubr.f32.gmra.mrb[26].mxu0 %v16774_v14  ;;  %13942 = vmatpush3.bf16.msra.mxu1 %v17363_v34 }
 0x299   : > { %14466 = vmatpush3.bf16.msra.mxu0 %v17031_v28  ;;  %13944 = vmatprep.subr.bf16.mxu1 %v17375_v51 }
 0x29a   : > { %14468 = vmatprep.subr.bf16.mxu0 %v18397_v7  ;;  %12652 = vmatprep.mubr.f32.mxu1 %v17341_v46 }
 0x29b   : > { %13573 = vmatprep.mubr.f32.mxu0 %v16782_v36  ;;  %12653 = vmatmul.mubr.f32.gmra.mrb[2].mxu1 %v17351_v18 }
 0x29c   : > { %13574 = vmatmul.mubr.f32.vlgmr.msra.gmra.mrb[24].mxu0 %v18324_v52  ;;  %13946 = vmatpush3.bf16.msra.mxu1 %v17375_v51 }
 0x29d   : > { %v15209_v50 = vpop.eup %15208  ;;  %14470 = vmatpush3.bf16.msra.mxu0 %v18397_v7  ;;  %13948 = vmatprep.subr.bf16.mxu1 %v17343_v4 }
 0x29e   : > { %v15211_v34 = vpop.eup %15210  ;;  %v2821_v29 = vadd.f32 1.0, %v15209_v50  ;;  %14472 = vmatprep.subr.bf16.mxu0 %v17045_v3  ;;  %12663 = vmatprep.mubr.f32.mxu1 %v17167_v5 }
 0x29f   : > { %v2820_v2 = vadd.f32 1.0, %v15211_v34  ;;  %13576 = vmatprep.mubr.f32.mxu0 %v18327_v33  ;;  %12664 = vmatmul.mubr.f32.vlgmr.msra.gmra.mrb[0].mxu1 %v17310_v39 }
 0x2a0   : > { %v2825_v53 = vmul.f32 %v2821_v29, %v2809_v16  ;;  %13577 = vmatmul.mubr.f32.gmra.mrb[26].mxu0 %v18332_v60  ;;  %13950 = vmatpush3.bf16.msra.mxu1 %v17343_v4 }
 0x2a1   : > { %v15213_v51 = vpop.eup %15212  ;;  %v2824_v22 = vmul.f32 %v2820_v2, %v2808_v44  ;;  %14474 = vmatpush3.bf16.msra.mxu0 %v17045_v3  ;;  %13952 = vmatprep.subr.bf16.mxu1 %v17357_v63 }
 0x2a2   : > { %v15215_v56 = vpop.eup %15214  ;;  %v2832_v61 = vand.u32 4294901760, %v2825_v53  ;;  %v2823_v55 = vadd.f32 1.0, %v15213_v51  ;;  %14476 = vmatprep.subr.bf16.mxu0 %v18395_v25  ;;  %12666 = vmatprep.mubr.f32.mxu1 %v17315_v11 }
 0x2a3   : > { %v2829_v42 = vand.u32 4294901760, %v2824_v22  ;;  %v2822_v20 = vadd.f32 1.0, %v15215_v56  ;;  %13587 = vmatprep.mubr.f32.mxu0 %v16752_v38  ;;  %12667 = vmatmul.mubr.f32.gmra.mrb[2].mxu1 %v17323_v40 }
 0x2a4   : > { %v2946_v4 = vsub.f32 %v2825_v53, %v2832_v61  ;;  %v2827_v26 = vmul.f32 %v2823_v55, %v2811_v35  ;;  %13588 = vmatmul.mubr.f32.vlgmr.msra.gmra.mrb[24].mxu0 %v16754_v8  ;;  %13954 = vmatpush3.bf16.msra.mxu1 %v17357_v63 }
 0x2a5   : > { %v17451_v3 = vpack.c.bf16 %v2832_v61, %v2829_v42  ;;  %v2939_v19 = vsub.f32 %v2824_v22, %v2829_v42  ;;  %v2826_v7 = vmul.f32 %v2822_v20, %v2810_v48  ;;  %14478 = vmatpush3.bf16.msra.mxu0 %v18395_v25  ;;  %12677 = vmatprep.mubr.f32.mxu1 %v17167_v5 }
 0x2a6   : > { %v2838_v49 = vand.u32 4294901760, %v2827_v26  ;;  %14480 = vmatprep.subr.bf16.mxu0 %v17031_v28  ;;  %13590 = vmatprep.mubr.f32.mxu0 %v16756_v45  ;;  %v2947_v50 = vand.u32 4294901760, %v2946_v4 }
 0x2a7   : > { %v2835_v34 = vand.u32 4294901760, %v2826_v7  ;;  %12678 = vmatmul.mubr.f32.vlgmr.msra.gmra.mrb[0].mxu1 %v17310_v39  ;;  %14004 = vmatprep.subr.bf16.mxu1 %v17451_v3  ;;  %v2940_v63 = vand.u32 4294901760, %v2939_v19  ;;  %v14019_v16 = vpack.c.bf16 %v2946_v4, %v2939_v19 }
 0x2a8   : > { %v2960_v29 = vsub.f32 %v2827_v26, %v2838_v49  ;;  %13591 = vmatmul.mubr.f32.gmra.mrb[26].mxu0 %v16758_v17  ;;  %14006 = vmatpush3.bf16.msra.mxu1 %v17451_v3  ;;  %v2948_v25 = vsub.f32 %v2946_v4, %v2947_v50 }
 0x2a9   : > { %v17461_v44 = vpack.c.bf16 %v2838_v49, %v2835_v34  ;;  %v2953_v2 = vsub.f32 %v2826_v7, %v2835_v34  ;;  %14482 = vmatpush3.bf16.msra.mxu0 %v17031_v28  ;;  %12680 = vmatprep.mubr.f32.mxu1 %v17315_v11  ;;  %v2941_v53 = vsub.f32 %v2939_v19, %v2940_v63  ;;  %v18398_v7 = vld [vmem:[#allocation52_spill] sm:$0xff] }
 0x2aa   : > { %14532 = vmatprep.subr.bf16.mxu0 %v17048_v30  ;;  %13601 = vmatprep.mubr.f32.mxu0 %v16752_v38  ;;  %v2949_v51 = vand.u32 4294901760, %v2948_v25  ;;  %v2961_v22 = vand.u32 4294901760, %v2960_v29  ;;  %v17467_v56 = vpack.c.bf16 %v2947_v50, %v2940_v63 }
 0x2ab   : > { %12681 = vmatmul.mubr.f32.gmra.mrb[2].mxu1 %v17323_v40  ;;  %14008 = vmatprep.subr.bf16.mxu1 %v17461_v44  ;;  %v2942_v61 = vand.u32 4294901760, %v2941_v53  ;;  %v2954_v35 = vand.u32 4294901760, %v2953_v2  ;;  %v14023_v55 = vpack.c.bf16 %v2960_v29, %v2953_v2 }
 0x2ac   : > { %13602 = vmatmul.mubr.f32.vlgmr.msra.gmra.mrb[24].mxu0 %v16754_v8  ;;  %14010 = vmatpush3.bf16.msra.mxu1 %v17461_v44  ;;  %v2962_v28 = vsub.f32 %v2960_v29, %v2961_v22 }
 0x2ad   : > { %14534 = vmatpush3.bf16.msra.mxu0 %v17048_v30  ;;  %12775 = vmatprep.mubr.f32.mxu1 %v17185_v21  ;;  %v14011_v42 = vpack.c.bf16 %v2949_v51, %v2942_v61  ;;  %v2955_v48 = vsub.f32 %v2953_v2, %v2954_v35  ;;  %v17475_v20 = vpack.c.bf16 %v2961_v22, %v2954_v35  ;;  %v18402_v22 = vld [vmem:[#allocation78_spill] sm:$0xff] }
 0x2ae   : > { %14536 = vmatprep.subr.bf16.mxu0 %v17061_v32  ;;  %13604 = vmatprep.mubr.f32.mxu0 %v16756_v45  ;;  %v2963_v4 = vand.u32 4294901760, %v2962_v28 }
 0x2af   : > { %12776 = vmatmul.mubr.f32.vlgmr.msra.gmra.mrb[4].mxu1 %v17361_v12  ;;  %14012 = vmatprep.subr.bf16.mxu1 %v14011_v42  ;;  %v2956_v26 = vand.u32 4294901760, %v2955_v48 }
 0x2b0   : > { %13605 = vmatmul.mubr.f32.gmra.mrb[26].mxu0 %v16758_v17  ;;  %14014 = vmatpush3.bf16.msra.mxu1 %v14011_v42 }
 0x2b1   : > { %14538 = vmatpush3.bf16.msra.mxu0 %v17061_v32  ;;  %12778 = vmatprep.mubr.f32.mxu1 %v17373_v58  ;;  %v14015_v19 = vpack.c.bf16 %v2963_v4, %v2956_v26 }
 0x2b2   : > { %14540 = vmatprep.subr.bf16.mxu0 %v17068_v13  ;;  %13699 = vmatprep.mubr.f32.mxu0 %v16817_v54  ;;  %v18399_v54 = vld [vmem:[#allocation77_spill] sm:$0xff] }
 0x2b3   : > { %12779 = vmatmul.mubr.f32.gmra.mrb[6].mxu1 %v17378_v62  ;;  %14016 = vmatprep.subr.bf16.mxu1 %v14015_v19 }
 0x2b4   : > { %13700 = vmatmul.mubr.f32.vlgmr.msra.gmra.mrb[28].mxu0 %v16819_v1  ;;  %14018 = vmatpush3.bf16.msra.mxu1 %v14015_v19 }
 0x2b5   : > { %14542 = vmatpush3.bf16.msra.mxu0 %v17068_v13  ;;  %14020 = vmatprep.subr.bf16.mxu1 %v14019_v16 }
 0x2b6   : > { %14544 = vmatprep.subr.bf16.mxu0 %v18398_v7  ;;  %12789 = vmatprep.mubr.f32.mxu1 %v17167_v5 }
 0x2b7   : > { %13702 = vmatprep.mubr.f32.mxu0 %v16821_v37  ;;  %12790 = vmatmul.mubr.f32.vlgmr.msra.gmra.mrb[4].mxu1 %v17310_v39  ;;  %v18400_v37 = vld [vmem:[#allocation46_spill] sm:$0xff] }
 0x2b8   : > { %13703 = vmatmul.mubr.f32.gmra.mrb[30].mxu0 %v16823_v43  ;;  %14022 = vmatpush3.bf16.msra.mxu1 %v14019_v16 }
 0x2b9   : > { %14546 = vmatpush3.bf16.msra.mxu0 %v18398_v7  ;;  %14024 = vmatprep.subr.bf16.mxu1 %v14023_v55 }
 0x2ba   : > { %14548 = vmatprep.subr.bf16.mxu0 %v18399_v54  ;;  %12792 = vmatprep.mubr.f32.mxu1 %v17315_v11 }
 0x2bb   : > { %13713 = vmatprep.mubr.f32.mxu0 %v16752_v38  ;;  %12793 = vmatmul.mubr.f32.gmra.mrb[6].mxu1 %v17323_v40 }
 0x2bc   : > { %13714 = vmatmul.mubr.f32.vlgmr.msra.gmra.mrb[28].mxu0 %v16754_v8  ;;  %14026 = vmatpush3.bf16.msra.mxu1 %v14023_v55 }
 0x2bd   : > { %14550 = vmatpush3.bf16.msra.mxu0 %v18399_v54  ;;  %14028 = vmatprep.subr.bf16.mxu1 %v17451_v3 }
 0x2be   : > { %14552 = vmatprep.subr.bf16.mxu0 %v18400_v37  ;;  %12803 = vmatprep.mubr.f32.mxu1 %v17173_v57  ;;  %v12931_v43 = vpop.f32.mrb[8].mxu0 }
 0x2bf   : > { %v14643_v1 = vadd.f32 %v12931_v43, %v17274_v6  ;;  %13716 = vmatprep.mubr.f32.mxu0 %v16756_v45  ;;  %12804 = vmatmul.mubr.f32.vlgmr.msra.gmra.mrb[4].mxu1 %v17320_v27  ;;  %v4147_v13 = vpop.f32.mrb[9].mxu0 }
 0x2c0   : > { %v14644_v49 = vadd.f32 %v4147_v13, %v17267_v10  ;;  %13717 = vmatmul.mubr.f32.gmra.mrb[30].mxu0 %v16758_v17  ;;  %14030 = vmatpush3.bf16.msra.mxu1 %v17451_v3 }
 0x2c1   : > { %v4174_v50 = vmul.f32 0.70710677, %v14643_v1  ;;  %14554 = vmatpush3.bf16.msra.mxu0 %v18400_v37  ;;  %14032 = vmatprep.subr.bf16.mxu1 %v17461_v44 }
 0x2c2   : > { %v4173_v34 = vmul.f32 0.70710677, %v14644_v49  ;;  %14556 = vmatprep.subr.bf16.mxu0 %v17048_v30  ;;  %12806 = vmatprep.mubr.f32.mxu1 %v17328_v23  ;;  %v12934_v63 = vpop.f32.mrb[10].mxu0 }
 0x2c3   : > { %15216 = verf.f32 %v4174_v50  ;;  %v14645_v16 = vadd.f32 %v12934_v63, %v17285_v41  ;;  %13727 = vmatprep.mubr.f32.mxu0 %v16762_v59  ;;  %12807 = vmatmul.mubr.f32.gmra.mrb[6].mxu1 %v17336_v0  ;;  %v4159_v29 = vpop.f32.mrb[11].mxu0 }
 0x2c4   : > { %15218 = verf.f32 %v4173_v34  ;;  %v14646_v25 = vadd.f32 %v4159_v29, %v17287_v24  ;;  %13728 = vmatmul.mubr.f32.vlgmr.msra.gmra.mrb[28].mxu0 %v16765_v15  ;;  %14034 = vmatpush3.bf16.msra.mxu1 %v17461_v44  ;;  %v18401_v15 = vld [vmem:[#allocation51_spill] sm:$0xff] }
 0x2c5   : > { %v4176_v2 = vmul.f32 0.70710677, %v14645_v16  ;;  %14558 = vmatpush3.bf16.msra.mxu0 %v17048_v30  ;;  %14036 = vmatprep.subr.bf16.mxu1 %v17467_v56  ;;  %v4172_v42 = vmul.f32 0.5, %v14645_v16 }
 0x2c6   : > { %v4175_v53 = vmul.f32 0.70710677, %v14646_v25  ;;  %14560 = vmatprep.subr.bf16.mxu0 %v17061_v32  ;;  %12817 = vmatprep.mubr.f32.mxu1 %v17177_v9 }
 0x2c7   : > { %15220 = verf.f32 %v4176_v2  ;;  %13730 = vmatprep.mubr.f32.mxu0 %v16771_v47  ;;  %12818 = vmatmul.mubr.f32.vlgmr.msra.gmra.mrb[4].mxu1 %v17332_v31 }
 0x2c8   : > { %15222 = verf.f32 %v4175_v53  ;;  %13731 = vmatmul.mubr.f32.gmra.mrb[30].mxu0 %v16774_v14  ;;  %14038 = vmatpush3.bf16.msra.mxu1 %v17467_v56  ;;  %v4170_v14 = vmul.f32 0.5, %v14643_v1  ;;  %v4169_v56 = vmul.f32 0.5, %v14644_v49 }
 0x2c9   : > { %14562 = vmatpush3.bf16.msra.mxu0 %v17061_v32  ;;  %14040 = vmatprep.subr.bf16.mxu1 %v17475_v20 }
 0x2ca   : > { %14564 = vmatprep.subr.bf16.mxu0 %v18401_v15  ;;  %12820 = vmatprep.mubr.f32.mxu1 %v17341_v46 }
 0x2cb   : > { %13741 = vmatprep.mubr.f32.mxu0 %v16782_v36  ;;  %12821 = vmatmul.mubr.f32.gmra.mrb[6].mxu1 %v17351_v18 }
 0x2cc   : > { %13742 = vmatmul.mubr.f32.vlgmr.msra.gmra.mrb[28].mxu0 %v18324_v52  ;;  %14042 = vmatpush3.bf16.msra.mxu1 %v17475_v20  ;;  %v4171_v20 = vmul.f32 0.5, %v14646_v25 }
 0x2cd   : > { %v15217_v59 = vpop.eup %15216  ;;  %14566 = vmatpush3.bf16.msra.mxu0 %v18401_v15  ;;  %14044 = vmatprep.subr.bf16.mxu1 %v17451_v3 }
 0x2ce   : > { %v15219_v47 = vpop.eup %15218  ;;  %v4182_v51 = vadd.f32 1.0, %v15217_v59  ;;  %14568 = vmatprep.subr.bf16.mxu0 %v18402_v22  ;;  %12831 = vmatprep.mubr.f32.mxu1 %v17167_v5 }
 0x2cf   : > { %v4181_v36 = vadd.f32 1.0, %v15219_v47  ;;  %13744 = vmatprep.mubr.f32.mxu0 %v18327_v33  ;;  %12832 = vmatmul.mubr.f32.vlgmr.msra.gmra.mrb[4].mxu1 %v17310_v39 }
 0x2d0   : > { %v4186_v52 = vmul.f32 %v4182_v51, %v4170_v14  ;;  %13745 = vmatmul.mubr.f32.gmra.mrb[30].mxu0 %v18332_v60  ;;  %14046 = vmatpush3.bf16.msra.mxu1 %v17451_v3 }
 0x2d1   : > { %v15221_v61 = vpop.eup %15220  ;;  %v4185_v35 = vmul.f32 %v4181_v36, %v4169_v56  ;;  %14570 = vmatpush3.bf16.msra.mxu0 %v18402_v22  ;;  %14048 = vmatprep.subr.bf16.mxu1 %v17461_v44 }
 0x2d2   : > { %v15223_v55 = vpop.eup %15222  ;;  %v4193_v28 = vand.u32 4294901760, %v4186_v52  ;;  %v4184_v48 = vadd.f32 1.0, %v15221_v61  ;;  %14572 = vmatprep.subr.bf16.mxu0 %v17048_v30  ;;  %12834 = vmatprep.mubr.f32.mxu1 %v17315_v11 }
 0x2d3   : > { %v4190_v33 = vand.u32 4294901760, %v4185_v35  ;;  %v4183_v4 = vadd.f32 1.0, %v15223_v55  ;;  %13755 = vmatprep.mubr.f32.mxu0 %v16752_v38  ;;  %12835 = vmatmul.mubr.f32.gmra.mrb[6].mxu1 %v17323_v40 }
 0x2d4   : > { %v4307_v60 = vsub.f32 %v4186_v52, %v4193_v28  ;;  %v4188_v3 = vmul.f32 %v4184_v48, %v4172_v42  ;;  %13756 = vmatmul.mubr.f32.vlgmr.msra.gmra.mrb[28].mxu0 %v16754_v8  ;;  %14050 = vmatpush3.bf16.msra.mxu1 %v17461_v44 }
 0x2d5   : > { %v17551_v26 = vpack.c.bf16 %v4193_v28, %v4190_v33  ;;  %v4300_v19 = vsub.f32 %v4185_v35, %v4190_v33  ;;  %v4187_v7 = vmul.f32 %v4183_v4, %v4171_v20  ;;  %14574 = vmatpush3.bf16.msra.mxu0 %v17048_v30  ;;  %12845 = vmatprep.mubr.f32.mxu1 %v17167_v5 }
 0x2d6   : > { %v4199_v54 = vand.u32 4294901760, %v4188_v3  ;;  %14576 = vmatprep.subr.bf16.mxu0 %v17061_v32  ;;  %13758 = vmatprep.mubr.f32.mxu0 %v16756_v45  ;;  %v4308_v37 = vand.u32 4294901760, %v4307_v60 }
 0x2d7   : > { %v4196_v43 = vand.u32 4294901760, %v4187_v7  ;;  %12846 = vmatmul.mubr.f32.vlgmr.msra.gmra.mrb[4].mxu1 %v17310_v39  ;;  %14100 = vmatprep.subr.bf16.mxu1 %v17551_v26  ;;  %v4301_v44 = vand.u32 4294901760, %v4300_v19  ;;  %v14115_v1 = vpack.c.bf16 %v4307_v60, %v4300_v19 }
 0x2d8   : > { %v4321_v13 = vsub.f32 %v4188_v3, %v4199_v54  ;;  %13759 = vmatmul.mubr.f32.gmra.mrb[30].mxu0 %v16758_v17  ;;  %14102 = vmatpush3.bf16.msra.mxu1 %v17551_v26  ;;  %v4309_v30 = vsub.f32 %v4307_v60, %v4308_v37 }
 0x2d9   : > { %v17561_v49 = vpack.c.bf16 %v4199_v54, %v4196_v43  ;;  %v4314_v50 = vsub.f32 %v4187_v7, %v4196_v43  ;;  %14578 = vmatpush3.bf16.msra.mxu0 %v17061_v32  ;;  %12848 = vmatprep.mubr.f32.mxu1 %v17315_v11  ;;  %v4302_v34 = vsub.f32 %v4300_v19, %v4301_v44 }
 0x2da   : > { %13769 = vmatprep.mubr.f32.mxu0 %v16752_v38  ;;  %v4310_v63 = vand.u32 4294901760, %v4309_v30  ;;  %v4322_v16 = vand.u32 4294901760, %v4321_v13  ;;  %v14131_v29 = vpack.c.bf16 %v4308_v37, %v4301_v44 }
 0x2db   : > { %12849 = vmatmul.mubr.f32.gmra.mrb[6].mxu1 %v17323_v40  ;;  %14104 = vmatprep.subr.bf16.mxu1 %v17561_v49  ;;  %v4303_v25 = vand.u32 4294901760, %v4302_v34  ;;  %v4315_v2 = vand.u32 4294901760, %v4314_v50  ;;  %v14119_v53 = vpack.c.bf16 %v4321_v13, %v4314_v50 }
 0x2dc   : > { %13770 = vmatmul.mubr.f32.vlgmr.msra.gmra.mrb[28].mxu0 %v16754_v8  ;;  %14106 = vmatpush3.bf16.msra.mxu1 %v17561_v49  ;;  %v4323_v32 = vsub.f32 %v4321_v13, %v4322_v16 }
 0x2dd   : > { %12943 = vmatprep.mubr.f32.mxu1 %v17185_v21  ;;  %13772 = vmatprep.mubr.f32.mxu0 %v16756_v45  ;;  %v14107_v38 = vpack.c.bf16 %v4310_v63, %v4303_v25  ;;  %v4316_v15 = vsub.f32 %v4314_v50, %v4315_v2  ;;  %v14135_v59 = vpack.c.bf16 %v4322_v16, %v4315_v2 }
 0x2de   : > { %v4324_v47 = vand.u32 4294901760, %v4323_v32 }
 0x2df   : > { %12944 = vmatmul.mubr.f32.vlgmr.msra.gmra.mrb[8].mxu1 %v17361_v12  ;;  %14108 = vmatprep.subr.bf16.mxu1 %v14107_v38  ;;  %v4317_v14 = vand.u32 4294901760, %v4316_v15 }
 0x2e0   : > { %13773 = vmatmul.mubr.f32.gmra.mrb[30].mxu0 %v16758_v17  ;;  %14110 = vmatpush3.bf16.msra.mxu1 %v14107_v38 }
 0x2e1   : > { %12946 = vmatprep.mubr.f32.mxu1 %v17373_v58  ;;  %v14111_v8 = vpack.c.bf16 %v4324_v47, %v4317_v14 }
 0x2e3   : > { %12947 = vmatmul.mubr.f32.gmra.mrb[10].mxu1 %v17378_v62  ;;  %14112 = vmatprep.subr.bf16.mxu1 %v14111_v8 }
 0x2e4   : > { %14114 = vmatpush3.bf16.msra.mxu1 %v14111_v8  ;;  %12957 = vmatprep.mubr.f32.mxu1 %v17167_v5 }
 0x2e5   : > { %14116 = vmatprep.subr.bf16.mxu1 %v14115_v1 }
 0x2e7   : > { %12958 = vmatmul.mubr.f32.vlgmr.msra.gmra.mrb[8].mxu1 %v17310_v39 }
 0x2e8   : > { %14118 = vmatpush3.bf16.msra.mxu1 %v14115_v1  ;;  %12960 = vmatprep.mubr.f32.mxu1 %v17315_v11 }
 0x2e9   : > { %14120 = vmatprep.subr.bf16.mxu1 %v14119_v53 }
 0x2eb   : > { %12961 = vmatmul.mubr.f32.gmra.mrb[10].mxu1 %v17323_v40 }
 0x2ec   : > { %14122 = vmatpush3.bf16.msra.mxu1 %v14119_v53  ;;  %12971 = vmatprep.mubr.f32.mxu1 %v17173_v57 }
 0x2ed   : > { %14124 = vmatprep.subr.bf16.mxu1 %v17551_v26 }
 0x2ee   : > { %v13099_v45 = vpop.f32.mrb[12].mxu0 }
 0x2ef   : > { %v14651_v17 = vadd.f32 %v13099_v45, %v17274_v6  ;;  %12972 = vmatmul.mubr.f32.vlgmr.msra.gmra.mrb[8].mxu1 %v17320_v27  ;;  %v5508_v51 = vpop.f32.mrb[13].mxu0 }
 0x2f0   : > { %v14652_v22 = vadd.f32 %v5508_v51, %v17267_v10  ;;  %14126 = vmatpush3.bf16.msra.mxu1 %v17551_v26  ;;  %12974 = vmatprep.mubr.f32.mxu1 %v17328_v23 }
 0x2f1   : > { %v5535_v56 = vmul.f32 0.70710677, %v14651_v17  ;;  %14128 = vmatprep.subr.bf16.mxu1 %v17561_v49  ;;  %v5531_v20 = vmul.f32 0.5, %v14651_v17 }
 0x2f2   : > { %v5534_v36 = vmul.f32 0.70710677, %v14652_v22  ;;  %v13102_v52 = vpop.f32.mrb[14].mxu0  ;;  %v5530_v60 = vmul.f32 0.5, %v14652_v22 }
 0x2f3   : > { %15224 = verf.f32 %v5535_v56  ;;  %v14653_v61 = vadd.f32 %v13102_v52, %v17285_v41  ;;  %12975 = vmatmul.mubr.f32.gmra.mrb[10].mxu1 %v17336_v0  ;;  %v5520_v35 = vpop.f32.mrb[15].mxu0 }
 0x2f4   : > { %15226 = verf.f32 %v5534_v36  ;;  %v14654_v55 = vadd.f32 %v5520_v35, %v17287_v24  ;;  %14130 = vmatpush3.bf16.msra.mxu1 %v17561_v49  ;;  %12985 = vmatprep.mubr.f32.mxu1 %v17177_v9 }
 0x2f5   : > { %v5537_v28 = vmul.f32 0.70710677, %v14653_v61  ;;  %14132 = vmatprep.subr.bf16.mxu1 %v14131_v29  ;;  %v5533_v44 = vmul.f32 0.5, %v14653_v61 }
 0x2f6   : > { %v5536_v42 = vmul.f32 0.70710677, %v14654_v55  ;;  %v5532_v30 = vmul.f32 0.5, %v14654_v55 }
 0x2f7   : > { %15228 = verf.f32 %v5537_v28  ;;  %12986 = vmatmul.mubr.f32.vlgmr.msra.gmra.mrb[8].mxu1 %v17332_v31 }
 0x2f8   : > { %15230 = verf.f32 %v5536_v42  ;;  %14134 = vmatpush3.bf16.msra.mxu1 %v14131_v29  ;;  %12988 = vmatprep.mubr.f32.mxu1 %v17341_v46 }
 0x2f9   : > { %14136 = vmatprep.subr.bf16.mxu1 %v14135_v59 }
 0x2fb   : > { %12989 = vmatmul.mubr.f32.gmra.mrb[10].mxu1 %v17351_v18 }
 0x2fc   : > { %14138 = vmatpush3.bf16.msra.mxu1 %v14135_v59  ;;  %12999 = vmatprep.mubr.f32.mxu1 %v17167_v5 }
 0x2fd   : > { %v15225_v48 = vpop.eup %15224  ;;  %14140 = vmatprep.subr.bf16.mxu1 %v17551_v26 }
 0x2fe   : > { %v15227_v33 = vpop.eup %15226  ;;  %v5543_v4 = vadd.f32 1.0, %v15225_v48 }
 0x2ff   : > { %v5542_v3 = vadd.f32 1.0, %v15227_v33  ;;  %13000 = vmatmul.mubr.f32.vlgmr.msra.gmra.mrb[8].mxu1 %v17310_v39 }
 0x300   : > { %v5547_v19 = vmul.f32 %v5543_v4, %v5531_v20  ;;  %14142 = vmatpush3.bf16.msra.mxu1 %v17551_v26  ;;  %13002 = vmatprep.mubr.f32.mxu1 %v17315_v11 }
 0x301   : > { %v15229_v7 = vpop.eup %15228  ;;  %v5546_v54 = vmul.f32 %v5542_v3, %v5530_v60  ;;  %14144 = vmatprep.subr.bf16.mxu1 %v17561_v49 }
 0x302   : > { %v15231_v37 = vpop.eup %15230  ;;  %v5554_v43 = vand.u32 4294901760, %v5547_v19  ;;  %v5545_v1 = vadd.f32 1.0, %v15229_v7 }
 0x303   : > { %v5551_v13 = vand.u32 4294901760, %v5546_v54  ;;  %v5544_v50 = vadd.f32 1.0, %v15231_v37  ;;  %13003 = vmatmul.mubr.f32.gmra.mrb[10].mxu1 %v17323_v40 }
 0x304   : > { %v5668_v34 = vsub.f32 %v5547_v19, %v5554_v43  ;;  %v5549_v63 = vmul.f32 %v5545_v1, %v5533_v44  ;;  %14146 = vmatpush3.bf16.msra.mxu1 %v17561_v49  ;;  %13013 = vmatprep.mubr.f32.mxu1 %v17167_v5 }
 0x305   : > { %v17605_v26 = vpack.c.bf16 %v5554_v43, %v5551_v13  ;;  %v5661_v16 = vsub.f32 %v5546_v54, %v5551_v13  ;;  %v5548_v29 = vmul.f32 %v5544_v50, %v5532_v30 }
 0x306   : > { %v5560_v25 = vand.u32 4294901760, %v5549_v63  ;;  %v5669_v2 = vand.u32 4294901760, %v5668_v34 }
 0x307   : > { %v5557_v53 = vand.u32 4294901760, %v5548_v29  ;;  %13014 = vmatmul.mubr.f32.vlgmr.msra.gmra.mrb[8].mxu1 %v17310_v39  ;;  %14196 = vmatprep.subr.bf16.mxu1 %v17605_v26  ;;  %v5662_v32 = vand.u32 4294901760, %v5661_v16  ;;  %v14211_v38 = vpack.c.bf16 %v5668_v34, %v5661_v16 }
 0x308   : > { %v5682_v15 = vsub.f32 %v5549_v63, %v5560_v25  ;;  %14198 = vmatpush3.bf16.msra.mxu1 %v17605_v26  ;;  %13016 = vmatprep.mubr.f32.mxu1 %v17315_v11  ;;  %v5670_v49 = vsub.f32 %v5668_v34, %v5669_v2 }
 0x309   : > { %v17611_v59 = vpack.c.bf16 %v5560_v25, %v5557_v53  ;;  %v5675_v47 = vsub.f32 %v5548_v29, %v5557_v53  ;;  %v5663_v14 = vsub.f32 %v5661_v16, %v5662_v32  ;;  %v14227_v8 = vpack.c.bf16 %v5669_v2, %v5662_v32 }
 0x30a   : > { %v5671_v45 = vand.u32 4294901760, %v5670_v49  ;;  %v5683_v17 = vand.u32 4294901760, %v5682_v15 }
 0x30b   : > { %13017 = vmatmul.mubr.f32.gmra.mrb[10].mxu1 %v17323_v40  ;;  %14200 = vmatprep.subr.bf16.mxu1 %v17611_v59  ;;  %v5664_v51 = vand.u32 4294901760, %v5663_v14  ;;  %v5676_v22 = vand.u32 4294901760, %v5675_v47  ;;  %v14215_v56 = vpack.c.bf16 %v5682_v15, %v5675_v47 }
 0x30c   : > { %14202 = vmatpush3.bf16.msra.mxu1 %v17611_v59  ;;  %13111 = vmatprep.mubr.f32.mxu1 %v17185_v21  ;;  %v5684_v36 = vsub.f32 %v5682_v15, %v5683_v17 }
 0x30d   : > { %v14203_v52 = vpack.c.bf16 %v5671_v45, %v5664_v51  ;;  %v5677_v61 = vsub.f32 %v5675_v47, %v5676_v22  ;;  %v14231_v35 = vpack.c.bf16 %v5683_v17, %v5676_v22 }
 0x30e   : > { %v5685_v55 = vand.u32 4294901760, %v5684_v36 }
 0x30f   : > { %13112 = vmatmul.mubr.f32.vlgmr.msra.gmra.mrb[12].mxu1 %v17361_v12  ;;  %14204 = vmatprep.subr.bf16.mxu1 %v14203_v52  ;;  %v5678_v28 = vand.u32 4294901760, %v5677_v61 }
 0x310   : > { %14206 = vmatpush3.bf16.msra.mxu1 %v14203_v52  ;;  %13114 = vmatprep.mubr.f32.mxu1 %v17373_v58 }
 0x311   : > { %v14207_v42 = vpack.c.bf16 %v5685_v55, %v5678_v28 }
 0x313   : > { %13115 = vmatmul.mubr.f32.gmra.mrb[14].mxu1 %v17378_v62  ;;  %14208 = vmatprep.subr.bf16.mxu1 %v14207_v42 }
 0x314   : > { %14210 = vmatpush3.bf16.msra.mxu1 %v14207_v42  ;;  %13125 = vmatprep.mubr.f32.mxu1 %v17167_v5 }
 0x315   : > { %14212 = vmatprep.subr.bf16.mxu1 %v14211_v38 }
 0x317   : > { %13126 = vmatmul.mubr.f32.vlgmr.msra.gmra.mrb[12].mxu1 %v17310_v39 }
 0x318   : > { %14214 = vmatpush3.bf16.msra.mxu1 %v14211_v38  ;;  %13128 = vmatprep.mubr.f32.mxu1 %v17315_v11 }
 0x319   : > { %14216 = vmatprep.subr.bf16.mxu1 %v14215_v56 }
 0x31b   : > { %13129 = vmatmul.mubr.f32.gmra.mrb[14].mxu1 %v17323_v40 }
 0x31c   : > { %14218 = vmatpush3.bf16.msra.mxu1 %v14215_v56  ;;  %13139 = vmatprep.mubr.f32.mxu1 %v17173_v57 }
 0x31d   : > { %14220 = vmatprep.subr.bf16.mxu1 %v17605_v26 }
 0x31e   : > { %v13267_v48 = vpop.f32.mrb[16].mxu0 }
 0x31f   : > { %v14659_v33 = vadd.f32 %v13267_v48, %v17274_v6  ;;  %13140 = vmatmul.mubr.f32.vlgmr.msra.gmra.mrb[12].mxu1 %v17320_v27  ;;  %v6869_v20 = vpop.f32.mrb[17].mxu0 }
 0x320   : > { %v14660_v4 = vadd.f32 %v6869_v20, %v17267_v10  ;;  %14222 = vmatpush3.bf16.msra.mxu1 %v17605_v26  ;;  %13142 = vmatprep.mubr.f32.mxu1 %v17328_v23 }
 0x321   : > { %v6896_v60 = vmul.f32 0.70710677, %v14659_v33  ;;  %14224 = vmatprep.subr.bf16.mxu1 %v17611_v59  ;;  %v6892_v30 = vmul.f32 0.5, %v14659_v33 }
 0x322   : > { %v6895_v3 = vmul.f32 0.70710677, %v14660_v4  ;;  %v13270_v19 = vpop.f32.mrb[18].mxu0  ;;  %v6891_v34 = vmul.f32 0.5, %v14660_v4 }
 0x323   : > { %15232 = verf.f32 %v6896_v60  ;;  %v14661_v7 = vadd.f32 %v13270_v19, %v17285_v41  ;;  %13143 = vmatmul.mubr.f32.gmra.mrb[14].mxu1 %v17336_v0  ;;  %v6881_v54 = vpop.f32.mrb[19].mxu0 }
 0x324   : > { %15234 = verf.f32 %v6895_v3  ;;  %v14662_v37 = vadd.f32 %v6881_v54, %v17287_v24  ;;  %14226 = vmatpush3.bf16.msra.mxu1 %v17611_v59  ;;  %13153 = vmatprep.mubr.f32.mxu1 %v17177_v9 }
 0x325   : > { %v6898_v43 = vmul.f32 0.70710677, %v14661_v7  ;;  %14228 = vmatprep.subr.bf16.mxu1 %v14227_v8  ;;  %v6894_v32 = vmul.f32 0.5, %v14661_v7 }
 0x326   : > { %v6897_v44 = vmul.f32 0.70710677, %v14662_v37  ;;  %v6893_v49 = vmul.f32 0.5, %v14662_v37 }
 0x327   : > { %15236 = verf.f32 %v6898_v43  ;;  %13154 = vmatmul.mubr.f32.vlgmr.msra.gmra.mrb[12].mxu1 %v17332_v31 }
 0x328   : > { %15238 = verf.f32 %v6897_v44  ;;  %14230 = vmatpush3.bf16.msra.mxu1 %v14227_v8  ;;  %13156 = vmatprep.mubr.f32.mxu1 %v17341_v46 }
 0x329   : > { %14232 = vmatprep.subr.bf16.mxu1 %v14231_v35 }
 0x32b   : > { %13157 = vmatmul.mubr.f32.gmra.mrb[14].mxu1 %v17351_v18 }
 0x32c   : > { %14234 = vmatpush3.bf16.msra.mxu1 %v14231_v35  ;;  %13167 = vmatprep.mubr.f32.mxu1 %v17167_v5 }
 0x32d   : > { %v15233_v1 = vpop.eup %15232  ;;  %14236 = vmatprep.subr.bf16.mxu1 %v17605_v26 }
 0x32e   : > { %v15235_v13 = vpop.eup %15234  ;;  %v6904_v50 = vadd.f32 1.0, %v15233_v1 }
 0x32f   : > { %v6903_v63 = vadd.f32 1.0, %v15235_v13  ;;  %13168 = vmatmul.mubr.f32.vlgmr.msra.gmra.mrb[12].mxu1 %v17310_v39 }
 0x330   : > { %v6908_v16 = vmul.f32 %v6904_v50, %v6892_v30  ;;  %14238 = vmatpush3.bf16.msra.mxu1 %v17605_v26  ;;  %13170 = vmatprep.mubr.f32.mxu1 %v17315_v11 }
 0x331   : > { %v15237_v29 = vpop.eup %15236  ;;  %v6907_v25 = vmul.f32 %v6903_v63, %v6891_v34  ;;  %14240 = vmatprep.subr.bf16.mxu1 %v17611_v59 }
 0x332   : > { %v15239_v2 = vpop.eup %15238  ;;  %v6915_v53 = vand.u32 4294901760, %v6908_v16  ;;  %v6906_v38 = vadd.f32 1.0, %v15237_v29 }
 0x333   : > { %v6912_v15 = vand.u32 4294901760, %v6907_v25  ;;  %v6905_v47 = vadd.f32 1.0, %v15239_v2  ;;  %13171 = vmatmul.mubr.f32.gmra.mrb[14].mxu1 %v17323_v40 }
 0x334   : > { %v7029_v14 = vsub.f32 %v6908_v16, %v6915_v53  ;;  %v6910_v8 = vmul.f32 %v6906_v38, %v6894_v32  ;;  %14242 = vmatpush3.bf16.msra.mxu1 %v17611_v59  ;;  %13181 = vmatprep.mubr.f32.mxu1 %v17167_v5 }
 0x335   : > { %v17649_v26 = vpack.c.bf16 %v6915_v53, %v6912_v15  ;;  %v7022_v45 = vsub.f32 %v6907_v25, %v6912_v15  ;;  %v6909_v17 = vmul.f32 %v6905_v47, %v6893_v49 }
 0x336   : > { %v6921_v51 = vand.u32 4294901760, %v6910_v8  ;;  %v7030_v22 = vand.u32 4294901760, %v7029_v14 }
 0x337   : > { %v6918_v56 = vand.u32 4294901760, %v6909_v17  ;;  %13182 = vmatmul.mubr.f32.vlgmr.msra.gmra.mrb[12].mxu1 %v17310_v39  ;;  %14292 = vmatprep.subr.bf16.mxu1 %v17649_v26  ;;  %v7023_v36 = vand.u32 4294901760, %v7022_v45  ;;  %v14307_v52 = vpack.c.bf16 %v7029_v14, %v7022_v45 }
 0x338   : > { %v7043_v61 = vsub.f32 %v6910_v8, %v6921_v51  ;;  %14294 = vmatpush3.bf16.msra.mxu1 %v17649_v26  ;;  %13184 = vmatprep.mubr.f32.mxu1 %v17315_v11  ;;  %v7031_v59 = vsub.f32 %v7029_v14, %v7030_v22 }
 0x339   : > { %v17655_v35 = vpack.c.bf16 %v6921_v51, %v6918_v56  ;;  %v7036_v55 = vsub.f32 %v6909_v17, %v6918_v56  ;;  %v7024_v28 = vsub.f32 %v7022_v45, %v7023_v36  ;;  %v14323_v42 = vpack.c.bf16 %v7030_v22, %v7023_v36 }
 0x33a   : > { %v7032_v48 = vand.u32 4294901760, %v7031_v59  ;;  %v7044_v33 = vand.u32 4294901760, %v7043_v61 }
 0x33b   : > { %13185 = vmatmul.mubr.f32.gmra.mrb[14].mxu1 %v17323_v40  ;;  %14296 = vmatprep.subr.bf16.mxu1 %v17655_v35  ;;  %v7025_v20 = vand.u32 4294901760, %v7024_v28  ;;  %v7037_v4 = vand.u32 4294901760, %v7036_v55  ;;  %v14311_v60 = vpack.c.bf16 %v7043_v61, %v7036_v55 }
 0x33c   : > { %14298 = vmatpush3.bf16.msra.mxu1 %v17655_v35  ;;  %13279 = vmatprep.mubr.f32.mxu1 %v17185_v21  ;;  %v7045_v3 = vsub.f32 %v7043_v61, %v7044_v33 }
 0x33d   : > { %v14299_v19 = vpack.c.bf16 %v7032_v48, %v7025_v20  ;;  %v7038_v7 = vsub.f32 %v7036_v55, %v7037_v4  ;;  %v14327_v54 = vpack.c.bf16 %v7044_v33, %v7037_v4 }
 0x33e   : > { %v7046_v37 = vand.u32 4294901760, %v7045_v3 }
 0x33f   : > { %13280 = vmatmul.mubr.f32.vlgmr.msra.gmra.mrb[16].mxu1 %v17361_v12  ;;  %14300 = vmatprep.subr.bf16.mxu1 %v14299_v19  ;;  %v7039_v43 = vand.u32 4294901760, %v7038_v7 }
 0x340   : > { %14302 = vmatpush3.bf16.msra.mxu1 %v14299_v19  ;;  %13282 = vmatprep.mubr.f32.mxu1 %v17373_v58 }
 0x341   : > { %v14303_v44 = vpack.c.bf16 %v7046_v37, %v7039_v43 }
 0x343   : > { %13283 = vmatmul.mubr.f32.gmra.mrb[18].mxu1 %v17378_v62  ;;  %14304 = vmatprep.subr.bf16.mxu1 %v14303_v44 }
 0x344   : > { %14306 = vmatpush3.bf16.msra.mxu1 %v14303_v44  ;;  %13293 = vmatprep.mubr.f32.mxu1 %v17167_v5 }
 0x345   : > { %14308 = vmatprep.subr.bf16.mxu1 %v14307_v52 }
 0x347   : > { %13294 = vmatmul.mubr.f32.vlgmr.msra.gmra.mrb[16].mxu1 %v17310_v39 }
 0x348   : > { %14310 = vmatpush3.bf16.msra.mxu1 %v14307_v52  ;;  %13296 = vmatprep.mubr.f32.mxu1 %v17315_v11 }
 0x349   : > { %14312 = vmatprep.subr.bf16.mxu1 %v14311_v60 }
 0x34b   : > { %13297 = vmatmul.mubr.f32.gmra.mrb[18].mxu1 %v17323_v40 }
 0x34c   : > { %14314 = vmatpush3.bf16.msra.mxu1 %v14311_v60  ;;  %13307 = vmatprep.mubr.f32.mxu1 %v17173_v57 }
 0x34d   : > { %14316 = vmatprep.subr.bf16.mxu1 %v17649_v26 }
 0x34e   : > { %v13435_v1 = vpop.f32.mrb[20].mxu0 }
 0x34f   : > { %v14667_v13 = vadd.f32 %v13435_v1, %v17274_v6  ;;  %13308 = vmatmul.mubr.f32.vlgmr.msra.gmra.mrb[16].mxu1 %v17320_v27  ;;  %v8230_v30 = vpop.f32.mrb[21].mxu0 }
 0x350   : > { %v14668_v50 = vadd.f32 %v8230_v30, %v17267_v10  ;;  %14318 = vmatpush3.bf16.msra.mxu1 %v17649_v26  ;;  %13310 = vmatprep.mubr.f32.mxu1 %v17328_v23 }
 0x351   : > { %v8257_v34 = vmul.f32 0.70710677, %v14667_v13  ;;  %14320 = vmatprep.subr.bf16.mxu1 %v17655_v35  ;;  %v8253_v49 = vmul.f32 0.5, %v14667_v13 }
 0x352   : > { %v8256_v63 = vmul.f32 0.70710677, %v14668_v50  ;;  %v8252_v14 = vmul.f32 0.5, %v14668_v50 }
 0x353   : > { %15240 = verf.f32 %v8257_v34  ;;  %v13438_v16 = vpop.f32.mrb[22].mxu0  ;;  %13311 = vmatmul.mubr.f32.gmra.mrb[18].mxu1 %v17336_v0 }
 0x354   : > { %15242 = verf.f32 %v8256_v63  ;;  %v14669_v29 = vadd.f32 %v13438_v16, %v17285_v41  ;;  %v8242_v25 = vpop.f32.mrb[23].mxu0  ;;  %14322 = vmatpush3.bf16.msra.mxu1 %v17655_v35  ;;  %13321 = vmatprep.mubr.f32.mxu1 %v17177_v9 }
 0x355   : > { %v14670_v2 = vadd.f32 %v8242_v25, %v17287_v24  ;;  %14324 = vmatprep.subr.bf16.mxu1 %v14323_v42 }
 0x356   : > { %v8259_v53 = vmul.f32 0.70710677, %v14669_v29  ;;  %v8255_v52 = vmul.f32 0.5, %v14669_v29 }
 0x357   : > { %v8258_v32 = vmul.f32 0.70710677, %v14670_v2  ;;  %13322 = vmatmul.mubr.f32.vlgmr.msra.gmra.mrb[16].mxu1 %v17332_v31  ;;  %v8254_v55 = vmul.f32 0.5, %v14670_v2 }
 0x358   : > { %15244 = verf.f32 %v8259_v53  ;;  %14326 = vmatpush3.bf16.msra.mxu1 %v14323_v42  ;;  %13324 = vmatprep.mubr.f32.mxu1 %v17341_v46 }
 0x359   : > { %15246 = verf.f32 %v8258_v32  ;;  %14328 = vmatprep.subr.bf16.mxu1 %v14327_v54 }
 0x35b   : > { %13325 = vmatmul.mubr.f32.gmra.mrb[18].mxu1 %v17351_v18 }
 0x35c   : > { %14330 = vmatpush3.bf16.msra.mxu1 %v14327_v54  ;;  %13335 = vmatprep.mubr.f32.mxu1 %v17167_v5 }
 0x35d   : > { %v15241_v38 = vpop.eup %15240  ;;  %14332 = vmatprep.subr.bf16.mxu1 %v17649_v26 }
 0x35e   : > { %v15243_v15 = vpop.eup %15242  ;;  %v8265_v47 = vadd.f32 1.0, %v15241_v38  ;;  %v17714_v38 = vpop.permute.xlu1 %1453 }
 0x35f   : > { %v8264_v8 = vadd.f32 1.0, %v15243_v15  ;;  %13336 = vmatmul.mubr.f32.vlgmr.msra.gmra.mrb[16].mxu1 %v17310_v39  ;;  %v17718_v15 = vpop.permute.xlu0 %1458 }
 0x360   : > { %v8269_v45 = vmul.f32 %v8265_v47, %v8253_v49  ;;  %14334 = vmatpush3.bf16.msra.mxu1 %v17649_v26  ;;  %13338 = vmatprep.mubr.f32.mxu1 %v17315_v11 }
 0x361   : > { %v8268_v17 = vmul.f32 %v8264_v8, %v8252_v14  ;;  %14336 = vmatprep.subr.bf16.mxu1 %v17655_v35 }
 0x362   : > { %v15245_v51 = vpop.eup %15244  ;;  %v8276_v22 = vand.u32 4294901760, %v8269_v45 }
 0x363   : > { %v15247_v56 = vpop.eup %15246  ;;  %v8273_v36 = vand.u32 4294901760, %v8268_v17  ;;  %v8267_v61 = vadd.f32 1.0, %v15245_v51  ;;  %13339 = vmatmul.mubr.f32.gmra.mrb[18].mxu1 %v17323_v40 }
 0x364   : > { %v8390_v59 = vsub.f32 %v8269_v45, %v8276_v22  ;;  %v8266_v28 = vadd.f32 1.0, %v15247_v56  ;;  %14338 = vmatpush3.bf16.msra.mxu1 %v17655_v35  ;;  %13349 = vmatprep.mubr.f32.mxu1 %v17167_v5  ;;  %v17725_v45 = vpop.permute.xlu1 %1463 }
 0x365   : > { %v17693_v26 = vpack.c.bf16 %v8276_v22, %v8273_v36  ;;  %v8383_v42 = vsub.f32 %v8268_v17, %v8273_v36  ;;  %v8271_v48 = vmul.f32 %v8267_v61, %v8255_v52  ;;  %v17732_v17 = vpop.permute.xlu0 %1468 }
 0x366   : > { %v8270_v33 = vmul.f32 %v8266_v28, %v8254_v55  ;;  %v8391_v20 = vand.u32 4294901760, %v8390_v59 }
 0x367   : > { %v8282_v4 = vand.u32 4294901760, %v8271_v48  ;;  %13350 = vmatmul.mubr.f32.vlgmr.msra.gmra.mrb[16].mxu1 %v17310_v39  ;;  %14388 = vmatprep.subr.bf16.mxu1 %v17693_v26  ;;  %v8384_v60 = vand.u32 4294901760, %v8383_v42  ;;  %v14403_v3 = vpack.c.bf16 %v8390_v59, %v8383_v42 }
 0x368   : > { %v8279_v19 = vand.u32 4294901760, %v8270_v33  ;;  %14390 = vmatpush3.bf16.msra.mxu1 %v17693_v26  ;;  %13352 = vmatprep.mubr.f32.mxu1 %v17315_v11  ;;  %v8392_v35 = vsub.f32 %v8390_v59, %v8391_v20 }
 0x369   : > { %v8404_v7 = vsub.f32 %v8271_v48, %v8282_v4  ;;  %v8385_v54 = vsub.f32 %v8383_v42, %v8384_v60  ;;  %v17699_v37 = vpack.c.bf16 %v8391_v20, %v8384_v60 }
 0x36a   : > { %v17701_v43 = vpack.c.bf16 %v8282_v4, %v8279_v19  ;;  %v8397_v44 = vsub.f32 %v8270_v33, %v8279_v19  ;;  %v8393_v1 = vand.u32 4294901760, %v8392_v35 }
 0x36b   : > { %13353 = vmatmul.mubr.f32.gmra.mrb[18].mxu1 %v17323_v40  ;;  %v8386_v13 = vand.u32 4294901760, %v8385_v54  ;;  %v8405_v30 = vand.u32 4294901760, %v8404_v7 }
 0x36c   : > { %14392 = vmatprep.subr.bf16.mxu1 %v17701_v43  ;;  %13447 = vmatprep.mubr.f32.mxu1 %v17185_v21  ;;  %v8398_v50 = vand.u32 4294901760, %v8397_v44  ;;  %v14407_v34 = vpack.c.bf16 %v8404_v7, %v8397_v44 }
 0x36d   : > { %14394 = vmatpush3.bf16.msra.mxu1 %v17701_v43  ;;  %v14395_v63 = vpack.c.bf16 %v8393_v1, %v8386_v13  ;;  %v8406_v16 = vsub.f32 %v8404_v7, %v8405_v30 }
 0x36e   : > { %v8399_v29 = vsub.f32 %v8397_v44, %v8398_v50  ;;  %v17707_v25 = vpack.c.bf16 %v8405_v30, %v8398_v50 }
 0x36f   : > { %14396 = vmatprep.subr.bf16.mxu1 %v14395_v63  ;;  %v8407_v2 = vand.u32 4294901760, %v8406_v16 }
 0x370   : > { %13448 = vmatmul.mubr.f32.vlgmr.msra.gmra.mrb[20].mxu1 %v17361_v12  ;;  %v8400_v53 = vand.u32 4294901760, %v8399_v29 }
 0x371   : > { %14398 = vmatpush3.bf16.msra.mxu1 %v14395_v63  ;;  %13450 = vmatprep.mubr.f32.mxu1 %v17373_v58 }
 0x372   : > { %v14399_v32 = vpack.c.bf16 %v8407_v2, %v8400_v53 }
 0x374   : > { %13451 = vmatmul.mubr.f32.gmra.mrb[22].mxu1 %v17378_v62  ;;  %14400 = vmatprep.subr.bf16.mxu1 %v14399_v32 }
 0x375   : > { %14402 = vmatpush3.bf16.msra.mxu1 %v14399_v32  ;;  %13461 = vmatprep.mubr.f32.mxu1 %v17167_v5 }
 0x376   : > { %14404 = vmatprep.subr.bf16.mxu1 %v14403_v3 }
 0x378   : > { %13462 = vmatmul.mubr.f32.vlgmr.msra.gmra.mrb[20].mxu1 %v17310_v39 }
 0x379   : > { %14406 = vmatpush3.bf16.msra.mxu1 %v14403_v3  ;;  %13464 = vmatprep.mubr.f32.mxu1 %v17315_v11 }
 0x37a   : > { %14408 = vmatprep.subr.bf16.mxu1 %v14407_v34  ;;  %v12679_v49 = vpop.f32.mrb[0].mxu1 }
 0x37b   : > { %v14631_v47 = vadd.f32 %v12679_v49, %v17718_v15  ;;  %v2075_v14 = vpop.f32.mrb[1].mxu1 }
 0x37c   : > { %v14632_v8 = vadd.f32 %v2075_v14, %v17714_v38  ;;  %13465 = vmatmul.mubr.f32.gmra.mrb[22].mxu1 %v17323_v40 }
 0x37d   : > { %2099 = vst.msk [vmem:[%s17727_s21 + $0x8] sm:$0xff] %vm2097_vm1, %v14631_v47  ;;  %14410 = vmatpush3.bf16.msra.mxu1 %v14407_v34  ;;  %13475 = vmatprep.mubr.f32.mxu1 %v17173_v57 }
 0x37e   : > { %2098 = vst.msk [vmem:[%s17727_s21] sm:$0xff] %vm2097_vm1, %v14632_v8  ;;  %14412 = vmatprep.subr.bf16.mxu1 %v17693_v26  ;;  %v12682_v51 = vpop.f32.mrb[2].mxu1 }
 0x37f   : > { %v14633_v22 = vadd.f32 %v12682_v51, %v17732_v17  ;;  %v13603_v56 = vpop.f32.mrb[24].mxu0  ;;  %v2087_v36 = vpop.f32.mrb[3].mxu1 }
 0x380   : > { %v14675_v52 = vadd.f32 %v13603_v56, %v17274_v6  ;;  %v14634_v61 = vadd.f32 %v2087_v36, %v17725_v45  ;;  %13476 = vmatmul.mubr.f32.vlgmr.msra.gmra.mrb[20].mxu1 %v17320_v27  ;;  %v9591_v59 = vpop.f32.mrb[25].mxu0 }
 0x381   : > { %2101 = vst.msk [vmem:[%s17727_s21 + $0x18] sm:$0xff] %vm2097_vm1, %v14633_v22  ;;  %v14676_v55 = vadd.f32 %v9591_v59, %v17267_v10  ;;  %14414 = vmatpush3.bf16.msra.mxu1 %v17693_v26  ;;  %13478 = vmatprep.mubr.f32.mxu1 %v17328_v23 }
 0x382   : > { %v9618_v28 = vmul.f32 0.70710677, %v14675_v52  ;;  %2100 = vst.msk [vmem:[%s17727_s21 + $0x10] sm:$0xff] %vm2097_vm1, %v14634_v61  ;;  %14416 = vmatprep.subr.bf16.mxu1 %v17701_v43  ;;  %v9614_v7 = vmul.f32 0.5, %v14675_v52 }
 0x383   : > { %v9617_v42 = vmul.f32 0.70710677, %v14676_v55  ;;  %v13606_v48 = vpop.f32.mrb[26].mxu0  ;;  %v9613_v44 = vmul.f32 0.5, %v14676_v55 }
 0x384   : > { %15248 = verf.f32 %v9618_v28  ;;  %v14677_v33 = vadd.f32 %v13606_v48, %v17285_v41  ;;  %13479 = vmatmul.mubr.f32.gmra.mrb[22].mxu1 %v17336_v0  ;;  %v9603_v20 = vpop.f32.mrb[27].mxu0 }
 0x385   : > { %15250 = verf.f32 %v9617_v42  ;;  %v14678_v4 = vadd.f32 %v9603_v20, %v17287_v24  ;;  %14418 = vmatpush3.bf16.msra.mxu1 %v17701_v43  ;;  %13489 = vmatprep.mubr.f32.mxu1 %v17177_v9 }
 0x386   : > { %v9620_v60 = vmul.f32 0.70710677, %v14677_v33  ;;  %14420 = vmatprep.subr.bf16.mxu1 %v17699_v37  ;;  %v9616_v63 = vmul.f32 0.5, %v14677_v33 }
 0x387   : > { %v9619_v3 = vmul.f32 0.70710677, %v14678_v4 }
 0x388   : > { %15252 = verf.f32 %v9620_v60  ;;  %13490 = vmatmul.mubr.f32.vlgmr.msra.gmra.mrb[20].mxu1 %v17332_v31 }
 0x389   : > { %15254 = verf.f32 %v9619_v3  ;;  %14422 = vmatpush3.bf16.msra.mxu1 %v17699_v37  ;;  %13492 = vmatprep.mubr.f32.mxu1 %v17341_v46 }
 0x38a   : > { %14424 = vmatprep.subr.bf16.mxu1 %v17707_v25 }
 0x38c   : > { %13493 = vmatmul.mubr.f32.gmra.mrb[22].mxu1 %v17351_v18 }
 0x38d   : > { %14426 = vmatpush3.bf16.msra.mxu1 %v17707_v25  ;;  %13503 = vmatprep.mubr.f32.mxu1 %v17167_v5  ;;  %v9615_v25 = vmul.f32 0.5, %v14678_v4 }
 0x38e   : > { %v15249_v19 = vpop.eup %15248  ;;  %14428 = vmatprep.subr.bf16.mxu1 %v17693_v26 }
 0x38f   : > { %v15251_v35 = vpop.eup %15250  ;;  %v9626_v54 = vadd.f32 1.0, %v15249_v19 }
 0x390   : > { %v9625_v1 = vadd.f32 1.0, %v15251_v35  ;;  %13504 = vmatmul.mubr.f32.vlgmr.msra.gmra.mrb[20].mxu1 %v17310_v39 }
 0x391   : > { %v9630_v37 = vmul.f32 %v9626_v54, %v9614_v7  ;;  %14430 = vmatpush3.bf16.msra.mxu1 %v17693_v26  ;;  %13506 = vmatprep.mubr.f32.mxu1 %v17315_v11 }
 0x392   : > { %v15253_v13 = vpop.eup %15252  ;;  %v9629_v30 = vmul.f32 %v9625_v1, %v9613_v44  ;;  %14432 = vmatprep.subr.bf16.mxu1 %v17701_v43 }
 0x393   : > { %v15255_v50 = vpop.eup %15254  ;;  %v9637_v34 = vand.u32 4294901760, %v9630_v37  ;;  %v9628_v16 = vadd.f32 1.0, %v15253_v13 }
 0x394   : > { %v9634_v29 = vand.u32 4294901760, %v9629_v30  ;;  %v9627_v2 = vadd.f32 1.0, %v15255_v50  ;;  %13507 = vmatmul.mubr.f32.gmra.mrb[22].mxu1 %v17323_v40 }
 0x395   : > { %v9751_v53 = vsub.f32 %v9630_v37, %v9637_v34  ;;  %v9632_v32 = vmul.f32 %v9628_v16, %v9616_v63  ;;  %14434 = vmatpush3.bf16.msra.mxu1 %v17701_v43  ;;  %13517 = vmatprep.mubr.f32.mxu1 %v17167_v5 }
 0x396   : > { %v17770_v26 = vpack.c.bf16 %v9637_v34, %v9634_v29  ;;  %v9744_v49 = vsub.f32 %v9629_v30, %v9634_v29  ;;  %v9631_v47 = vmul.f32 %v9627_v2, %v9615_v25 }
 0x397   : > { %v9643_v14 = vand.u32 4294901760, %v9632_v32  ;;  %v9752_v8 = vand.u32 4294901760, %v9751_v53 }
 0x398   : > { %v9640_v51 = vand.u32 4294901760, %v9631_v47  ;;  %13518 = vmatmul.mubr.f32.vlgmr.msra.gmra.mrb[20].mxu1 %v17310_v39  ;;  %14484 = vmatprep.subr.bf16.mxu1 %v17770_v26  ;;  %v9745_v22 = vand.u32 4294901760, %v9744_v49  ;;  %v14499_v56 = vpack.c.bf16 %v9751_v53, %v9744_v49 }
 0x399   : > { %v9765_v36 = vsub.f32 %v9632_v32, %v9643_v14  ;;  %14486 = vmatpush3.bf16.msra.mxu1 %v17770_v26  ;;  %13520 = vmatprep.mubr.f32.mxu1 %v17315_v11  ;;  %v9753_v43 = vsub.f32 %v9751_v53, %v9752_v8 }
 0x39a   : > { %v17776_v52 = vpack.c.bf16 %v9643_v14, %v9640_v51  ;;  %v9758_v61 = vsub.f32 %v9631_v47, %v9640_v51  ;;  %v9746_v59 = vsub.f32 %v9744_v49, %v9745_v22  ;;  %v17778_v55 = vpack.c.bf16 %v9752_v8, %v9745_v22 }
 0x39b   : > { %v9754_v28 = vand.u32 4294901760, %v9753_v43  ;;  %v9766_v42 = vand.u32 4294901760, %v9765_v36 }
 0x39c   : > { %13521 = vmatmul.mubr.f32.gmra.mrb[22].mxu1 %v17323_v40  ;;  %14488 = vmatprep.subr.bf16.mxu1 %v17776_v52  ;;  %v9747_v48 = vand.u32 4294901760, %v9746_v59  ;;  %v9759_v33 = vand.u32 4294901760, %v9758_v61  ;;  %v14503_v20 = vpack.c.bf16 %v9765_v36, %v9758_v61 }
 0x39d   : > { %14490 = vmatpush3.bf16.msra.mxu1 %v17776_v52  ;;  %13615 = vmatprep.mubr.f32.mxu1 %v17185_v21  ;;  %v9767_v4 = vsub.f32 %v9765_v36, %v9766_v42 }
 0x39e   : > { %v14491_v60 = vpack.c.bf16 %v9754_v28, %v9747_v48  ;;  %v9760_v3 = vsub.f32 %v9758_v61, %v9759_v33  ;;  %v14519_v19 = vpack.c.bf16 %v9766_v42, %v9759_v33 }
 0x39f   : > { %v9768_v35 = vand.u32 4294901760, %v9767_v4 }
 0x3a0   : > { %13616 = vmatmul.mubr.f32.vlgmr.msra.gmra.mrb[24].mxu1 %v17361_v12  ;;  %14492 = vmatprep.subr.bf16.mxu1 %v14491_v60  ;;  %v9761_v7 = vand.u32 4294901760, %v9760_v3 }
 0x3a1   : > { %14494 = vmatpush3.bf16.msra.mxu1 %v14491_v60  ;;  %13618 = vmatprep.mubr.f32.mxu1 %v17373_v58 }
 0x3a2   : > { %v14495_v54 = vpack.c.bf16 %v9768_v35, %v9761_v7 }
 0x3a4   : > { %13619 = vmatmul.mubr.f32.gmra.mrb[26].mxu1 %v17378_v62  ;;  %14496 = vmatprep.subr.bf16.mxu1 %v14495_v54 }
 0x3a5   : > { %14498 = vmatpush3.bf16.msra.mxu1 %v14495_v54  ;;  %13629 = vmatprep.mubr.f32.mxu1 %v17167_v5 }
 0x3a6   : > { %14500 = vmatprep.subr.bf16.mxu1 %v14499_v56 }
 0x3a8   : > { %13630 = vmatmul.mubr.f32.vlgmr.msra.gmra.mrb[24].mxu1 %v17310_v39 }
 0x3a9   : > { %14502 = vmatpush3.bf16.msra.mxu1 %v14499_v56  ;;  %13632 = vmatprep.mubr.f32.mxu1 %v17315_v11 }
 0x3aa   : > { %14504 = vmatprep.subr.bf16.mxu1 %v14503_v20  ;;  %v12847_v44 = vpop.f32.mrb[4].mxu1 }
 0x3ab   : > { %v14639_v1 = vadd.f32 %v12847_v44, %v17718_v15  ;;  %v3420_v37 = vpop.f32.mrb[5].mxu1 }
 0x3ac   : > { %v14640_v13 = vadd.f32 %v3420_v37, %v17714_v38  ;;  %13633 = vmatmul.mubr.f32.gmra.mrb[26].mxu1 %v17323_v40 }
 0x3ad   : > { %14506 = vmatpush3.bf16.msra.mxu1 %v14503_v20  ;;  %3448 = vrot.lane.b32.xlu0 %v14639_v1, %s15351_s22 }
 0x3ae   : > { %14508 = vmatprep.subr.bf16.mxu1 %v17770_v26  ;;  %v12850_v30 = vpop.f32.mrb[6].mxu1  ;;  %13643 = vmatprep.mubr.f32.mxu1 %v17173_v57 }
 0x3af   : > { %v14641_v50 = vadd.f32 %v12850_v30, %v17732_v17  ;;  %v13771_v34 = vpop.f32.mrb[28].mxu0  ;;  %3446 = vrot.lane.b32.xlu1 %v14640_v13, %s15351_s22  ;;  %v3432_v63 = vpop.f32.mrb[7].mxu1 }
 0x3b0   : > { %v14683_v16 = vadd.f32 %v13771_v34, %v17274_v6  ;;  %v14642_v29 = vadd.f32 %v3432_v63, %v17725_v45  ;;  %13644 = vmatmul.mubr.f32.vlgmr.msra.gmra.mrb[24].mxu1 %v17320_v27  ;;  %v10952_v25 = vpop.f32.mrb[29].mxu0 }
 0x3b1   : > { %v14684_v2 = vadd.f32 %v10952_v25, %v17267_v10  ;;  %14510 = vmatpush3.bf16.msra.mxu1 %v17770_v26  ;;  %3452 = vrot.lane.b32.xlu0 %v14641_v50, %s15351_s22 }
 0x3b2   : > { %v10979_v53 = vmul.f32 0.70710677, %v14683_v16  ;;  %14512 = vmatprep.subr.bf16.mxu1 %v17776_v52  ;;  %13646 = vmatprep.mubr.f32.mxu1 %v17328_v23  ;;  %v10975_v51 = vmul.f32 0.5, %v14683_v16 }
 0x3b3   : > { %v10978_v32 = vmul.f32 0.70710677, %v14684_v2  ;;  %v13774_v49 = vpop.f32.mrb[30].mxu0  ;;  %3450 = vrot.lane.b32.xlu1 %v14642_v29, %s15351_s22  ;;  %v10974_v56 = vmul.f32 0.5, %v14684_v2 }
 0x3b4   : > { %15256 = verf.f32 %v10979_v53  ;;  %v14685_v6 = vadd.f32 %v13774_v49, %v17285_v41  ;;  %13647 = vmatmul.mubr.f32.gmra.mrb[26].mxu1 %v17336_v0  ;;  %v10964_v47 = vpop.f32.mrb[31].mxu0 }
 0x3b5   : > { %15258 = verf.f32 %v10978_v32  ;;  %v14686_v10 = vadd.f32 %v10964_v47, %v17287_v24  ;;  %14514 = vmatpush3.bf16.msra.mxu1 %v17776_v52  ;;  %13657 = vmatprep.mubr.f32.mxu1 %v17177_v9 }
 0x3b6   : > { %v10981_v14 = vmul.f32 0.70710677, %v14685_v6  ;;  %14516 = vmatprep.subr.bf16.mxu1 %v17778_v55  ;;  %v10977_v42 = vmul.f32 0.5, %v14685_v6 }
 0x3b7   : > { %v10980_v8 = vmul.f32 0.70710677, %v14686_v10  ;;  %v10976_v20 = vmul.f32 0.5, %v14686_v10 }
 0x3b8   : > { %15260 = verf.f32 %v10981_v14  ;;  %13658 = vmatmul.mubr.f32.vlgmr.msra.gmra.mrb[24].mxu1 %v17332_v31 }
 0x3b9   : > { %15262 = verf.f32 %v10980_v8  ;;  %14518 = vmatpush3.bf16.msra.mxu1 %v17778_v55  ;;  %13660 = vmatprep.mubr.f32.mxu1 %v17341_v46 }
 0x3ba   : > { %14520 = vmatprep.subr.bf16.mxu1 %v14519_v19 }
 0x3bc   : > { %13661 = vmatmul.mubr.f32.gmra.mrb[26].mxu1 %v17351_v18 }
 0x3bd   : > { %14522 = vmatpush3.bf16.msra.mxu1 %v14519_v19  ;;  %13671 = vmatprep.mubr.f32.mxu1 %v17167_v5 }
 0x3be   : > { %v15257_v41 = vpop.eup %15256  ;;  %14524 = vmatprep.subr.bf16.mxu1 %v17770_v26 }
 0x3bf   : > { %v15259_v24 = vpop.eup %15258  ;;  %v10987_v22 = vadd.f32 1.0, %v15257_v41 }
 0x3c0   : > { %v10986_v36 = vadd.f32 1.0, %v15259_v24  ;;  %13672 = vmatmul.mubr.f32.vlgmr.msra.gmra.mrb[24].mxu1 %v17310_v39 }
 0x3c1   : > { %v10991_v43 = vmul.f32 %v10987_v22, %v10975_v51  ;;  %14526 = vmatpush3.bf16.msra.mxu1 %v17770_v26  ;;  %13674 = vmatprep.mubr.f32.mxu1 %v17315_v11 }
 0x3c2   : > { %v15261_v61 = vpop.eup %15260  ;;  %v10990_v59 = vmul.f32 %v10986_v36, %v10974_v56  ;;  %14528 = vmatprep.subr.bf16.mxu1 %v17776_v52 }
 0x3c3   : > { %v15263_v55 = vpop.eup %15262  ;;  %v10998_v28 = vand.u32 4294901760, %v10991_v43  ;;  %v10989_v48 = vadd.f32 1.0, %v15261_v61 }
 0x3c4   : > { %v10995_v33 = vand.u32 4294901760, %v10990_v59  ;;  %v10988_v4 = vadd.f32 1.0, %v15263_v55  ;;  %13675 = vmatmul.mubr.f32.gmra.mrb[26].mxu1 %v17323_v40 }
 0x3c5   : > { %v11112_v60 = vsub.f32 %v10991_v43, %v10998_v28  ;;  %v10993_v3 = vmul.f32 %v10989_v48, %v10977_v42  ;;  %14530 = vmatpush3.bf16.msra.mxu1 %v17776_v52  ;;  %13685 = vmatprep.mubr.f32.mxu1 %v17167_v5 }
 0x3c6   : > { %v17826_v26 = vpack.c.bf16 %v10998_v28, %v10995_v33  ;;  %v11105_v19 = vsub.f32 %v10990_v59, %v10995_v33  ;;  %v10992_v35 = vmul.f32 %v10988_v4, %v10976_v20 }
 0x3c7   : > { %v11004_v7 = vand.u32 4294901760, %v10993_v3  ;;  %v11113_v54 = vand.u32 4294901760, %v11112_v60 }
 0x3c8   : > { %v11001_v44 = vand.u32 4294901760, %v10992_v35  ;;  %13686 = vmatmul.mubr.f32.vlgmr.msra.gmra.mrb[24].mxu1 %v17310_v39  ;;  %14580 = vmatprep.subr.bf16.mxu1 %v17826_v26  ;;  %v11106_v1 = vand.u32 4294901760, %v11105_v19  ;;  %v14595_v37 = vpack.c.bf16 %v11112_v60, %v11105_v19 }
 0x3c9   : > { %v11126_v13 = vsub.f32 %v10993_v3, %v11004_v7  ;;  %14582 = vmatpush3.bf16.msra.mxu1 %v17826_v26  ;;  %13688 = vmatprep.mubr.f32.mxu1 %v17315_v11  ;;  %v11114_v52 = vsub.f32 %v11112_v60, %v11113_v54 }
 0x3ca   : > { %v17832_v30 = vpack.c.bf16 %v11004_v7, %v11001_v44  ;;  %v11119_v50 = vsub.f32 %v10992_v35, %v11001_v44  ;;  %v11107_v34 = vsub.f32 %v11105_v19, %v11106_v1  ;;  %v14611_v63 = vpack.c.bf16 %v11113_v54, %v11106_v1 }
 0x3cb   : > { %v11115_v16 = vand.u32 4294901760, %v11114_v52  ;;  %v11127_v29 = vand.u32 4294901760, %v11126_v13 }
 0x3cc   : > { %13689 = vmatmul.mubr.f32.gmra.mrb[26].mxu1 %v17323_v40  ;;  %14584 = vmatprep.subr.bf16.mxu1 %v17832_v30  ;;  %v11108_v25 = vand.u32 4294901760, %v11107_v34  ;;  %v11120_v2 = vand.u32 4294901760, %v11119_v50  ;;  %v14599_v53 = vpack.c.bf16 %v11126_v13, %v11119_v50 }
 0x3cd   : > { %14586 = vmatpush3.bf16.msra.mxu1 %v17832_v30  ;;  %13783 = vmatprep.mubr.f32.mxu1 %v17185_v21  ;;  %v11128_v32 = vsub.f32 %v11126_v13, %v11127_v29 }
 0x3ce   : > { %v14587_v49 = vpack.c.bf16 %v11115_v16, %v11108_v25  ;;  %v11121_v6 = vsub.f32 %v11119_v50, %v11120_v2  ;;  %v14615_v47 = vpack.c.bf16 %v11127_v29, %v11120_v2 }
 0x3cf   : > { %v11129_v10 = vand.u32 4294901760, %v11128_v32 }
 0x3d0   : > { %13784 = vmatmul.mubr.f32.vlgmr.msra.gmra.mrb[28].mxu1 %v17361_v12  ;;  %14588 = vmatprep.subr.bf16.mxu1 %v14587_v49  ;;  %v11122_v14 = vand.u32 4294901760, %v11121_v6 }
 0x3d1   : > { %14590 = vmatpush3.bf16.msra.mxu1 %v14587_v49  ;;  %13786 = vmatprep.mubr.f32.mxu1 %v17373_v58 }
 0x3d2   : > { %v14591_v8 = vpack.c.bf16 %v11129_v10, %v11122_v14 }
 0x3d4   : > { %13787 = vmatmul.mubr.f32.gmra.mrb[30].mxu1 %v17378_v62  ;;  %14592 = vmatprep.subr.bf16.mxu1 %v14591_v8 }
 0x3d5   : > { %14594 = vmatpush3.bf16.msra.mxu1 %v14591_v8  ;;  %13797 = vmatprep.mubr.f32.mxu1 %v17167_v5 }
 0x3d6   : > { %14596 = vmatprep.subr.bf16.mxu1 %v14595_v37 }
 0x3d8   : > { %13798 = vmatmul.mubr.f32.vlgmr.msra.gmra.mrb[28].mxu1 %v17310_v39 }
 0x3d9   : > { %14598 = vmatpush3.bf16.msra.mxu1 %v14595_v37  ;;  %13800 = vmatprep.mubr.f32.mxu1 %v17315_v11 }
 0x3da   : > { %14600 = vmatprep.subr.bf16.mxu1 %v14599_v53  ;;  %v13015_v12 = vpop.f32.mrb[8].mxu1 }
 0x3db   : > { %v14647_v21 = vadd.f32 %v13015_v12, %v17718_v15  ;;  %v4781_v41 = vpop.f32.mrb[9].mxu1 }
 0x3dc   : > { %v14648_v58 = vadd.f32 %v4781_v41, %v17714_v38  ;;  %13801 = vmatmul.mubr.f32.gmra.mrb[30].mxu1 %v17323_v40 }
 0x3dd   : > { %14602 = vmatpush3.bf16.msra.mxu1 %v14599_v53  ;;  %4809 = vrot.lane.b32.xlu0 %v14647_v21, %s15352_s19 }
 0x3de   : > { %14604 = vmatprep.subr.bf16.mxu1 %v17826_v26  ;;  %v13018_v62 = vpop.f32.mrb[10].mxu1  ;;  %13811 = vmatprep.mubr.f32.mxu1 %v17173_v57 }
 0x3df   : > { %v14649_v24 = vadd.f32 %v13018_v62, %v17732_v17  ;;  %4807 = vrot.lane.b32.xlu1 %v14648_v58, %s15352_s19  ;;  %v4793_v51 = vpop.f32.mrb[11].mxu1 }
 0x3e0   : > { %v14650_v22 = vadd.f32 %v4793_v51, %v17725_v45  ;;  %13812 = vmatmul.mubr.f32.vlgmr.msra.gmra.mrb[28].mxu1 %v17320_v27 }
 0x3e1   : > { %14606 = vmatpush3.bf16.msra.mxu1 %v17826_v26  ;;  %4813 = vrot.lane.b32.xlu0 %v14649_v24, %s15352_s19 }
 0x3e2   : > { %14608 = vmatprep.subr.bf16.mxu1 %v17832_v30  ;;  %13814 = vmatprep.mubr.f32.mxu1 %v17328_v23 }
 0x3e3   : > { %4811 = vrot.lane.b32.xlu1 %v14650_v22, %s15352_s19 }
 0x3e4   : > { %13815 = vmatmul.mubr.f32.gmra.mrb[30].mxu1 %v17336_v0 }
 0x3e5   : > { %14610 = vmatpush3.bf16.msra.mxu1 %v17832_v30  ;;  %13825 = vmatprep.mubr.f32.mxu1 %v17177_v9 }
 0x3e6   : > { %14612 = vmatprep.subr.bf16.mxu1 %v14611_v63 }
 0x3e8   : > { %13826 = vmatmul.mubr.f32.vlgmr.msra.gmra.mrb[28].mxu1 %v17332_v31 }
 0x3e9   : > { %14614 = vmatpush3.bf16.msra.mxu1 %v14611_v63  ;;  %13828 = vmatprep.mubr.f32.mxu1 %v17341_v46 }
 0x3ea   : > { %14616 = vmatprep.subr.bf16.mxu1 %v14615_v47 }
 0x3ec   : > { %13829 = vmatmul.mubr.f32.gmra.mrb[30].mxu1 %v17351_v18 }
 0x3ed   : > { %14618 = vmatpush3.bf16.msra.mxu1 %v14615_v47  ;;  %13839 = vmatprep.mubr.f32.mxu1 %v17167_v5 }
 0x3ee   : > { %14620 = vmatprep.subr.bf16.mxu1 %v17826_v26 }
 0x3f0   : > { %13840 = vmatmul.mubr.f32.vlgmr.msra.gmra.mrb[28].mxu1 %v17310_v39 }
 0x3f1   : > { %14622 = vmatpush3.bf16.msra.mxu1 %v17826_v26  ;;  %13842 = vmatprep.mubr.f32.mxu1 %v17315_v11 }
 0x3f2   : > { %14624 = vmatprep.subr.bf16.mxu1 %v17832_v30 }
 0x3f4   : > { %13843 = vmatmul.mubr.f32.gmra.mrb[30].mxu1 %v17323_v40 }
 0x3f5   : > { %14626 = vmatpush3.bf16.msra.mxu1 %v17832_v30  ;;  %13853 = vmatprep.mubr.f32.mxu1 %v17167_v5 }
 0x3f8   : > { %13854 = vmatmul.mubr.f32.vlgmr.msra.gmra.mrb[28].mxu1 %v17310_v39 }
 0x3f9   : > { %13856 = vmatprep.mubr.f32.mxu1 %v17315_v11 }
 0x3fc   : > { %13857 = vmatmul.mubr.f32.gmra.mrb[30].mxu1 %v17323_v40 }
 0x40a   : > { %v13183_v57 = vpop.f32.mrb[12].mxu1 }
 0x40b   : > { %v14655_v9 = vadd.f32 %v13183_v57, %v17718_v15  ;;  %v6142_v27 = vpop.f32.mrb[13].mxu1 }
 0x40c   : > { %v14656_v23 = vadd.f32 %v6142_v27, %v17714_v38 }
 0x40d   : > { %6170 = vrot.lane.b32.xlu0 %v14655_v9, %s15353_s20 }
 0x40e   : > { %v13186_v31 = vpop.f32.mrb[14].mxu1  ;;  %6168 = vrot.lane.b32.xlu1 %v14656_v23, %s15353_s20 }
 0x40f   : > { %v14657_v5 = vadd.f32 %v13186_v31, %v17732_v17  ;;  %v6154_v39 = vpop.f32.mrb[15].mxu1 }
 0x410   : > { %v14658_v11 = vadd.f32 %v6154_v39, %v17725_v45 }
 0x411   : > { %6174 = vrot.lane.b32.xlu0 %v14657_v5, %s15353_s20 }
 0x412   : > { %6172 = vrot.lane.b32.xlu1 %v14658_v11, %s15353_s20  ;;  %s17924_s20 = scalar_lea.hbm %s17987_s8, %s11746_s11 }
 0x41f   : > { %v3449_v40 = vpop.permute.xlu0 %3448 }
 0x420   : > { %3460 = vst.msk [vmem:[%s17727_s21 + $0x8] sm:$0xff] %vm3458_vm2, %v3449_v40 }
 0x421   : > { %v3447_v0 = vpop.permute.xlu1 %3446 }
 0x422   : > { %3459 = vst.msk [vmem:[%s17727_s21] sm:$0xff] %vm3458_vm2, %v3447_v0 }
 0x423   : > { %v3453_v46 = vpop.permute.xlu0 %3452 }
 0x424   : > { %3462 = vst.msk [vmem:[%s17727_s21 + $0x18] sm:$0xff] %vm3458_vm2, %v3453_v46 }
 0x425   : > { %v3451_v18 = vpop.permute.xlu1 %3450 }
 0x426   : > { %3461 = vst.msk [vmem:[%s17727_s21 + $0x10] sm:$0xff] %vm3458_vm2, %v3451_v18 }
 0x43a   : > { %v13351_v56 = vpop.f32.mrb[16].mxu1 }
 0x43b   : > { %v14663_v36 = vadd.f32 %v13351_v56, %v17718_v15  ;;  %v7503_v43 = vpop.f32.mrb[17].mxu1 }
 0x43c   : > { %v14664_v61 = vadd.f32 %v7503_v43, %v17714_v38 }
 0x43d   : > { %7531 = vrot.lane.b32.xlu0 %v14663_v36, %s15354_s23 }
 0x43e   : > { %v13354_v59 = vpop.f32.mrb[18].mxu1  ;;  %7529 = vrot.lane.b32.xlu1 %v14664_v61, %s15354_s23 }
 0x43f   : > { %v14665_v55 = vadd.f32 %v13354_v59, %v17732_v17  ;;  %v7515_v28 = vpop.f32.mrb[19].mxu1 }
 0x440   : > { %v14666_v42 = vadd.f32 %v7515_v28, %v17725_v45 }
 0x441   : > { %7535 = vrot.lane.b32.xlu0 %v14665_v55, %s15354_s23 }
 0x442   : > { %7533 = vrot.lane.b32.xlu1 %v14666_v42, %s15354_s23  ;;  %s15264_s23 = scalar_lea.vmem %s17926_s12, 512 }
 0x443   : > { %p15265_p12 = scmp.ne.s32.totalorder %s17926_s12, %s15264_s23 }
 0x445   : > { %p15266_p13 = pnand %p15265_p12, %p15445_p4 }
 0x447   : > { %p15267_p0 = pneg %p15266_p13 }
 0x44f   : > { %v4810_v48 = vpop.permute.xlu0 %4809 }
 0x450   : > { %4821 = vst.msk [vmem:[%s17727_s21 + $0x8] sm:$0xff] %vm4819_vm3, %v4810_v48 }
 0x451   : > { %v4808_v33 = vpop.permute.xlu1 %4807 }
 0x452   : > { %4820 = vst.msk [vmem:[%s17727_s21] sm:$0xff] %vm4819_vm3, %v4808_v33 }
 0x453   : > { %v4814_v20 = vpop.permute.xlu0 %4813 }
 0x454   : > { %4823 = vst.msk [vmem:[%s17727_s21 + $0x18] sm:$0xff] %vm4819_vm3, %v4814_v20 }
 0x455   : > { %v4812_v4 = vpop.permute.xlu1 %4811 }
 0x456   : > { %4822 = vst.msk [vmem:[%s17727_s21 + $0x10] sm:$0xff] %vm4819_vm3, %v4812_v4 }
 0x46b   : > { %v13519_v60 = vpop.f32.mrb[20].mxu1 }
 0x46c   : > { %v14671_v3 = vadd.f32 %v13519_v60, %v17718_v15  ;;  %v8864_v26 = vpop.f32.mrb[21].mxu1 }
 0x46d   : > { %v14672_v19 = vadd.f32 %v8864_v26, %v17714_v38 }
 0x46e   : > { %8892 = vrot.lane.b32.xlu0 %v14671_v3, %s15355_s24 }
 0x46f   : > { %v13522_v35 = vpop.f32.mrb[22].mxu1  ;;  %8890 = vrot.lane.b32.xlu1 %v14672_v19, %s15355_s24 }
 0x470   : > { %v14673_v7 = vadd.f32 %v13522_v35, %v17732_v17  ;;  %v8876_v54 = vpop.f32.mrb[23].mxu1 }
 0x471   : > { %v14674_v44 = vadd.f32 %v8876_v54, %v17725_v45 }
 0x472   : > { %8896 = vrot.lane.b32.xlu0 %v14673_v7, %s15355_s24 }
 0x473   : > { %8894 = vrot.lane.b32.xlu1 %v14674_v44, %s15355_s24  ;;  %s15358_s24 = smov [#allocation2]  }
 0x47f   : > { %v6171_v1 = vpop.permute.xlu0 %6170 }
 0x480   : > { %6182 = vst.msk [vmem:[%s17727_s21 + $0x8] sm:$0xff] %vm6180_vm4, %v6171_v1  ;;  %v6169_v37 = vpop.permute.xlu1 %6168 }
 0x481   : > { %6181 = vst.msk [vmem:[%s17727_s21] sm:$0xff] %vm6180_vm4, %v6169_v37 }
 0x483   : > { %v6175_v13 = vpop.permute.xlu0 %6174 }
 0x484   : > { %6184 = vst.msk [vmem:[%s17727_s21 + $0x18] sm:$0xff] %vm6180_vm4, %v6175_v13  ;;  %v6173_v52 = vpop.permute.xlu1 %6172 }
 0x485   : > { %6183 = vst.msk [vmem:[%s17727_s21 + $0x10] sm:$0xff] %vm6180_vm4, %v6173_v52 }
 0x49b   : > { %v13687_v30 = vpop.f32.mrb[24].mxu1 }
 0x49c   : > { %v14679_v50 = vadd.f32 %v13687_v30, %v17718_v15  ;;  %v10225_v34 = vpop.f32.mrb[25].mxu1 }
 0x49d   : > { %v14680_v63 = vadd.f32 %v10225_v34, %v17714_v38 }
 0x49e   : > { %10253 = vrot.lane.b32.xlu0 %v14679_v50, %s15356_s25 }
 0x49f   : > { %v13690_v16 = vpop.f32.mrb[26].mxu1  ;;  %10251 = vrot.lane.b32.xlu1 %v14680_v63, %s15356_s25 }
 0x4a0   : > { %v14681_v29 = vadd.f32 %v13690_v16, %v17732_v17  ;;  %v10237_v25 = vpop.f32.mrb[27].mxu1 }
 0x4a1   : > { %v14682_v2 = vadd.f32 %v10237_v25, %v17725_v45 }
 0x4a2   : > { %10257 = vrot.lane.b32.xlu0 %v14681_v29, %s15356_s25 }
 0x4a3   : > { %10255 = vrot.lane.b32.xlu1 %v14682_v2, %s15356_s25  ;;  %s15268_s25 = sshll.u32 %s15358_s24, 4  ;;  %s15269_s25 = int_to_ptr.vmem [resolvable:$false] %s15268_s25 }
 0x4a4   : > { %p15271_p1 = scmp.lt.s32.totalorder %s17926_s12, %s15269_s25 }
 0x4af   : > { %v7532_v53 = vpop.permute.xlu0 %7531 }
 0x4b0   : > { %7543 = vst.msk [vmem:[%s17727_s21 + $0x8] sm:$0xff] %vm7541_vm5, %v7532_v53  ;;  %v7530_v32 = vpop.permute.xlu1 %7529 }
 0x4b1   : > { %7542 = vst.msk [vmem:[%s17727_s21] sm:$0xff] %vm7541_vm5, %v7530_v32 }
 0x4b3   : > { %v7536_v49 = vpop.permute.xlu0 %7535 }
 0x4b4   : > { %7545 = vst.msk [vmem:[%s17727_s21 + $0x18] sm:$0xff] %vm7541_vm5, %v7536_v49  ;;  %v7534_v6 = vpop.permute.xlu1 %7533 }
 0x4b5   : > { %7544 = vst.msk [vmem:[%s17727_s21 + $0x10] sm:$0xff] %vm7541_vm5, %v7534_v6 }
 0x4cb   : > { %v13855_v47 = vpop.f32.mrb[28].mxu1 }
 0x4cc   : > { %v14687_v10 = vadd.f32 %v13855_v47, %v17718_v15  ;;  %v11586_v14 = vpop.f32.mrb[29].mxu1 }
 0x4cd   : > { %v14688_v8 = vadd.f32 %v11586_v14, %v17714_v38 }
 0x4ce   : > { %11614 = vrot.lane.b32.xlu0 %v14687_v10, %s15357_s26 }
 0x4cf   : > { %v13858_v12 = vpop.f32.mrb[30].mxu1  ;;  %11612 = vrot.lane.b32.xlu1 %v14688_v8, %s15357_s26 }
 0x4d0   : > { %v14689_v21 = vadd.f32 %v13858_v12, %v17732_v17  ;;  %v11598_v41 = vpop.f32.mrb[31].mxu1 }
 0x4d1   : > { %v14690_v58 = vadd.f32 %v11598_v41, %v17725_v45 }
 0x4d2   : > { %11618 = vrot.lane.b32.xlu0 %v14689_v21, %s15357_s26 }
 0x4d3   : > { %11616 = vrot.lane.b32.xlu1 %v14690_v58, %s15357_s26  ;;  %s15270_s26 = scalar_lea.vmem %s15269_s25, 1024 }
 0x4d4   : > { %p15272_p2 = scmp.lt.s32.totalorder %s15270_s26, %s15264_s23 }
 0x4d6   : > { %p15273_p3 = por %p15272_p2, %p15271_p1 }
 0x4d8   : > { %p15274_p5 = pnand %p15273_p3, %p15267_p0 }
 0x4e0   : > { %v8893_v15 = vpop.permute.xlu0 %8892 }
 0x4e1   : > { %8904 = vst.msk [vmem:[%s17727_s21 + $0x8] sm:$0xff] %vm8902_vm6, %v8893_v15  ;;  %v8891_v38 = vpop.permute.xlu1 %8890 }
 0x4e2   : > { %8903 = vst.msk [vmem:[%s17727_s21] sm:$0xff] %vm8902_vm6, %v8891_v38 }
 0x4e4   : > { %v8897_v62 = vpop.permute.xlu0 %8896 }
 0x4e5   : > { %8906 = vst.msk [vmem:[%s17727_s21 + $0x18] sm:$0xff] %vm8902_vm6, %v8897_v62  ;;  %v8895_v24 = vpop.permute.xlu1 %8894 }
 0x4e6   : > { %8905 = vst.msk [vmem:[%s17727_s21 + $0x10] sm:$0xff] %vm8902_vm6, %v8895_v24 }
 0x510   : > { %v10254_v45 = vpop.permute.xlu0 %10253 }
 0x511   : > { %10265 = vst.msk [vmem:[%s17727_s21 + $0x8] sm:$0xff] %vm10263_vm7, %v10254_v45  ;;  %v10252_v17 = vpop.permute.xlu1 %10251 }
 0x512   : > { %10264 = vst.msk [vmem:[%s17727_s21] sm:$0xff] %vm10263_vm7, %v10252_v17 }
 0x514   : > { %v10258_v51 = vpop.permute.xlu0 %10257 }
 0x515   : > { %10267 = vst.msk [vmem:[%s17727_s21 + $0x18] sm:$0xff] %vm10263_vm7, %v10258_v51  ;;  %v10256_v22 = vpop.permute.xlu1 %10255 }
 0x516   : > { %10266 = vst.msk [vmem:[%s17727_s21 + $0x10] sm:$0xff] %vm10263_vm7, %v10256_v22 }
 0x540   : > { %v11615_v57 = vpop.permute.xlu0 %11614 }
 0x541   : > { %11626 = vst.msk [vmem:[%s17727_s21 + $0x8] sm:$0xff] %vm11624_vm8, %v11615_v57  ;;  %v11613_v9 = vpop.permute.xlu1 %11612 }
 0x542   : > { %11625 = vst.msk [vmem:[%s17727_s21] sm:$0xff] %vm11624_vm8, %v11613_v9 }
 0x544   : > { %v11619_v27 = vpop.permute.xlu0 %11618 }
 0x545   : > { %11628 = vst.msk [vmem:[%s17727_s21 + $0x18] sm:$0xff] %vm11624_vm8, %v11619_v27  ;;  %v11617_v23 = vpop.permute.xlu1 %11616 }
 0x546   : > { %11627 = vst.msk [vmem:[%s17727_s21 + $0x10] sm:$0xff] %vm11624_vm8, %v11617_v23 }
 0x547   : > { %15277 = shalt.err (!%p15274_p5)
}
 0x548   : > { %s15278_s14 = scalar_lea.hbm %s17924_s20, 512  ;;  %s15282_s16 = scalar_lea.hbm %s17987_s8, 1024 }
 0x549   : > { %p15279_p6 = scmp.ne.s32.totalorder %s17924_s20, %s15278_s14  ;;  %p15283_p10 = scmp.lt.u32.totalorder %s17924_s20, %s17987_s8 }
 0x54a   : > { %p15284_p11 = scmp.lt.u32.totalorder %s15282_s16, %s15278_s14  ;;  %p15286_p13 = scmp.lt.u32.totalorder %s15278_s14, %s17924_s20 }
 0x54b   : > { %p15280_p7 = pnand %p15279_p6, %p15445_p4 }
 0x54c   : > { %p15285_p12 = por %p15284_p11, %p15283_p10 }
 0x54d   : > { %p15281_p9 = pneg %p15280_p7 }
 0x54e   : > { %p15287_p0 = por %p15286_p13, %p15285_p12 }
 0x550   : > { %p15288_p1 = pnand %p15287_p0, %p15281_p9 }
 0x552   : > { %15291 = shalt.err (!%p15288_p1)
}
 0x553   : > { %s15359_s23 = smov 128  }
 0x554   : > { %15011 = dma.vmem_to_hbm [thread:$0]  (%p15445_p4), %s17926_s12, 512, %s17924_s20, %s17932_s30, %s15359_s23, %s15359_s23, %s15351_s22  }
 0x555 PF: > { %p15017_p2 = scmp.ge.s32.totalorder %s15342_s10, 2  ;;  %s11659_s25 = sand.u32 1, %s15322_s27  }
 0x556   : > { %s11660_s26 = scalar_lea.sflag [#allocation3], %s11659_s25 }
 0x557   : > { %p15014_p3 = pnand %p15017_p2, %p15452_p8 }
 0x559   : > { %15317 = dma.done.wait (!%p15014_p3), %s11660_s26, 512  }
 0x55a   : > { %15319 = vsyncadd (!%p15014_p3), %s11660_s26, 4294966784  ;;  %s21_s10 = sadd.s32 1, %s15342_s10   ;;  %s18403_s27 = smov %s15326_s28 }
 0x55b   : > { %p18_p5 = scmp.ge.s32.totalorder %s21_s10, 4   ;;  %s18404_s28 = smov %s15330_s29 }
 0x55c   : > { %s18405_s29 = smov %s15458_s18  ;;  %s18406_s30 = smov %s15338_s9 }
 0x55d   : > { %s18407_s9 = smov %s18409_s13  ;;  %20 = sbr.rel (!%p18_p5) target bundleno = 4 (0x4), region = 90 }
 0x564   :  { %11665 = vsyncpa [#allocation3], 1 }
 0x565   :  { %11667 = vsyncpa [#allocation3 + $0x1], 1 }

</bundles_post_ra>
